<compile_context>
chip_gen: v5e
topology: v5e:2x2
jax: 0.10.0
libtpu: 0.0.40
codegen_flags: <defaults>
</compile_context>

<pallas_src>
import functools

import jax
import jax.numpy as jnp
from jax.experimental import pallas as pl
from jax.experimental.pallas import tpu as pltpu


def _round_up(a, b):
    return (a + b - 1) // b * b


def _sigmoid(x):
    # exp and the approximate reciprocal both go to the EUP slot.
    return pl.reciprocal(1.0 + jnp.exp(-x), approx=True)


def mlp_kernel(x_ref, w1_ref, b1_ref, w2_ref, b2_ref, w3_ref, b3_ref,
               w4_ref, b4_ref, o_ref, *, tile_b):
    # first_layer + sigmoid  (bf16 MXU matmul, f32 accumulate)
    h = jnp.dot(x_ref[...].astype(jnp.bfloat16), w1_ref[...],
                preferred_element_type=jnp.float32)
    h = _sigmoid(h + b1_ref[...])
    # hidden layer 0 + sigmoid
    h = jnp.dot(h.astype(jnp.bfloat16), w2_ref[...],
                preferred_element_type=jnp.float32)
    h = _sigmoid(h + b2_ref[...])
    # hidden layer 1 + sigmoid
    h = jnp.dot(h.astype(jnp.bfloat16), w3_ref[...],
                preferred_element_type=jnp.float32)
    h = _sigmoid(h + b3_ref[...])
    # last_layer: 1-wide matmul done as broadcast-mul + lane reduce (VPU/XLU)
    rating = jnp.sum(h * w4_ref[...], axis=-1) + b4_ref[0, 0]
    # lane-dense store: one full (1, 1, tile_b) block per grid step
    o_ref[...] = rating.reshape(1, 1, tile_b).astype(o_ref.dtype)


def mlp_forward(x, params, *, tile_b=256):
    """x: (N, emsize) float32.  Returns rating of shape (N,)."""
    (w1, b1), (w2, b2), (w3, b3), (w4, b4) = params
    N, E = x.shape
    H = w1.shape[1]
    assert tile_b % 128 == 0, "tile_b must be a multiple of 128 (lane-dense)"

    # ---- weight preparation (done once, outside the kernel) ----
    # Pad the hidden dim to a multiple of 128 so all weight tiles are aligned.
    Hp = _round_up(H, 128)
    pc = Hp - H

    w1p = jnp.pad(w1, ((0, 0), (0, pc))).astype(jnp.bfloat16)       # (E, Hp)
    b1p = jnp.pad(b1, (0, pc)).reshape(1, Hp).astype(jnp.float32)
    w2p = jnp.pad(w2, ((0, pc), (0, pc))).astype(jnp.bfloat16)      # (Hp, Hp)
    b2p = jnp.pad(b2, (0, pc)).reshape(1, Hp).astype(jnp.float32)
    w3p = jnp.pad(w3, ((0, pc), (0, pc))).astype(jnp.bfloat16)      # (Hp, Hp)
    b3p = jnp.pad(b3, (0, pc)).reshape(1, Hp).astype(jnp.float32)
    # last layer as a (1, Hp) f32 row for the VPU/XLU reduction
    w4p = jnp.pad(w4.reshape(H, 1).T, ((0, 0), (0, pc))).astype(jnp.float32)
    b4p = b4.reshape(1, 1).astype(jnp.float32)

    # ---- batch padding (padded rows are sliced off at the end) ----
    n_tiles = pl.cdiv(N, tile_b)
    Np = n_tiles * tile_b
    xp = jnp.pad(x, ((0, Np - N), (0, 0)))

    resident = lambda shape: pl.BlockSpec(shape, lambda i: (0,) * len(shape))

    out = pl.pallas_call(
        functools.partial(mlp_kernel, tile_b=tile_b),
        out_shape=jax.ShapeDtypeStruct((n_tiles, 1, tile_b), jnp.float32),
        grid_spec=pltpu.PrefetchScalarGridSpec(
            num_scalar_prefetch=0,
            grid=(n_tiles,),
            in_specs=[
                pl.BlockSpec((tile_b, E), lambda i: (i, 0)),   # x batch tile
                resident((E, Hp)), resident((1, Hp)),          # first_layer
                resident((Hp, Hp)), resident((1, Hp)),         # layers[0]
                resident((Hp, Hp)), resident((1, Hp)),         # layers[1]
                resident((1, Hp)), resident((1, 1)),           # last_layer
            ],
            out_specs=pl.BlockSpec((1, 1, tile_b), lambda i: (i, 0, 0)),
        ),
        compiler_params=pltpu.CompilerParams(
            dimension_semantics=("parallel",)),
    )(xp, w1p, b1p, w2p, b2p, w3p, b3p, w4p, b4p)

    # lane-dense (n_tiles, 1, tile_b) -> flat (Np,) -> (N,)
    # (matches torch.squeeze on the (N, 1) rating for N > 1)
    return out.reshape(Np)[:N]


def init_mlp_params(key, emsize, hidden_size=400, num_layers=2):
    """Matches MLP.init_weights(): weights ~ U(-0.1, 0.1), biases = 0.
    Weights are stored transposed (in, out) relative to nn.Linear."""
    initrange = 0.1
    keys = jax.random.split(key, num_layers + 2)

    def lin(k, fan_in, fan_out):
        # nn.Linear weight is (out, in); sample that then transpose.
        w = jax.random.uniform(k, (fan_out, fan_in), jnp.float32,
                               -initrange, initrange)
        b = jnp.zeros((fan_out,), jnp.float32)
        return w.T, b

    first = lin(keys[0], emsize, hidden_size)
    mid0 = lin(keys[1], hidden_size, hidden_size)
    mid1 = lin(keys[2], hidden_size, hidden_size)
    last = lin(keys[3], hidden_size, 1)
    return (first, mid0, mid1, last)


def mlp_reference(x, params):
    """Pure-JAX f32 reference for correctness checking."""
    (w1, b1), (w2, b2), (w3, b3), (w4, b4) = params
    h = jax.nn.sigmoid(x @ w1 + b1)
    h = jax.nn.sigmoid(h @ w2 + b2)
    h = jax.nn.sigmoid(h @ w3 + b3)
    return jnp.squeeze(h @ w4 + b4)


if __name__ == "__main__":
    key = jax.random.PRNGKey(0)
    k_param, k_x = jax.random.split(key)

    # small shapes; batch deliberately not a multiple of tile_b to exercise
    # the cdiv + padding path.
    batch, emsize, hidden = 200, 32, 400
    params = init_mlp_params(k_param, emsize, hidden_size=hidden, num_layers=2)
    x = jax.random.normal(k_x, (batch, emsize), jnp.float32)

    rating = mlp_forward(x, params, tile_b=128)
    rating = jax.block_until_ready(rating)

    ref = mlp_reference(x, params)
    assert rating.shape == (batch,), rating.shape
    # bf16 matmul operands + approx reciprocal -> loosened tolerance vs f32 ref
    err = float(jnp.max(jnp.abs(rating - ref)))
    assert err < 3e-2, err

    print("KERNEL_OK")
</pallas_src>

<mosaic_0001>
module attributes {stable_mosaic.version = 11 : i64} {
  func.func @mlp_kernel(%arg0: i32, %arg1: memref<128x32xf32, #tpu.memory_space<vmem>>, %arg2: memref<32x512xbf16, #tpu.memory_space<vmem>>, %arg3: memref<1x512xf32, #tpu.memory_space<vmem>>, %arg4: memref<512x512xbf16, #tpu.memory_space<vmem>>, %arg5: memref<1x512xf32, #tpu.memory_space<vmem>>, %arg6: memref<512x512xbf16, #tpu.memory_space<vmem>>, %arg7: memref<1x512xf32, #tpu.memory_space<vmem>>, %arg8: memref<1x512xf32, #tpu.memory_space<vmem>>, %arg9: memref<1x1xf32, #tpu.memory_space<vmem>>, %arg10: memref<1x1x128xf32, #tpu.memory_space<vmem>>) attributes {dimension_semantics = [#tpu.dimension_semantics<parallel>], iteration_bounds = array<i64: 2>, scalar_prefetch = 0 : i64, scratch_operands = 0 : i64, tpu.core_type = #tpu.core_type<tc>, window_params = [{transform_indices = @transform_0, window_bounds = array<i64: 128, 32>}, {pipeline_mode = #tpu.pipeline_mode<synchronous>, transform_indices = @transform_1, window_bounds = array<i64: 32, 512>}, {pipeline_mode = #tpu.pipeline_mode<synchronous>, transform_indices = @transform_2, window_bounds = array<i64: 1, 512>}, {pipeline_mode = #tpu.pipeline_mode<synchronous>, transform_indices = @transform_3, window_bounds = array<i64: 512, 512>}, {pipeline_mode = #tpu.pipeline_mode<synchronous>, transform_indices = @transform_4, window_bounds = array<i64: 1, 512>}, {pipeline_mode = #tpu.pipeline_mode<synchronous>, transform_indices = @transform_5, window_bounds = array<i64: 512, 512>}, {pipeline_mode = #tpu.pipeline_mode<synchronous>, transform_indices = @transform_6, window_bounds = array<i64: 1, 512>}, {pipeline_mode = #tpu.pipeline_mode<synchronous>, transform_indices = @transform_7, window_bounds = array<i64: 1, 512>}, {pipeline_mode = #tpu.pipeline_mode<synchronous>, transform_indices = @transform_8, window_bounds = array<i64: 1, 1>}, {transform_indices = @transform_9, window_bounds = array<i64: 1, 1, 128>}]} {
    %c0 = arith.constant 0 : index
    %c0_0 = arith.constant 0 : index
    %0 = vector.load %arg1[%c0, %c0_0] : memref<128x32xf32, #tpu.memory_space<vmem>>, vector<128x32xf32>
    %1 = arith.truncf %0 : vector<128x32xf32> to vector<128x32xbf16>
    %c0_1 = arith.constant 0 : index
    %c0_2 = arith.constant 0 : index
    %2 = vector.load %arg2[%c0_1, %c0_2] : memref<32x512xbf16, #tpu.memory_space<vmem>>, vector<32x512xbf16>
    %cst = arith.constant dense<0.000000e+00> : vector<128x512xf32>
    %3 = tpu.matmul %1, %2, %cst {dimension_numbers = #tpu.dot_dimension_numbers<[1], [0], [0], [1], [0, 0, 1, 1], [], []>} : vector<128x32xbf16>, vector<32x512xbf16>, vector<128x512xf32> -> vector<128x512xf32>
    %c0_3 = arith.constant 0 : index
    %c0_4 = arith.constant 0 : index
    %4 = vector.load %arg3[%c0_3, %c0_4] : memref<1x512xf32, #tpu.memory_space<vmem>>, vector<1x512xf32>
    %5 = vector.broadcast %4 : vector<1x512xf32> to vector<128x512xf32>
    %6 = arith.addf %3, %5 : vector<128x512xf32>
    %cst_5 = arith.constant 0.000000e+00 : f32
    %7 = vector.broadcast %cst_5 : f32 to vector<128x512xf32>
    %8 = arith.subf %7, %6 : vector<128x512xf32>
    %9 = math.exp %8 : vector<128x512xf32>
    %cst_6 = arith.constant 1.000000e+00 : f32
    %10 = vector.broadcast %cst_6 : f32 to vector<128x512xf32>
    %11 = arith.addf %10, %9 : vector<128x512xf32>
    %12 = tpu.reciprocal %11 {approx = true} : vector<128x512xf32> -> vector<128x512xf32>
    %13 = arith.truncf %12 : vector<128x512xf32> to vector<128x512xbf16>
    %c0_7 = arith.constant 0 : index
    %c0_8 = arith.constant 0 : index
    %14 = vector.load %arg4[%c0_7, %c0_8] : memref<512x512xbf16, #tpu.memory_space<vmem>>, vector<512x512xbf16>
    %cst_9 = arith.constant dense<0.000000e+00> : vector<128x512xf32>
    %15 = tpu.matmul %13, %14, %cst_9 {dimension_numbers = #tpu.dot_dimension_numbers<[1], [0], [0], [1], [0, 0, 1, 1], [], []>} : vector<128x512xbf16>, vector<512x512xbf16>, vector<128x512xf32> -> vector<128x512xf32>
    %c0_10 = arith.constant 0 : index
    %c0_11 = arith.constant 0 : index
    %16 = vector.load %arg5[%c0_10, %c0_11] : memref<1x512xf32, #tpu.memory_space<vmem>>, vector<1x512xf32>
    %17 = vector.broadcast %16 : vector<1x512xf32> to vector<128x512xf32>
    %18 = arith.addf %15, %17 : vector<128x512xf32>
    %cst_12 = arith.constant 0.000000e+00 : f32
    %19 = vector.broadcast %cst_12 : f32 to vector<128x512xf32>
    %20 = arith.subf %19, %18 : vector<128x512xf32>
    %21 = math.exp %20 : vector<128x512xf32>
    %cst_13 = arith.constant 1.000000e+00 : f32
    %22 = vector.broadcast %cst_13 : f32 to vector<128x512xf32>
    %23 = arith.addf %22, %21 : vector<128x512xf32>
    %24 = tpu.reciprocal %23 {approx = true} : vector<128x512xf32> -> vector<128x512xf32>
    %25 = arith.truncf %24 : vector<128x512xf32> to vector<128x512xbf16>
    %c0_14 = arith.constant 0 : index
    %c0_15 = arith.constant 0 : index
    %26 = vector.load %arg6[%c0_14, %c0_15] : memref<512x512xbf16, #tpu.memory_space<vmem>>, vector<512x512xbf16>
    %cst_16 = arith.constant dense<0.000000e+00> : vector<128x512xf32>
    %27 = tpu.matmul %25, %26, %cst_16 {dimension_numbers = #tpu.dot_dimension_numbers<[1], [0], [0], [1], [0, 0, 1, 1], [], []>} : vector<128x512xbf16>, vector<512x512xbf16>, vector<128x512xf32> -> vector<128x512xf32>
    %c0_17 = arith.constant 0 : index
    %c0_18 = arith.constant 0 : index
    %28 = vector.load %arg7[%c0_17, %c0_18] : memref<1x512xf32, #tpu.memory_space<vmem>>, vector<1x512xf32>
    %29 = vector.broadcast %28 : vector<1x512xf32> to vector<128x512xf32>
    %30 = arith.addf %27, %29 : vector<128x512xf32>
    %cst_19 = arith.constant 0.000000e+00 : f32
    %31 = vector.broadcast %cst_19 : f32 to vector<128x512xf32>
    %32 = arith.subf %31, %30 : vector<128x512xf32>
    %33 = math.exp %32 : vector<128x512xf32>
    %cst_20 = arith.constant 1.000000e+00 : f32
    %34 = vector.broadcast %cst_20 : f32 to vector<128x512xf32>
    %35 = arith.addf %34, %33 : vector<128x512xf32>
    %36 = tpu.reciprocal %35 {approx = true} : vector<128x512xf32> -> vector<128x512xf32>
    %c0_21 = arith.constant 0 : index
    %c0_22 = arith.constant 0 : index
    %37 = vector.load %arg8[%c0_21, %c0_22] : memref<1x512xf32, #tpu.memory_space<vmem>>, vector<1x512xf32>
    %38 = vector.broadcast %37 : vector<1x512xf32> to vector<128x512xf32>
    %39 = arith.mulf %36, %38 : vector<128x512xf32>
    %cst_23 = arith.constant dense<0.000000e+00> : vector<128xf32>
    %40 = vector.multi_reduction <add>, %39, %cst_23 [1] : vector<128x512xf32> to vector<128xf32>
    %c0_24 = arith.constant 0 : index
    %c0_25 = arith.constant 0 : index
    %41 = vector.load %arg9[%c0_24, %c0_25] : memref<1x1xf32, #tpu.memory_space<vmem>>, vector<1x1xf32>
    %42 = vector.extract %41[0, 0] : f32 from vector<1x1xf32>
    %43 = vector.broadcast %42 : f32 to vector<128xf32>
    %44 = arith.addf %40, %43 : vector<128xf32>
    %45 = vector.shape_cast %44 : vector<128xf32> to vector<1x1x128xf32>
    %c0_26 = arith.constant 0 : index
    %c0_27 = arith.constant 0 : index
    %c0_28 = arith.constant 0 : index
    %46 = vector.load %arg10[%c0_26, %c0_27, %c0_28] : memref<1x1x128xf32, #tpu.memory_space<vmem>>, vector<1x1x128xf32>
    tpu.vector_store %arg10[%c0_26, %c0_27, %c0_28], %45 {strides = array<i32>} : memref<1x1x128xf32, #tpu.memory_space<vmem>>, vector<1x1x128xf32>,
    return
  }
  func.func @transform_0(%arg0: i32) -> (i32, i32) {
    %c0_i32 = arith.constant 0 : i32
    %c0_i32_0 = arith.constant 0 : i32
    return %arg0, %c0_i32 : i32, i32
  }
  func.func @transform_1(%arg0: i32) -> (i32, i32) {
    %c0_i32 = arith.constant 0 : i32
    %c0_i32_0 = arith.constant 0 : i32
    %c0_i32_1 = arith.constant 0 : i32
    return %c0_i32, %c0_i32_0 : i32, i32
  }
  func.func @transform_2(%arg0: i32) -> (i32, i32) {
    %c0_i32 = arith.constant 0 : i32
    %c0_i32_0 = arith.constant 0 : i32
    %c0_i32_1 = arith.constant 0 : i32
    return %c0_i32, %c0_i32_0 : i32, i32
  }
  func.func @transform_3(%arg0: i32) -> (i32, i32) {
    %c0_i32 = arith.constant 0 : i32
    %c0_i32_0 = arith.constant 0 : i32
    %c0_i32_1 = arith.constant 0 : i32
    return %c0_i32, %c0_i32_0 : i32, i32
  }
  func.func @transform_4(%arg0: i32) -> (i32, i32) {
    %c0_i32 = arith.constant 0 : i32
    %c0_i32_0 = arith.constant 0 : i32
    %c0_i32_1 = arith.constant 0 : i32
    return %c0_i32, %c0_i32_0 : i32, i32
  }
  func.func @transform_5(%arg0: i32) -> (i32, i32) {
    %c0_i32 = arith.constant 0 : i32
    %c0_i32_0 = arith.constant 0 : i32
    %c0_i32_1 = arith.constant 0 : i32
    return %c0_i32, %c0_i32_0 : i32, i32
  }
  func.func @transform_6(%arg0: i32) -> (i32, i32) {
    %c0_i32 = arith.constant 0 : i32
    %c0_i32_0 = arith.constant 0 : i32
    %c0_i32_1 = arith.constant 0 : i32
    return %c0_i32, %c0_i32_0 : i32, i32
  }
  func.func @transform_7(%arg0: i32) -> (i32, i32) {
    %c0_i32 = arith.constant 0 : i32
    %c0_i32_0 = arith.constant 0 : i32
    %c0_i32_1 = arith.constant 0 : i32
    return %c0_i32, %c0_i32_0 : i32, i32
  }
  func.func @transform_8(%arg0: i32) -> (i32, i32) {
    %c0_i32 = arith.constant 0 : i32
    %c0_i32_0 = arith.constant 0 : i32
    %c0_i32_1 = arith.constant 0 : i32
    return %c0_i32, %c0_i32_0 : i32, i32
  }
  func.func @transform_9(%arg0: i32) -> (i32, i32, i32) {
    %c0_i32 = arith.constant 0 : i32
    %c0_i32_0 = arith.constant 0 : i32
    %c0_i32_1 = arith.constant 0 : i32
    return %arg0, %c0_i32, %c0_i32_0 : i32, i32, i32
  }
}

</mosaic_0001>

<bundles_post_ra>
// kernel: tpu_custom_call.1
= control target key start
LH: loop header
LB: loop body
LE: loop exit
PB: predicated region body
PF: predicated region fallthrough
CT: control target
= control target key end

     0   :  { %s8816_s0 = inlined_call_operand.vmem [shape: f32[256,32], index: 0, kind: input, shape index: {}]   ;;  %s8817_s1 = inlined_call_operand.vmem [shape: bf16[32,512], index: 1, kind: input, shape index: {}]   ;;  %s8818_s2 = inlined_call_operand.vmem [shape: f32[1,512], index: 2, kind: input, shape index: {}]   ;;  %s8819_s3 = inlined_call_operand.hbm [shape: bf16[512,512], index: 3, kind: input, shape index: {}]   ;;  %s8820_s4 = inlined_call_operand.vmem [shape: f32[1,512], index: 4, kind: input, shape index: {}]   ;;  %s8821_s5 = inlined_call_operand.hbm [shape: bf16[512,512], index: 5, kind: input, shape index: {}]   ;;  %s8822_s6 = inlined_call_operand.vmem [shape: f32[1,512], index: 6, kind: input, shape index: {}]   ;;  %s8823_s7 = inlined_call_operand.vmem [shape: f32[1,512], index: 7, kind: input, shape index: {}]   ;;  %s8824_s8 = inlined_call_operand.<no memory space> [shape: f32[1,1], index: 8, kind: input, shape index: {}]   ;;  %s8825_s9 = inlined_call_operand.hbm [shape: f32[2,1,128], index: 9, kind: output, shape index: {}]  }
   0x1   :  { %v14_v0 = vstv %s8824_s8 }
   0x2   :  { %15 = vst [vmem:[#allocation2] sm:$0x1] %v14_v0 }
   0x3   :  { %16 = vsyncpa [#allocation4], 0 }
   0x4   :  { %17 = vsyncpa [#allocation7], 0 }
   0x5   :  { %18 = vsyncpa [#allocation5], 0 }
   0x6   :  { %20 = vsyncpa [#allocation5 + $0x1], 0  ;;  %s7552_s11 = smov 0   ;;  %s7554_s12 = smov 0  }
   0x7   :  { %s7556_s13 = smov 0   ;;  %s7558_s14 = smov 0  }
   0x8 LB: > { %s7573_s8 = sadd.s32 4294967295, %s7493_s14   ;;  %s5164_s15 = sadd.s32 4294967294, %s7493_s14   ;;  %s7493_s14 = sphi %s7558_s14, %s8893_s14   ;;  %s7489_s13 = sphi %s7556_s13, %s8892_s13   ;;  %s7485_s12 = sphi %s7554_s12, %s8891_s12   ;;  %s7481_s11 = sphi %s7552_s11, %s8890_s11  }
   0x9   : > { %s7577_s16 = sadd.s32 1, %s7493_s14   ;;  %s227_s17 = sadd.s32 1, %s7489_s13 }
   0xa   : > { %s224_s18 = ssub.s32 %s7493_s14, %s7577_s16  ;;  %p237_p0 = scmp.ne.s32.totalorder %s7489_s13, %s7485_s12 }
   0xb   : > { %p225_p1 = scmp.eq.s32.totalorder %s224_s18, 0  ;;  %p238_p2 = scmp.eq.s32.totalorder %s7573_s8, 1 }
   0xc   : > { %p243_p3 = scmp.ne.s32.totalorder %s7485_s12, %s7481_s11  ;;  %p244_p4 = scmp.eq.s32.totalorder %s5164_s15, 1 }
   0xd   : > { %s7588_s19 = scalar_select %p225_p1, %s7489_s13, %s227_s17  }
   0xe   : > { %p7590_p5 = por %p238_p2, %p237_p0  ;;  %p7594_p6 = por %p244_p4, %p243_p3 }
   0xf   : > { %p5165_p7 = scmp.ge.s32.totalorder %s7493_s14, 1  ;;  %p251_p8 = scmp.lt.s32.totalorder %s7493_s14, 3 }
  0x10   : > { %p6551_p9 = scmp.eq.s32.totalorder %s7573_s8, 0  ;;  %s268_s25 = sshll.u32 %s8819_s3, 4  ;;  %s269_s25 = int_to_ptr.hbm [resolvable:$true] %s268_s25 }
  0x11   : > { %p7601_p10 = pnand %p5165_p7, %p251_p8  ;;  %s7495_s26 = smov [#allocation3]  }
  0x12   : > { %s270_s27 = sshll.u32 %s7495_s26, 4  ;;  %s285_s30 = sshll.u32 %s8821_s5, 4  ;;  %s271_s27 = int_to_ptr.vmem [resolvable:$true] %s270_s27  ;;  %s286_s30 = int_to_ptr.hbm [resolvable:$true] %s285_s30 }
  0x13   : > { %p6540_p11 = pneg %p7601_p10  ;;  %s7496_s10 = smov 256  }
  0x14   : > { %s7497_s15 = smov 16   ;;  %s7498_s17 = smov [#allocation6]  }
  0x15   : > { %p6541_p12 = pnand %p6551_p9, %p6540_p11  ;;  %s287_s18 = sshll.u32 %s7498_s17, 4  ;;  %s288_s18 = int_to_ptr.vmem [resolvable:$true] %s287_s18 }
  0x16   : > { %321 = sbr.rel (%p7601_p10) target bundleno = 1546 (0x60a), region = 56 }
  0x17   : > { %6543 = dma.hbm_to_vmem [thread:$0]  (!%p6541_p12), %s269_s25, 16384, %s271_s27, [#allocation4], %s7496_s10, %s7496_s10, %s7497_s15  }
  0x18   : > { %6546 = dma.hbm_to_vmem [thread:$0]  (!%p6541_p12), %s286_s30, 16384, %s288_s18, [#allocation7], %s7496_s10, %s7496_s10, %s7497_s15  }
  0x1b   : > { %7468 = dma.done.wait (%p6551_p9), [#allocation4], 16384  }
  0x1c   : > { %7470 = vsyncadd (%p6551_p9), [#allocation4], 4294950912 }
  0x1d   : > { %7472 = dma.done.wait (%p6551_p9), [#allocation7], 16384  }
  0x1e   : > { %7474 = vsyncadd (%p6551_p9), [#allocation7], 4294950912  ;;  %s5172_s23 = sshll.u32 %s7573_s8, 4  ;;  %v5192_v1 = vld [vmem:[%s8817_s1 + $0x20] sm:$0xf]  ;;  %vm451_vm0 = vcmask 261120  }
  0x1f   : > { %p363_p13 = scmp.lt.s32.totalorder %s5172_s23, 31  ;;  %v6270_v2 = vld [vmem:[%s8817_s1 + $0x2c] sm:$0xf0]  ;;  %v6268_v3 = vld [vmem:[%s8817_s1 + $0x24] sm:$0xf]  ;;  %vm5014_vm1 = vcmask 130112  }
  0x20   : > { %v5193_v4 = vor.u32 %v6270_v2, %v5192_v1  ;;  %v5194_v5 = vld [vmem:[%s8817_s1 + $0x30] sm:$0xf0]  ;;  %v5200_v6 = vld [vmem:[%s8817_s1 + $0x28] sm:$0xf]  ;;  %v6271_v7 = vld [vmem:[%s8817_s1 + $0x34] sm:$0xf0] }
  0x21   : > { %s8895_s23 = smov (!%p363_p13, %s5172_s23), 31  ;;  %v5197_v8 = vor.u32 %v6268_v3, %v5194_v5  ;;  %v5201_v9 = vor.u32 %v6271_v7, %v5200_v6  ;;  %v6269_v10 = vld [vmem:[%s8817_s1 + $0x2c] sm:$0xf]  ;;  %v5202_v11 = vld [vmem:[%s8817_s1 + $0x38] sm:$0xf0]  ;;  %vm5018_vm2 = vcmask 195712  }
  0x22   : > { %s5173_s24 = sshll.u32 %s8895_s23, 3  ;;  %v5176_v12 = vld [vmem:[%s8817_s1] sm:$0xf]  ;;  %482 = vmatpush.bf16.msra.mxu0 %v5193_v4  ;;  %v5205_v13 = vor.u32 %v6269_v10, %v5202_v11  ;;  %v6266_v14 = vld [vmem:[%s8817_s1 + $0xc] sm:$0xf0]  ;;  %vm5022_vm3 = vcmask 261312  }
  0x23   : > { %s7656_s15 = scalar_lea.vmem %s8816_s0, %s5173_s24  ;;  %v6264_v15 = vld [vmem:[%s8817_s1 + $0x4] sm:$0xf]  ;;  %v5178_v16 = vld [vmem:[%s8817_s1 + $0x10] sm:$0xf0]  ;;  %531 = vmatpush.bf16.msra.mxu1 %v5197_v8  ;;  %580 = vmatpush.bf16.msra.mxu2 %v5201_v9  ;;  %v5177_v17 = vor.u32 %v6266_v14, %v5176_v12  ;;  %v5184_v19 = vld [vmem:[%s8817_s1 + $0x8] sm:$0xf]  ;;  %s5083_s24 = scalar_lea.hbm %s8825_s9, %s7573_s8 }
  0x24   : > { %v5181_v18 = vor.u32 %v6264_v15, %v5178_v16  ;;  %v6267_v20 = vld [vmem:[%s8817_s1 + $0x14] sm:$0xf0]  ;;  %v6265_v21 = vld [vmem:[%s8817_s1 + $0xc] sm:$0xf]  ;;  %629 = vmatpush.bf16.msra.mxu3 %v5205_v13  ;;  %v5186_v23 = vld [vmem:[%s8817_s1 + $0x18] sm:$0xf0] }
  0x25   : > { %v5185_v22 = vor.u32 %v6267_v20, %v5184_v19  ;;  %v369_v24 = vld [vmem:[%s7656_s15] sm:$0xff]  ;;  %v370_v25 = vld [vmem:[%s7656_s15 + $0x8] sm:$0xff]  ;;  %v5189_v26 = vor.u32 %v6265_v21, %v5186_v23  ;;  %v6366_v29 = vld [vmem:[#allocation3 + $0x2ec] sm:$0xf0]  ;;  %vm5026_vm4 = vcmask 326912   ;;  %vm5030_vm5 = vcmask 392512  }
  0x26   : > { %v385_v27 = vpack.c.bf16 %v370_v25, %v369_v24  ;;  %483 = vmatpush.bf16.msra.mxu0 %v5177_v17  ;;  %v5608_v28 = vld [vmem:[#allocation3 + $0x2e0] sm:$0xf]  ;;  %v6302_v32 = vld [vmem:[#allocation3 + $0xec] sm:$0xf0]  ;;  %v372_v41 = vld [vmem:[%s7656_s15 + $0x18] sm:$0xff]  ;;  %vm5034_vm6 = vcmask 458112  }
  0x27   : > { %532 = vmatpush.bf16.msra.mxu1 %v5181_v18  ;;  %581 = vmatpush.bf16.msra.mxu2 %v5185_v22  ;;  %v5352_v30 = vld [vmem:[#allocation3 + $0xe0] sm:$0xf]  ;;  %v5609_v31 = vor.u32 %v6366_v29, %v5608_v28  ;;  %v6398_v34 = vld [vmem:[#allocation3 + $0x3ec] sm:$0xf0]  ;;  %v374_v56 = vld [vmem:[%s7656_s15 + $0x28] sm:$0xff]  ;;  %vm5038_vm7 = vcmask 523712  }
  0x28   : > { %630 = vmatpush.bf16.msra.mxu3 %v5189_v26  ;;  %v5736_v33 = vld [vmem:[#allocation3 + $0x3e0] sm:$0xf]  ;;  %v5353_v35 = vor.u32 %v6302_v32, %v5352_v30  ;;  %v6334_v38 = vld [vmem:[#allocation3 + $0x1ec] sm:$0xf0]  ;;  %v376_v7 = vld [vmem:[%s7656_s15 + $0x38] sm:$0xff]  ;;  %vm5042_vm8 = vcmask 589312  }
  0x29   : > { %5206 = vmatmul.msk.bf16.vlgmr.msra.gmra.mxu0 %vm451_vm0, %v385_v27  ;;  %v5737_v36 = vor.u32 %v6398_v34, %v5736_v33  ;;  %v5480_v37 = vld [vmem:[#allocation3 + $0x1e0] sm:$0xf]  ;;  %v371_v40 = vld [vmem:[%s7656_s15 + $0x10] sm:$0xff]  ;;  %v378_v22 = vld [vmem:[%s7656_s15 + $0x48] sm:$0xff]  ;;  %vm5046_vm9 = vcmask 654912   ;;  %vm5050_vm10 = vcmask 720512  }
  0x2a   : > { %5214 = vmatmul.msk.bf16.vlgmr.msra.gmra.mxu1 %vm451_vm0, %v385_v27  ;;  %5222 = vmatmul.msk.bf16.vlgmr.msra.gmra.mxu2 %vm451_vm0, %v385_v27  ;;  %v5481_v39 = vor.u32 %v6334_v38, %v5480_v37  ;;  %v386_v42 = vpack.c.bf16 %v372_v41, %v371_v40  ;;  %v5592_v43 = vld [vmem:[#allocation3 + $0x2c0] sm:$0xf]  ;;  %v6362_v44 = vld [vmem:[#allocation3 + $0x2cc] sm:$0xf0]  ;;  %v380_v37 = vld [vmem:[%s7656_s15 + $0x58] sm:$0xff]  ;;  %vm5054_vm11 = vcmask 786112  }
  0x2b   : > { %5230 = vmatmul.msk.bf16.vlgmr.msra.gmra.mxu3 %vm451_vm0, %v385_v27  ;;  %1900 = vmatpush.bf16.msrb.mxu2 %v5609_v31  ;;  %v5336_v45 = vld [vmem:[#allocation3 + $0xc0] sm:$0xf]  ;;  %v5593_v46 = vor.u32 %v6362_v44, %v5592_v43  ;;  %v6298_v47 = vld [vmem:[#allocation3 + $0xcc] sm:$0xf0]  ;;  %vm5058_vm12 = vcmask 851712   ;;  %vm5062_vm13 = vcmask 917312  }
  0x2c   : > { %1802 = vmatpush.bf16.msrb.mxu0 %v5353_v35  ;;  %1949 = vmatpush.bf16.msrb.mxu3 %v5737_v36  ;;  %v5720_v48 = vld [vmem:[#allocation3 + $0x3c0] sm:$0xf]  ;;  %v6394_v49 = vld [vmem:[#allocation3 + $0x3cc] sm:$0xf0]  ;;  %v5337_v50 = vor.u32 %v6298_v47, %v5336_v45  ;;  %vm5066_vm14 = vcmask 982912   ;;  %s5087_s8 = sshll.u32 %s5083_s24, 4  ;;  %s5088_s8 = int_to_ptr.hbm [resolvable:$true] %s5087_s8 }
  0x2d   : > { %1851 = vmatpush.bf16.msrb.mxu1 %v5481_v39  ;;  %v5721_v51 = vor.u32 %v6394_v49, %v5720_v48  ;;  %v5464_v52 = vld [vmem:[#allocation3 + $0x1c0] sm:$0xf]  ;;  %v6330_v53 = vld [vmem:[#allocation3 + $0x1cc] sm:$0xf0]  ;;  %vm5070_vm15 = vcmask 1048512   ;;  %s7437_s30 = sshra.s32 %s5088_s8, 4  ;;  %s7438_s30 = int_to_ptr.hbm [resolvable:$true] %s7437_s30 }
  0x2e   : > { %v5465_v54 = vor.u32 %v6330_v53, %v5464_v52  ;;  %v373_v55 = vld [vmem:[%s7656_s15 + $0x20] sm:$0xff]  ;;  %v6358_v59 = vld [vmem:[#allocation3 + $0x2ac] sm:$0xf0]  ;;  %v382_v52 = vld [vmem:[%s7656_s15 + $0x68] sm:$0xff]  ;;  %s7439_s10 = scalar_lea.hbm %s7438_s30, 1  ;;  %s7443_s23 = scalar_lea.hbm %s8825_s9, 2 }
  0x2f   : > { %1901 = vmatpush.bf16.msrb.mxu2 %v5593_v46  ;;  %v387_v57 = vpack.c.bf16 %v374_v56, %v373_v55  ;;  %v5576_v58 = vld [vmem:[#allocation3 + $0x2a0] sm:$0xf]  ;;  %v6294_v62 = vld [vmem:[#allocation3 + $0xac] sm:$0xf0]  ;;  %v384_v55 = vld [vmem:[%s7656_s15 + $0x78] sm:$0xff]  ;;  %p7440_p0 = scmp.ne.s32.totalorder %s7438_s30, %s7439_s10  ;;  %p7444_p3 = scmp.lt.s32.totalorder %s7438_s30, %s8825_s9 }
  0x30   : > { %1803 = vmatpush.bf16.msrb.mxu0 %v5337_v50  ;;  %1950 = vmatpush.bf16.msrb.mxu3 %v5721_v51  ;;  %v5320_v60 = vld [vmem:[#allocation3 + $0xa0] sm:$0xf]  ;;  %v5577_v61 = vor.u32 %v6358_v59, %v5576_v58  ;;  %v6390_v0 = vld [vmem:[#allocation3 + $0x3ac] sm:$0xf0]  ;;  %p7445_p4 = scmp.lt.s32.totalorder %s7443_s23, %s7439_s10 }
  0x31   : > { %1852 = vmatpush.bf16.msrb.mxu1 %v5465_v54  ;;  %v5704_v63 = vld [vmem:[#allocation3 + $0x3a0] sm:$0xf]  ;;  %v5321_v1 = vor.u32 %v6294_v62, %v5320_v60  ;;  %v6326_v4 = vld [vmem:[#allocation3 + $0x1ac] sm:$0xf0]  ;;  %p7441_p1 = pnand %p7440_p0, %p7590_p5 }
  0x32   : > { %v5705_v2 = vor.u32 %v6390_v0, %v5704_v63  ;;  %v5448_v3 = vld [vmem:[#allocation3 + $0x1a0] sm:$0xf]  ;;  %v375_v6 = vld [vmem:[%s7656_s15 + $0x30] sm:$0xff]  ;;  %p7446_p7 = por %p7445_p4, %p7444_p3 }
  0x33   : > { %1902 = vmatpush.bf16.msrb.mxu2 %v5577_v61  ;;  %v5449_v5 = vor.u32 %v6326_v4, %v5448_v3  ;;  %v388_v8 = vpack.c.bf16 %v376_v7, %v375_v6  ;;  %v5560_v9 = vld [vmem:[#allocation3 + $0x280] sm:$0xf]  ;;  %v6354_v10 = vld [vmem:[#allocation3 + $0x28c] sm:$0xf0]  ;;  %p7442_p2 = pneg %p7441_p1 }
  0x34   : > { %1804 = vmatpush.bf16.msrb.mxu0 %v5321_v1  ;;  %1951 = vmatpush.bf16.msrb.mxu3 %v5705_v2  ;;  %v5304_v11 = vld [vmem:[#allocation3 + $0x80] sm:$0xf]  ;;  %v5561_v12 = vor.u32 %v6354_v10, %v5560_v9  ;;  %v6290_v13 = vld [vmem:[#allocation3 + $0x8c] sm:$0xf0] }
  0x35   : > { %1853 = vmatpush.bf16.msrb.mxu1 %v5449_v5  ;;  %v5688_v14 = vld [vmem:[#allocation3 + $0x380] sm:$0xf]  ;;  %v6386_v15 = vld [vmem:[#allocation3 + $0x38c] sm:$0xf0]  ;;  %v5305_v16 = vor.u32 %v6290_v13, %v5304_v11  ;;  %p7447_p8 = pnand %p7446_p7, %p7442_p2 }
  0x36   : > { %v5689_v17 = vor.u32 %v6386_v15, %v5688_v14  ;;  %v5432_v18 = vld [vmem:[#allocation3 + $0x180] sm:$0xf]  ;;  %v6322_v19 = vld [vmem:[#allocation3 + $0x18c] sm:$0xf0] }
  0x37   : > { %1903 = vmatpush.bf16.msrb.mxu2 %v5561_v12  ;;  %v5433_v20 = vor.u32 %v6322_v19, %v5432_v18  ;;  %v377_v21 = vld [vmem:[%s7656_s15 + $0x40] sm:$0xff]  ;;  %v6350_v25 = vld [vmem:[#allocation3 + $0x26c] sm:$0xf0] }
  0x38   : > { %1805 = vmatpush.bf16.msrb.mxu0 %v5305_v16  ;;  %1952 = vmatpush.bf16.msrb.mxu3 %v5689_v17  ;;  %v389_v23 = vpack.c.bf16 %v378_v22, %v377_v21  ;;  %v5544_v24 = vld [vmem:[#allocation3 + $0x260] sm:$0xf]  ;;  %v6286_v28 = vld [vmem:[#allocation3 + $0x6c] sm:$0xf0] }
  0x39   : > { %5207 = vmatmul.msk.bf16.gmra.mxu0 %vm451_vm0, %v386_v42  ;;  %1854 = vmatpush.bf16.msrb.mxu1 %v5433_v20  ;;  %v5288_v26 = vld [vmem:[#allocation3 + $0x60] sm:$0xf]  ;;  %v5545_v27 = vor.u32 %v6350_v25, %v5544_v24  ;;  %v6382_v30 = vld [vmem:[#allocation3 + $0x36c] sm:$0xf0] }
  0x3a   : > { %5215 = vmatmul.msk.bf16.gmra.mxu1 %vm451_vm0, %v386_v42  ;;  %5223 = vmatmul.msk.bf16.gmra.mxu2 %vm451_vm0, %v386_v42  ;;  %v5672_v29 = vld [vmem:[#allocation3 + $0x360] sm:$0xf]  ;;  %v5289_v31 = vor.u32 %v6286_v28, %v5288_v26  ;;  %v6318_v34 = vld [vmem:[#allocation3 + $0x16c] sm:$0xf0] }
  0x3b   : > { %5231 = vmatmul.msk.bf16.gmra.mxu3 %vm451_vm0, %v386_v42  ;;  %v5673_v32 = vor.u32 %v6382_v30, %v5672_v29  ;;  %v5416_v33 = vld [vmem:[#allocation3 + $0x160] sm:$0xf]  ;;  %1904 = vmatpush.bf16.msrb.mxu2 %v5545_v27  ;;  %v379_v36 = vld [vmem:[%s7656_s15 + $0x50] sm:$0xff] }
  0x3c   : > { %v5417_v35 = vor.u32 %v6318_v34, %v5416_v33  ;;  %1806 = vmatpush.bf16.msrb.mxu0 %v5289_v31  ;;  %v390_v38 = vpack.c.bf16 %v380_v37, %v379_v36  ;;  %v5528_v39 = vld [vmem:[#allocation3 + $0x240] sm:$0xf]  ;;  %v6346_v40 = vld [vmem:[#allocation3 + $0x24c] sm:$0xf0] }
  0x3d   : > { %1953 = vmatpush.bf16.msrb.mxu3 %v5673_v32  ;;  %v5272_v41 = vld [vmem:[#allocation3 + $0x40] sm:$0xf]  ;;  %v5529_v42 = vor.u32 %v6346_v40, %v5528_v39  ;;  %v6282_v43 = vld [vmem:[#allocation3 + $0x4c] sm:$0xf0] }
  0x3e   : > { %1855 = vmatpush.bf16.msrb.mxu1 %v5417_v35  ;;  %v5656_v44 = vld [vmem:[#allocation3 + $0x340] sm:$0xf]  ;;  %v6378_v45 = vld [vmem:[#allocation3 + $0x34c] sm:$0xf0]  ;;  %v5273_v46 = vor.u32 %v6282_v43, %v5272_v41 }
  0x3f   : > { %v5657_v47 = vor.u32 %v6378_v45, %v5656_v44  ;;  %v5400_v48 = vld [vmem:[#allocation3 + $0x140] sm:$0xf]  ;;  %v6314_v49 = vld [vmem:[#allocation3 + $0x14c] sm:$0xf0]  ;;  %1905 = vmatpush.bf16.msrb.mxu2 %v5529_v42 }
  0x40   : > { %v5401_v50 = vor.u32 %v6314_v49, %v5400_v48  ;;  %1807 = vmatpush.bf16.msrb.mxu0 %v5273_v46  ;;  %v381_v51 = vld [vmem:[%s7656_s15 + $0x60] sm:$0xff]  ;;  %v383_v54 = vld [vmem:[%s7656_s15 + $0x70] sm:$0xff]  ;;  %s360_s15 = sand.u32 1, %s7485_s12  }
  0x41   : > { %1954 = vmatpush.bf16.msrb.mxu3 %v5657_v47  ;;  %v391_v53 = vpack.c.bf16 %v382_v52, %v381_v51  ;;  %v392_v56 = vpack.c.bf16 %v384_v55, %v383_v54  ;;  %v6342_v58 = vld [vmem:[#allocation3 + $0x22c] sm:$0xf0]  ;;  %v401_v60 = vld [vmem:[%s8818_s2] sm:$0xf]  ;;  %s361_s27 = scalar_lea.vmem [#allocation8], %s360_s15  ;;  %s5075_s29 = scalar_lea.sflag [#allocation5], %s360_s15 }
  0x42   : > { %1856 = vmatpush.bf16.msrb.mxu1 %v5401_v50  ;;  %v5256_v61 = vld [vmem:[#allocation3 + $0x20] sm:$0xf]  ;;  %v6278_v62 = vld [vmem:[#allocation3 + $0x2c] sm:$0xf0]  ;;  %v7730_v4 = vperm.slane %v401_v60, 0  ;;  %v7732_v7 = vperm.slane %v401_v60, 1 }
  0x43   : > { %v5384_v63 = vld [vmem:[#allocation3 + $0x120] sm:$0xf]  ;;  %v5257_v0 = vor.u32 %v6278_v62, %v5256_v61  ;;  %v6374_v2 = vld [vmem:[#allocation3 + $0x32c] sm:$0xf0]  ;;  %v7736_v20 = vperm.slane %v401_v60, 2  ;;  %v7738_v21 = vperm.slane %v401_v60, 3 }
  0x44   : > { %v5640_v1 = vld [vmem:[#allocation3 + $0x320] sm:$0xf]  ;;  %v6310_v3 = vld [vmem:[#allocation3 + $0x12c] sm:$0xf0]  ;;  %s5085_s28 = sshll.u32 %s361_s27, 4  ;;  %s5086_s28 = int_to_ptr.vmem [resolvable:$true] %s5085_s28 }
  0x45   : > { %v5641_v5 = vor.u32 %v6374_v2, %v5640_v1  ;;  %v5385_v6 = vor.u32 %v6310_v3, %v5384_v63  ;;  %1808 = vmatpush.bf16.msrb.mxu0 %v5257_v0  ;;  %v5240_v9 = vld [vmem:[#allocation3] sm:$0xf]  ;;  %v6274_v10 = vld [vmem:[#allocation3 + $0xc] sm:$0xf0] }
  0x46   : > { %v5368_v11 = vld [vmem:[#allocation3 + $0x100] sm:$0xf]  ;;  %v5241_v14 = vor.u32 %v6274_v10, %v5240_v9  ;;  %v6306_v15 = vld [vmem:[#allocation3 + $0x10c] sm:$0xf0] }
  0x47   : > { %1955 = vmatpush.bf16.msrb.mxu3 %v5641_v5  ;;  %1857 = vmatpush.bf16.msrb.mxu1 %v5385_v6  ;;  %v5369_v17 = vor.u32 %v6306_v15, %v5368_v11  ;;  %v6338_v24 = vld [vmem:[#allocation3 + $0x20c] sm:$0xf0]  ;;  %v5624_v27 = vld [vmem:[#allocation3 + $0x300] sm:$0xf] }
  0x48   : > { %v6370_v28 = vld [vmem:[#allocation3 + $0x30c] sm:$0xf0] }
  0x49   : > { %5208 = vmatmul.msk.bf16.gmra.mxu0 %vm451_vm0, %v387_v57  ;;  %v5625_v30 = vor.u32 %v6370_v28, %v5624_v27 }
  0x4a   : > { %5216 = vmatmul.msk.bf16.gmra.mxu1 %vm451_vm0, %v387_v57  ;;  %5224 = vmatmul.msk.bf16.gmra.mxu2 %vm451_vm0, %v387_v57 }
  0x4b   : > { %5232 = vmatmul.msk.bf16.gmra.mxu3 %vm451_vm0, %v387_v57  ;;  %v5512_v57 = vld [vmem:[#allocation3 + $0x220] sm:$0xf]  ;;  %1809 = vmatpush.bf16.msrb.mxu0 %v5241_v14 }
  0x4c   : > { %v5513_v59 = vor.u32 %v6342_v58, %v5512_v57  ;;  %1858 = vmatpush.bf16.msrb.mxu1 %v5369_v17  ;;  %1956 = vmatpush.bf16.msrb.mxu3 %v5625_v30 }
  0x4e   : > { %1906 = vmatpush.bf16.msrb.mxu2 %v5513_v59 }
  0x59   : > { %5209 = vmatmul.msk.bf16.gmra.mxu0 %vm451_vm0, %v388_v8 }
  0x5a   : > { %5217 = vmatmul.msk.bf16.gmra.mxu1 %vm451_vm0, %v388_v8  ;;  %5225 = vmatmul.msk.bf16.gmra.mxu2 %vm451_vm0, %v388_v8 }
  0x5b   : > { %5233 = vmatmul.msk.bf16.gmra.mxu3 %vm451_vm0, %v388_v8 }
  0x69   : > { %5210 = vmatmul.msk.bf16.gmra.mxu0 %vm451_vm0, %v389_v23 }
  0x6a   : > { %5218 = vmatmul.msk.bf16.gmra.mxu1 %vm451_vm0, %v389_v23  ;;  %5226 = vmatmul.msk.bf16.gmra.mxu2 %vm451_vm0, %v389_v23 }
  0x6b   : > { %5234 = vmatmul.msk.bf16.gmra.mxu3 %vm451_vm0, %v389_v23  ;;  %v5496_v23 = vld [vmem:[#allocation3 + $0x200] sm:$0xf] }
  0x6c   : > { %v5497_v26 = vor.u32 %v6338_v24, %v5496_v23 }
  0x6e   : > { %1907 = vmatpush.bf16.msrb.mxu2 %v5497_v26 }
  0x79   : > { %5211 = vmatmul.msk.bf16.gmra.mxu0 %vm451_vm0, %v390_v38 }
  0x7a   : > { %5219 = vmatmul.msk.bf16.gmra.mxu1 %vm451_vm0, %v390_v38  ;;  %5227 = vmatmul.msk.bf16.gmra.mxu2 %vm451_vm0, %v390_v38 }
  0x7b   : > { %5235 = vmatmul.msk.bf16.gmra.mxu3 %vm451_vm0, %v390_v38 }
  0x89   : > { %5212 = vmatmul.msk.bf16.gmra.mxu0 %vm451_vm0, %v391_v53 }
  0x8a   : > { %5220 = vmatmul.msk.bf16.gmra.mxu1 %vm451_vm0, %v391_v53  ;;  %5228 = vmatmul.msk.bf16.gmra.mxu2 %vm451_vm0, %v391_v53 }
  0x8b   : > { %5236 = vmatmul.msk.bf16.gmra.mxu3 %vm451_vm0, %v391_v53 }
  0x99   : > { %5213 = vmatmul.msk.bf16.gmra.mxu0 %vm451_vm0, %v392_v56 }
  0x9a   : > { %5221 = vmatmul.msk.bf16.gmra.mxu1 %vm451_vm0, %v392_v56  ;;  %5229 = vmatmul.msk.bf16.gmra.mxu2 %vm451_vm0, %v392_v56 }
  0x9b   : > { %5237 = vmatmul.msk.bf16.gmra.mxu3 %vm451_vm0, %v392_v56 }
  0xa6   : > { %v485_v8 = vpop.f32.mrf.mxu0 }
  0xa7   : > { %v486_v12 = vadd.f32 %v485_v8, %v7730_v4  ;;  %v534_v13 = vpop.f32.mrf.mxu1 }
  0xa8   : > { %v535_v16 = vadd.f32 %v534_v13, %v7732_v7 }
  0xa9   : > { %v672_v18 = vsub.f32 0.0, %v486_v12 }
  0xaa   : > { %v673_v19 = vsub.f32 0.0, %v535_v16 }
  0xab   : > { %v736_v22 = vmul.f32 1.442695, %v672_v18  ;;  %v6364_v18 = vld [vmem:[#allocation3 + $0x2e4] sm:$0xf] }
  0xac   : > { %v738_v25 = vmul.f32 1.442695, %v673_v19  ;;  %v5610_v19 = vld [vmem:[#allocation3 + $0x2f0] sm:$0xf0] }
  0xad   : > { %6592 = vpow2.f32 %v736_v22  ;;  %v583_v29 = vpop.f32.mrf.mxu2 }
  0xae   : > { %6594 = vpow2.f32 %v738_v25  ;;  %v584_v31 = vadd.f32 %v583_v29, %v7736_v20  ;;  %v632_v32 = vpop.f32.mrf.mxu3  ;;  %v487_v33 = vpop.f32.mrf.mxu0  ;;  %v5613_v29 = vor.u32 %v6364_v18, %v5610_v19 }
  0xaf   : > { %v633_v34 = vadd.f32 %v632_v32, %v7738_v21  ;;  %v488_v35 = vadd.f32 %v487_v33, %v7730_v4  ;;  %v536_v36 = vpop.f32.mrf.mxu1  ;;  %v6300_v33 = vld [vmem:[#allocation3 + $0xe4] sm:$0xf] }
  0xb0   : > { %v674_v37 = vsub.f32 0.0, %v584_v31  ;;  %v537_v38 = vadd.f32 %v536_v36, %v7732_v7  ;;  %2096 = vmatpush.bf16.msra.mxu2 %v5613_v29 }
  0xb1   : > { %v675_v39 = vsub.f32 0.0, %v633_v34  ;;  %v676_v40 = vsub.f32 0.0, %v488_v35 }
  0xb2   : > { %v740_v41 = vmul.f32 1.442695, %v674_v37  ;;  %v677_v42 = vsub.f32 0.0, %v537_v38 }
  0xb3   : > { %v6593_v43 = vpop.eup %6592  ;;  %v742_v44 = vmul.f32 1.442695, %v675_v39  ;;  %v744_v46 = vmul.f32 1.442695, %v676_v40  ;;  %v5354_v39 = vld [vmem:[#allocation3 + $0xf0] sm:$0xf0] }
  0xb4   : > { %v6595_v45 = vpop.eup %6594  ;;  %6596 = vpow2.f32 %v740_v41  ;;  %v746_v47 = vmul.f32 1.442695, %v677_v42  ;;  %v864_v49 = vadd.f32 1.0, %v6593_v43  ;;  %v6396_v40 = vld [vmem:[#allocation3 + $0x3e4] sm:$0xf] }
  0xb5   : > { %6598 = vpow2.f32 %v742_v44  ;;  %v585_v48 = vpop.f32.mrf.mxu2  ;;  %v865_v53 = vadd.f32 1.0, %v6595_v45  ;;  %v5357_v44 = vor.u32 %v6300_v33, %v5354_v39  ;;  %v5738_v45 = vld [vmem:[#allocation3 + $0x3f0] sm:$0xf0] }
  0xb6   : > { %v586_v50 = vadd.f32 %v585_v48, %v7736_v20  ;;  %v634_v51 = vpop.f32.mrf.mxu3  ;;  %v490_v52 = vpop.f32.mrf.mxu0  ;;  %6600 = vpow2.f32 %v744_v46 }
  0xb7   : > { %v635_v54 = vadd.f32 %v634_v51, %v7738_v21  ;;  %v491_v55 = vadd.f32 %v490_v52, %v7730_v4  ;;  %v539_v56 = vpop.f32.mrf.mxu1  ;;  %6602 = vpow2.f32 %v746_v47  ;;  %v5741_v51 = vor.u32 %v6396_v40, %v5738_v45  ;;  %1998 = vmatpush.bf16.msra.mxu0 %v5357_v44 }
  0xb8   : > { %v678_v57 = vsub.f32 0.0, %v586_v50  ;;  %v540_v58 = vadd.f32 %v539_v56, %v7732_v7  ;;  %6604 = vrcp.f32 %v864_v49 }
  0xb9   : > { %v679_v59 = vsub.f32 0.0, %v635_v54  ;;  %v680_v60 = vsub.f32 0.0, %v491_v55  ;;  %6606 = vrcp.f32 %v865_v53  ;;  %2145 = vmatpush.bf16.msra.mxu3 %v5741_v51 }
  0xba   : > { %v6597_v61 = vpop.eup %6596  ;;  %v748_v62 = vmul.f32 1.442695, %v678_v57  ;;  %v681_v63 = vsub.f32 0.0, %v540_v58 }
  0xbb   : > { %v6599_v0 = vpop.eup %6598  ;;  %v866_v1 = vadd.f32 1.0, %v6597_v61  ;;  %v750_v2 = vmul.f32 1.442695, %v679_v59  ;;  %v752_v5 = vmul.f32 1.442695, %v680_v60 }
  0xbc   : > { %v867_v3 = vadd.f32 1.0, %v6599_v0  ;;  %6608 = vpow2.f32 %v748_v62  ;;  %v6601_v8 = vpop.eup %6600  ;;  %v754_v9 = vmul.f32 1.442695, %v681_v63  ;;  %v6332_v61 = vld [vmem:[#allocation3 + $0x1e4] sm:$0xf] }
  0xbd   : > { %6610 = vrcp.f32 %v866_v1  ;;  %v588_v6 = vpop.f32.mrf.mxu2  ;;  %v6603_v13 = vpop.eup %6602  ;;  %v868_v14 = vadd.f32 1.0, %v6601_v8  ;;  %v5482_v62 = vld [vmem:[#allocation3 + $0x1f0] sm:$0xf0] }
  0xbe   : > { %6612 = vrcp.f32 %v867_v3  ;;  %v589_v10 = vadd.f32 %v588_v6, %v7736_v20  ;;  %v637_v11 = vpop.f32.mrf.mxu3  ;;  %v492_v12 = vpop.f32.mrf.mxu0  ;;  %v869_v23 = vadd.f32 1.0, %v6603_v13 }
  0xbf   : > { %6614 = vpow2.f32 %v750_v2  ;;  %v638_v15 = vadd.f32 %v637_v11, %v7738_v21  ;;  %v493_v16 = vadd.f32 %v492_v12, %v7730_v4  ;;  %v541_v17 = vpop.f32.mrf.mxu1  ;;  %v6605_v22 = vpop.eup %6604  ;;  %v5485_v11 = vor.u32 %v6332_v61, %v5482_v62 }
  0xc0   : > { %6616 = vpow2.f32 %v752_v5  ;;  %v682_v24 = vsub.f32 0.0, %v589_v10  ;;  %v542_v25 = vadd.f32 %v541_v17, %v7732_v7  ;;  %v6607_v26 = vpop.eup %6606 }
  0xc1   : > { %6618 = vrcp.f32 %v868_v14  ;;  %v683_v27 = vsub.f32 0.0, %v638_v15  ;;  %v684_v28 = vsub.f32 0.0, %v493_v16  ;;  %2047 = vmatpush.bf16.msra.mxu1 %v5485_v11  ;;  %v6328_v11 = vld [vmem:[#allocation3 + $0x1c4] sm:$0xf] }
  0xc2   : > { %v6609_v30 = vpop.eup %6608  ;;  %6620 = vrcp.f32 %v869_v23  ;;  %v756_v31 = vmul.f32 1.442695, %v682_v24  ;;  %v685_v32 = vsub.f32 0.0, %v542_v25 }
  0xc3   : > { %v6611_v34 = vpop.eup %6610  ;;  %v870_v35 = vadd.f32 1.0, %v6609_v30  ;;  %6622 = vpow2.f32 %v754_v9  ;;  %v758_v36 = vmul.f32 1.442695, %v683_v27  ;;  %v760_v37 = vmul.f32 1.442695, %v684_v28 }
  0xc4   : > { %v7752_v38 = vpop.eup %6612  ;;  %6624 = vpow2.f32 %v756_v31  ;;  %v762_v42 = vmul.f32 1.442695, %v685_v32 }
  0xc5   : > { %v6615_v41 = vpop.eup %6614  ;;  %6626 = vrcp.f32 %v870_v35  ;;  %v590_v43 = vpop.f32.mrf.mxu2  ;;  %v5594_v35 = vld [vmem:[#allocation3 + $0x2d0] sm:$0xf0] }
  0xc6   : > { %v6617_v46 = vpop.eup %6616  ;;  %v871_v47 = vadd.f32 1.0, %v6615_v41  ;;  %6628 = vpow2.f32 %v758_v36  ;;  %v591_v48 = vadd.f32 %v590_v43, %v7736_v20  ;;  %v639_v49 = vpop.f32.mrf.mxu3 }
  0xc7   : > { %v495_v50 = vpop.f32.mrf.mxu0  ;;  %v6619_v52 = vpop.eup %6618  ;;  %v872_v53 = vadd.f32 1.0, %v6617_v46  ;;  %6630 = vpow2.f32 %v760_v37  ;;  %v640_v54 = vadd.f32 %v639_v49, %v7738_v21  ;;  %v6296_v46 = vld [vmem:[#allocation3 + $0xc4] sm:$0xf]  ;;  %v5338_v49 = vld [vmem:[#allocation3 + $0xd0] sm:$0xf0] }
  0xc8   : > { %v496_v55 = vadd.f32 %v495_v50, %v7730_v4  ;;  %v544_v56 = vpop.f32.mrf.mxu1  ;;  %v6621_v57 = vpop.eup %6620  ;;  %6632 = vrcp.f32 %v871_v47  ;;  %v686_v58 = vsub.f32 0.0, %v591_v48  ;;  %v7758_v60 = vpack.c.bf16 %v6619_v52, %v6605_v22  ;;  %v6392_v50 = vld [vmem:[#allocation3 + $0x3c4] sm:$0xf] }
  0xc9   : > { %v545_v59 = vadd.f32 %v544_v56, %v7732_v7  ;;  %v6623_v63 = vpop.eup %6622  ;;  %v687_v0 = vsub.f32 0.0, %v640_v54  ;;  %v7760_v2 = vpack.c.bf16 %v6621_v57, %v6607_v26  ;;  %6634 = vpow2.f32 %v762_v42  ;;  %v5722_v56 = vld [vmem:[#allocation3 + $0x3d0] sm:$0xf0] }
  0xca   : > { %v688_v1 = vsub.f32 0.0, %v496_v55  ;;  %v6625_v3 = vpop.eup %6624  ;;  %v873_v5 = vadd.f32 1.0, %v6623_v63  ;;  %v764_v6 = vmul.f32 1.442695, %v686_v58  ;;  %1810 = vmatmul.bf16.vlgmr.msrb.gmra.mxu0 %v7758_v60  ;;  %6636 = vrcp.f32 %v872_v53 }
  0xcb   : > { %v689_v8 = vsub.f32 0.0, %v545_v59  ;;  %v6627_v9 = vpop.eup %6626  ;;  %v874_v10 = vadd.f32 1.0, %v6625_v3  ;;  %1859 = vmatmul.bf16.vlgmr.msrb.gmra.mxu1 %v7760_v2  ;;  %v766_v16 = vmul.f32 1.442695, %v687_v0  ;;  %v5341_v55 = vor.u32 %v6296_v46, %v5338_v49 }
  0xcc   : > { %v6629_v12 = vpop.eup %6628  ;;  %6638 = vrcp.f32 %v873_v5  ;;  %v7764_v13 = vpack.c.bf16 %v6627_v9, %v6611_v34  ;;  %v768_v17 = vmul.f32 1.442695, %v688_v1  ;;  %v6360_v34 = vld [vmem:[#allocation3 + $0x2c4] sm:$0xf]  ;;  %v5725_v62 = vor.u32 %v6392_v50, %v5722_v56  ;;  %v5578_v56 = vld [vmem:[#allocation3 + $0x2b0] sm:$0xf0] }
  0xcd   : > { %v6631_v14 = vpop.eup %6630  ;;  %6640 = vrcp.f32 %v874_v10  ;;  %v875_v15 = vadd.f32 1.0, %v6629_v12  ;;  %v593_v18 = vpop.f32.mrf.mxu2  ;;  %v770_v23 = vmul.f32 1.442695, %v689_v8  ;;  %v5597_v43 = vor.u32 %v6360_v34, %v5594_v35  ;;  %1999 = vmatpush.bf16.msra.mxu0 %v5341_v55  ;;  %v6356_v55 = vld [vmem:[#allocation3 + $0x2a4] sm:$0xf] }
  0xce   : > { %v6633_v19 = vpop.eup %6632  ;;  %v876_v22 = vadd.f32 1.0, %v6631_v14  ;;  %6642 = vpow2.f32 %v764_v6  ;;  %v594_v24 = vadd.f32 %v593_v18, %v7736_v20  ;;  %v642_v25 = vpop.f32.mrf.mxu3  ;;  %1908 = vmatmul.bf16.vlgmr.msrb.gmra.mxu2 %v7764_v13  ;;  %2146 = vmatpush.bf16.msra.mxu3 %v5725_v62 }
  0xcf   : > { %v497_v26 = vpop.f32.mrf.mxu0  ;;  %6644 = vrcp.f32 %v875_v15  ;;  %v643_v27 = vadd.f32 %v642_v25, %v7738_v21  ;;  %v7770_v28 = vpack.c.bf16 %v6633_v19, %v7752_v38  ;;  %v6635_v31 = vpop.eup %6634  ;;  %2097 = vmatpush.bf16.msra.mxu2 %v5597_v43 }
  0xd0   : > { %v498_v29 = vadd.f32 %v497_v26, %v7730_v4  ;;  %v546_v30 = vpop.f32.mrf.mxu1  ;;  %6646 = vrcp.f32 %v876_v22  ;;  %v690_v32 = vsub.f32 0.0, %v594_v24  ;;  %v6637_v36 = vpop.eup %6636  ;;  %v877_v37 = vadd.f32 1.0, %v6635_v31 }
  0xd1   : > { %v547_v33 = vadd.f32 %v546_v30, %v7732_v7  ;;  %6648 = vpow2.f32 %v766_v16  ;;  %v691_v39 = vsub.f32 0.0, %v643_v27  ;;  %1957 = vmatmul.bf16.vlgmr.msrb.gmra.mxu3 %v7770_v28 }
  0xd2   : > { %v692_v40 = vsub.f32 0.0, %v498_v29  ;;  %v6639_v41 = vpop.eup %6638  ;;  %6650 = vpow2.f32 %v768_v17  ;;  %v772_v38 = vmul.f32 1.442695, %v690_v32  ;;  %v5466_v17 = vld [vmem:[#allocation3 + $0x1d0] sm:$0xf0] }
  0xd3   : > { %v693_v42 = vsub.f32 0.0, %v547_v33  ;;  %v7775_v44 = vpop.eup %6640  ;;  %6652 = vrcp.f32 %v877_v37  ;;  %v774_v45 = vmul.f32 1.442695, %v691_v39  ;;  %v5469_v30 = vor.u32 %v6328_v11, %v5466_v17  ;;  %v6388_v11 = vld [vmem:[#allocation3 + $0x3a4] sm:$0xf] }
  0xd4   : > { %v6643_v47 = vpop.eup %6642  ;;  %6654 = vpow2.f32 %v770_v23  ;;  %v776_v48 = vmul.f32 1.442695, %v692_v40 }
  0xd5   : > { %v7777_v51 = vpop.eup %6644  ;;  %v878_v52 = vadd.f32 1.0, %v6643_v47  ;;  %6656 = vpow2.f32 %v772_v38  ;;  %v778_v53 = vmul.f32 1.442695, %v693_v42  ;;  %v595_v54 = vpop.f32.mrf.mxu2  ;;  %2048 = vmatpush.bf16.msra.mxu1 %v5469_v30 }
  0xd6   : > { %v6647_v57 = vpop.eup %6646  ;;  %6658 = vpow2.f32 %v774_v45  ;;  %v596_v58 = vadd.f32 %v595_v54, %v7736_v20  ;;  %v644_v59 = vpop.f32.mrf.mxu3 }
  0xd7   : > { %v500_v61 = vpop.f32.mrf.mxu0  ;;  %v6649_v63 = vpop.eup %6648  ;;  %6660 = vrcp.f32 %v878_v52  ;;  %v645_v0 = vadd.f32 %v644_v59, %v7738_v21  ;;  %v7782_v5 = vpack.c.bf16 %v6647_v57, %v6637_v36 }
  0xd8   : > { %v501_v1 = vadd.f32 %v500_v61, %v7730_v4  ;;  %v549_v3 = vpop.f32.mrf.mxu1  ;;  %v6651_v6 = vpop.eup %6650  ;;  %v879_v8 = vadd.f32 1.0, %v6649_v63  ;;  %6662 = vpow2.f32 %v776_v48  ;;  %v694_v9 = vsub.f32 0.0, %v596_v58 }
  0xd9   : > { %v550_v10 = vadd.f32 %v549_v3, %v7732_v7  ;;  %v6653_v12 = vpop.eup %6652  ;;  %v880_v14 = vadd.f32 1.0, %v6651_v6  ;;  %6664 = vpow2.f32 %v778_v53  ;;  %v695_v15 = vsub.f32 0.0, %v645_v0  ;;  %v5322_v6 = vld [vmem:[#allocation3 + $0xb0] sm:$0xf0] }
  0xda   : > { %v696_v16 = vsub.f32 0.0, %v501_v1  ;;  %v6655_v18 = vpop.eup %6654  ;;  %6666 = vrcp.f32 %v879_v8  ;;  %v780_v19 = vmul.f32 1.442695, %v694_v9  ;;  %1815 = vmatmul.bf16.gmra.mxu0 %v7782_v5  ;;  %v7786_v23 = vpack.c.bf16 %v6653_v12, %v6639_v41  ;;  %v5706_v12 = vld [vmem:[#allocation3 + $0x3b0] sm:$0xf0] }
  0xdb   : > { %v697_v22 = vsub.f32 0.0, %v550_v10  ;;  %v6657_v24 = vpop.eup %6656  ;;  %6668 = vrcp.f32 %v880_v14  ;;  %v881_v25 = vadd.f32 1.0, %v6655_v18  ;;  %v782_v29 = vmul.f32 1.442695, %v695_v15 }
  0xdc   : > { %v6659_v26 = vpop.eup %6658  ;;  %v882_v27 = vadd.f32 1.0, %v6657_v24  ;;  %6670 = vpow2.f32 %v780_v19  ;;  %1864 = vmatmul.bf16.gmra.mxu1 %v7786_v23  ;;  %v784_v33 = vmul.f32 1.442695, %v696_v16  ;;  %v5581_v61 = vor.u32 %v6356_v55, %v5578_v56 }
  0xdd   : > { %v6661_v31 = vpop.eup %6660  ;;  %6672 = vrcp.f32 %v881_v25  ;;  %v883_v32 = vadd.f32 1.0, %v6659_v26  ;;  %v598_v34 = vpop.f32.mrf.mxu2  ;;  %v786_v36 = vmul.f32 1.442695, %v697_v22  ;;  %v5709_v19 = vor.u32 %v6388_v11, %v5706_v12 }
  0xde   : > { %v6663_v35 = vpop.eup %6662  ;;  %6674 = vrcp.f32 %v882_v27  ;;  %v599_v37 = vadd.f32 %v598_v34, %v7736_v20  ;;  %v647_v39 = vpop.f32.mrf.mxu3  ;;  %v7791_v40 = vpack.c.bf16 %v6661_v31, %v7775_v44  ;;  %2098 = vmatpush.bf16.msra.mxu2 %v5581_v61  ;;  %v5450_v34 = vld [vmem:[#allocation3 + $0x1b0] sm:$0xf0] }
  0xdf   : > { %v502_v41 = vpop.f32.mrf.mxu0  ;;  %v6665_v38 = vpop.eup %6664  ;;  %6676 = vrcp.f32 %v883_v32  ;;  %v884_v42 = vadd.f32 1.0, %v6663_v35  ;;  %v648_v43 = vadd.f32 %v647_v39, %v7738_v21  ;;  %2147 = vmatpush.bf16.msra.mxu3 %v5709_v19 }
  0xe0   : > { %v503_v45 = vadd.f32 %v502_v41, %v7730_v4  ;;  %v551_v46 = vpop.f32.mrf.mxu1  ;;  %v6667_v47 = vpop.eup %6666  ;;  %v885_v48 = vadd.f32 1.0, %v6665_v38  ;;  %6678 = vpow2.f32 %v782_v29  ;;  %v698_v49 = vsub.f32 0.0, %v599_v37  ;;  %1913 = vmatmul.bf16.gmra.mxu2 %v7791_v40 }
  0xe1   : > { %v552_v50 = vadd.f32 %v551_v46, %v7732_v7  ;;  %v6669_v44 = vpop.eup %6668  ;;  %6680 = vrcp.f32 %v884_v42  ;;  %v699_v52 = vsub.f32 0.0, %v648_v43  ;;  %v7798_v53 = vpack.c.bf16 %v6667_v47, %v7777_v51  ;;  %v6292_v51 = vld [vmem:[#allocation3 + $0xa4] sm:$0xf] }
  0xe2   : > { %v700_v54 = vsub.f32 0.0, %v503_v45  ;;  %v6671_v57 = vpop.eup %6670  ;;  %6682 = vrcp.f32 %v885_v48  ;;  %v788_v58 = vmul.f32 1.442695, %v698_v49  ;;  %v5325_v10 = vor.u32 %v6292_v51, %v5322_v6 }
  0xe3   : > { %v701_v59 = vsub.f32 0.0, %v552_v50  ;;  %v6673_v62 = vpop.eup %6672  ;;  %v886_v63 = vadd.f32 1.0, %v6671_v57  ;;  %6684 = vpow2.f32 %v784_v33  ;;  %v790_v0 = vmul.f32 1.442695, %v699_v52  ;;  %1962 = vmatmul.bf16.gmra.mxu3 %v7798_v53  ;;  %v6324_v33 = vld [vmem:[#allocation3 + $0x1a4] sm:$0xf] }
  0xe4   : > { %v6675_v1 = vpop.eup %6674  ;;  %6686 = vpow2.f32 %v786_v36  ;;  %v792_v3 = vmul.f32 1.442695, %v700_v54  ;;  %2000 = vmatpush.bf16.msra.mxu0 %v5325_v10  ;;  %v5453_v47 = vor.u32 %v6324_v33, %v5450_v34 }
  0xe5   : > { %v7801_v8 = vpop.eup %6676  ;;  %6688 = vrcp.f32 %v886_v63  ;;  %v600_v9 = vpop.f32.mrf.mxu2  ;;  %v794_v15 = vmul.f32 1.442695, %v701_v59 }
  0xe6   : > { %v6679_v14 = vpop.eup %6678  ;;  %6690 = vpow2.f32 %v788_v58  ;;  %v601_v16 = vadd.f32 %v600_v9, %v7736_v20  ;;  %v649_v17 = vpop.f32.mrf.mxu3  ;;  %2049 = vmatpush.bf16.msra.mxu1 %v5453_v47  ;;  %v6320_v47 = vld [vmem:[#allocation3 + $0x184] sm:$0xf] }
  0xe7   : > { %v505_v18 = vpop.f32.mrf.mxu0  ;;  %v6681_v22 = vpop.eup %6680  ;;  %v887_v24 = vadd.f32 1.0, %v6679_v14  ;;  %6692 = vpow2.f32 %v790_v0  ;;  %v650_v25 = vadd.f32 %v649_v17, %v7738_v21 }
  0xe8   : > { %v506_v26 = vadd.f32 %v505_v18, %v7730_v4  ;;  %v554_v27 = vpop.f32.mrf.mxu1  ;;  %v6683_v29 = vpop.eup %6682  ;;  %6694 = vpow2.f32 %v792_v3  ;;  %v702_v30 = vsub.f32 0.0, %v601_v16  ;;  %v7807_v32 = vpack.c.bf16 %v6681_v22, %v6669_v44  ;;  %v6352_v16 = vld [vmem:[#allocation3 + $0x284] sm:$0xf]  ;;  %v5562_v22 = vld [vmem:[#allocation3 + $0x290] sm:$0xf0] }
  0xe9   : > { %v555_v31 = vadd.f32 %v554_v27, %v7732_v7  ;;  %v6685_v35 = vpop.eup %6684  ;;  %6696 = vrcp.f32 %v887_v24  ;;  %v703_v36 = vsub.f32 0.0, %v650_v25  ;;  %v7809_v39 = vpack.c.bf16 %v6683_v29, %v6673_v62  ;;  %v6288_v29 = vld [vmem:[#allocation3 + $0x84] sm:$0xf] }
  0xea   : > { %v704_v37 = vsub.f32 0.0, %v506_v26  ;;  %v6687_v41 = vpop.eup %6686  ;;  %v888_v38 = vadd.f32 1.0, %v6685_v35  ;;  %6698 = vpow2.f32 %v794_v15  ;;  %v796_v42 = vmul.f32 1.442695, %v702_v30  ;;  %1820 = vmatmul.bf16.gmra.mxu0 %v7807_v32  ;;  %v5306_v30 = vld [vmem:[#allocation3 + $0x90] sm:$0xf0] }
  0xeb   : > { %v705_v43 = vsub.f32 0.0, %v555_v31  ;;  %v6689_v45 = vpop.eup %6688  ;;  %v889_v46 = vadd.f32 1.0, %v6687_v41  ;;  %v798_v52 = vmul.f32 1.442695, %v703_v36  ;;  %v5565_v26 = vor.u32 %v6352_v16, %v5562_v22  ;;  %v6384_v36 = vld [vmem:[#allocation3 + $0x384] sm:$0xf] }
  0xec   : > { %v6691_v48 = vpop.eup %6690  ;;  %6700 = vrcp.f32 %v888_v38  ;;  %1869 = vmatmul.bf16.gmra.mxu1 %v7809_v39  ;;  %v7813_v49 = vpack.c.bf16 %v6689_v45, %v6675_v1  ;;  %v800_v54 = vmul.f32 1.442695, %v704_v37  ;;  %v5309_v35 = vor.u32 %v6288_v29, %v5306_v30  ;;  %v5690_v37 = vld [vmem:[#allocation3 + $0x390] sm:$0xf0] }
  0xed   : > { %v6693_v50 = vpop.eup %6692  ;;  %6702 = vrcp.f32 %v889_v46  ;;  %v890_v44 = vadd.f32 1.0, %v6691_v48  ;;  %v603_v55 = vpop.f32.mrf.mxu2  ;;  %v802_v58 = vmul.f32 1.442695, %v705_v43  ;;  %2099 = vmatpush.bf16.msra.mxu2 %v5565_v26  ;;  %v5693_v46 = vor.u32 %v6384_v36, %v5690_v37  ;;  %v5434_v48 = vld [vmem:[#allocation3 + $0x190] sm:$0xf0] }
  0xee   : > { %v6695_v56 = vpop.eup %6694  ;;  %v891_v57 = vadd.f32 1.0, %v6693_v50  ;;  %6704 = vpow2.f32 %v796_v42  ;;  %v604_v59 = vadd.f32 %v603_v55, %v7736_v20  ;;  %v652_v61 = vpop.f32.mrf.mxu3  ;;  %2001 = vmatpush.bf16.msra.mxu0 %v5309_v35  ;;  %v5437_v55 = vor.u32 %v6320_v47, %v5434_v48 }
  0xef   : > { %v507_v62 = vpop.f32.mrf.mxu0  ;;  %v6697_v63 = vpop.eup %6696  ;;  %6706 = vrcp.f32 %v890_v44  ;;  %v892_v0 = vadd.f32 1.0, %v6695_v56  ;;  %v653_v1 = vadd.f32 %v652_v61, %v7738_v21  ;;  %2148 = vmatpush.bf16.msra.mxu3 %v5693_v46 }
  0xf0   : > { %v508_v3 = vadd.f32 %v507_v62, %v7730_v4  ;;  %v556_v51 = vpop.f32.mrf.mxu1  ;;  %v6699_v6 = vpop.eup %6698  ;;  %6708 = vrcp.f32 %v891_v57  ;;  %v706_v9 = vsub.f32 0.0, %v604_v59  ;;  %1918 = vmatmul.bf16.gmra.mxu2 %v7813_v49  ;;  %v7820_v10 = vpack.c.bf16 %v6697_v63, %v7801_v8  ;;  %2050 = vmatpush.bf16.msra.mxu1 %v5437_v55 }
  0xf1   : > { %v557_v11 = vadd.f32 %v556_v51, %v7732_v7  ;;  %6710 = vrcp.f32 %v892_v0  ;;  %v893_v12 = vadd.f32 1.0, %v6699_v6  ;;  %v707_v14 = vsub.f32 0.0, %v653_v1 }
  0xf2   : > { %v708_v15 = vsub.f32 0.0, %v508_v3  ;;  %v6701_v17 = vpop.eup %6700  ;;  %6712 = vpow2.f32 %v798_v52  ;;  %v804_v18 = vmul.f32 1.442695, %v706_v9 }
  0xf3   : > { %v709_v19 = vsub.f32 0.0, %v557_v11  ;;  %v6703_v24 = vpop.eup %6702  ;;  %6714 = vrcp.f32 %v893_v12  ;;  %v806_v25 = vmul.f32 1.442695, %v707_v14  ;;  %1967 = vmatmul.bf16.gmra.mxu3 %v7820_v10 }
  0xf4   : > { %v6705_v8 = vpop.eup %6704  ;;  %6716 = vpow2.f32 %v800_v54  ;;  %v808_v27 = vmul.f32 1.442695, %v708_v15 }
  0xf5   : > { %v6707_v31 = vpop.eup %6706  ;;  %v894_v33 = vadd.f32 1.0, %v6705_v8  ;;  %6718 = vpow2.f32 %v802_v58  ;;  %v605_v34 = vpop.f32.mrf.mxu2  ;;  %v810_v38 = vmul.f32 1.442695, %v709_v19 }
  0xf6   : > { %v7824_v41 = vpop.eup %6708  ;;  %6720 = vpow2.f32 %v804_v18  ;;  %v606_v42 = vadd.f32 %v605_v34, %v7736_v20  ;;  %v654_v43 = vpop.f32.mrf.mxu3 }
  0xf7   : > { %v510_v45 = vpop.f32.mrf.mxu0  ;;  %v6711_v50 = vpop.eup %6710  ;;  %6722 = vrcp.f32 %v894_v33  ;;  %v655_v44 = vadd.f32 %v654_v43, %v7738_v21 }
  0xf8   : > { %v511_v52 = vadd.f32 %v510_v45, %v7730_v4  ;;  %v559_v54 = vpop.f32.mrf.mxu1  ;;  %v6713_v56 = vpop.eup %6712  ;;  %6724 = vpow2.f32 %v806_v25  ;;  %v710_v57 = vsub.f32 0.0, %v606_v42  ;;  %v7829_v58 = vpack.c.bf16 %v6711_v50, %v6701_v17 }
  0xf9   : > { %v6715_v59 = vpop.eup %6714  ;;  %v895_v61 = vadd.f32 1.0, %v6713_v56  ;;  %6726 = vpow2.f32 %v808_v27  ;;  %v711_v62 = vsub.f32 0.0, %v655_v44  ;;  %v560_v63 = vadd.f32 %v559_v54, %v7732_v7  ;;  %v6348_v44 = vld [vmem:[#allocation3 + $0x264] sm:$0xf] }
  0xfa   : > { %v6717_v0 = vpop.eup %6716  ;;  %6728 = vpow2.f32 %v810_v38  ;;  %v812_v1 = vmul.f32 1.442695, %v710_v57  ;;  %v712_v3 = vsub.f32 0.0, %v511_v52  ;;  %1825 = vmatmul.bf16.gmra.mxu0 %v7829_v58  ;;  %v7833_v51 = vpack.c.bf16 %v6715_v59, %v6703_v24 }
  0xfb   : > { %v6719_v6 = vpop.eup %6718  ;;  %6730 = vrcp.f32 %v895_v61  ;;  %v896_v9 = vadd.f32 1.0, %v6717_v0  ;;  %v814_v14 = vmul.f32 1.442695, %v711_v62  ;;  %v713_v17 = vsub.f32 0.0, %v560_v63  ;;  %v5546_v61 = vld [vmem:[#allocation3 + $0x270] sm:$0xf0] }
  0xfc   : > { %v6721_v11 = vpop.eup %6720  ;;  %v897_v12 = vadd.f32 1.0, %v6719_v6  ;;  %6732 = vpow2.f32 %v812_v1  ;;  %1874 = vmatmul.bf16.gmra.mxu1 %v7833_v51  ;;  %v816_v22 = vmul.f32 1.442695, %v712_v3  ;;  %v5549_v0 = vor.u32 %v6348_v44, %v5546_v61  ;;  %v6284_v1 = vld [vmem:[#allocation3 + $0x64] sm:$0xf] }
  0xfd   : > { %v6723_v15 = vpop.eup %6722  ;;  %6734 = vrcp.f32 %v896_v9  ;;  %v898_v16 = vadd.f32 1.0, %v6721_v11  ;;  %v608_v18 = vpop.f32.mrf.mxu2  ;;  %v818_v47 = vmul.f32 1.442695, %v713_v17  ;;  %v6380_v3 = vld [vmem:[#allocation3 + $0x364] sm:$0xf] }
  0xfe   : > { %v6725_v19 = vpop.eup %6724  ;;  %6736 = vrcp.f32 %v897_v12  ;;  %v609_v24 = vadd.f32 %v608_v18, %v7736_v20  ;;  %v657_v25 = vpop.f32.mrf.mxu3  ;;  %v7837_v26 = vpack.c.bf16 %v6723_v15, %v6707_v31  ;;  %2100 = vmatpush.bf16.msra.mxu2 %v5549_v0 }
  0xff   : > { %v512_v8 = vpop.f32.mrf.mxu0  ;;  %v6727_v27 = vpop.eup %6726  ;;  %6738 = vrcp.f32 %v898_v16  ;;  %v899_v29 = vadd.f32 1.0, %v6725_v19  ;;  %v658_v30 = vadd.f32 %v657_v25, %v7738_v21  ;;  %v5674_v16 = vld [vmem:[#allocation3 + $0x370] sm:$0xf0] }
 0x100   : > { %v513_v33 = vadd.f32 %v512_v8, %v7730_v4  ;;  %v561_v34 = vpop.f32.mrf.mxu1  ;;  %v6729_v35 = vpop.eup %6728  ;;  %v900_v36 = vadd.f32 1.0, %v6727_v27  ;;  %6740 = vpow2.f32 %v814_v14  ;;  %v714_v37 = vsub.f32 0.0, %v609_v24  ;;  %1923 = vmatmul.bf16.gmra.mxu2 %v7837_v26 }
 0x101   : > { %v562_v38 = vadd.f32 %v561_v34, %v7732_v7  ;;  %v6731_v42 = vpop.eup %6730  ;;  %6742 = vrcp.f32 %v899_v29  ;;  %v901_v31 = vadd.f32 1.0, %v6729_v35  ;;  %v715_v43 = vsub.f32 0.0, %v658_v30 }
 0x102   : > { %v716_v45 = vsub.f32 0.0, %v513_v33  ;;  %v6733_v46 = vpop.eup %6732  ;;  %6744 = vrcp.f32 %v900_v36  ;;  %v7844_v48 = vpack.c.bf16 %v6731_v42, %v7824_v41  ;;  %v820_v55 = vmul.f32 1.442695, %v714_v37  ;;  %v5290_v41 = vld [vmem:[#allocation3 + $0x70] sm:$0xf0] }
 0x103   : > { %v717_v50 = vsub.f32 0.0, %v562_v38  ;;  %v6735_v52 = vpop.eup %6734  ;;  %6746 = vrcp.f32 %v901_v31  ;;  %v902_v54 = vadd.f32 1.0, %v6733_v46  ;;  %v822_v57 = vmul.f32 1.442695, %v715_v43  ;;  %v6316_v36 = vld [vmem:[#allocation3 + $0x164] sm:$0xf] }
 0x104   : > { %v6737_v56 = vpop.eup %6736  ;;  %6748 = vpow2.f32 %v816_v22  ;;  %1972 = vmatmul.bf16.gmra.mxu3 %v7844_v48  ;;  %v824_v59 = vmul.f32 1.442695, %v716_v45  ;;  %v5293_v15 = vor.u32 %v6284_v1, %v5290_v41  ;;  %v5677_v29 = vor.u32 %v6380_v3, %v5674_v16  ;;  %v5418_v37 = vld [vmem:[#allocation3 + $0x170] sm:$0xf0] }
 0x105   : > { %v6739_v62 = vpop.eup %6738  ;;  %6750 = vrcp.f32 %v902_v54  ;;  %v610_v63 = vpop.f32.mrf.mxu2  ;;  %v826_v9 = vmul.f32 1.442695, %v717_v50 }
 0x106   : > { %v6741_v6 = vpop.eup %6740  ;;  %6752 = vpow2.f32 %v818_v47  ;;  %v611_v11 = vadd.f32 %v610_v63, %v7736_v20  ;;  %v659_v12 = vpop.f32.mrf.mxu3  ;;  %2002 = vmatpush.bf16.msra.mxu0 %v5293_v15  ;;  %2149 = vmatpush.bf16.msra.mxu3 %v5677_v29 }
 0x107   : > { %v515_v14 = vpop.f32.mrf.mxu0  ;;  %v6743_v17 = vpop.eup %6742  ;;  %v903_v18 = vadd.f32 1.0, %v6741_v6  ;;  %6754 = vpow2.f32 %v820_v55  ;;  %v660_v19 = vadd.f32 %v659_v12, %v7738_v21 }
 0x108   : > { %v516_v22 = vadd.f32 %v515_v14, %v7730_v4  ;;  %v564_v24 = vpop.f32.mrf.mxu1  ;;  %v6745_v25 = vpop.eup %6744  ;;  %6756 = vpow2.f32 %v822_v57  ;;  %v718_v8 = vsub.f32 0.0, %v611_v11 }
 0x109   : > { %v565_v27 = vadd.f32 %v564_v24, %v7732_v7  ;;  %v6747_v30 = vpop.eup %6746  ;;  %6758 = vrcp.f32 %v903_v18  ;;  %v719_v33 = vsub.f32 0.0, %v660_v19  ;;  %v7851_v35 = vpack.c.bf16 %v6745_v25, %v6735_v52 }
 0x10a   : > { %v720_v34 = vsub.f32 0.0, %v516_v22  ;;  %v6749_v38 = vpop.eup %6748  ;;  %6760 = vpow2.f32 %v824_v59  ;;  %v828_v42 = vmul.f32 1.442695, %v718_v8  ;;  %v7853_v43 = vpack.c.bf16 %v6747_v30, %v6737_v56 }
 0x10b   : > { %v721_v31 = vsub.f32 0.0, %v565_v27  ;;  %v6751_v45 = vpop.eup %6750  ;;  %v904_v46 = vadd.f32 1.0, %v6749_v38  ;;  %6762 = vpow2.f32 %v826_v9  ;;  %v830_v47 = vmul.f32 1.442695, %v719_v33  ;;  %1830 = vmatmul.bf16.gmra.mxu0 %v7851_v35  ;;  %v6344_v38 = vld [vmem:[#allocation3 + $0x244] sm:$0xf] }
 0x10c   : > { %v6753_v50 = vpop.eup %6752  ;;  %6764 = vpow2.f32 %v828_v42  ;;  %1879 = vmatmul.bf16.gmra.mxu1 %v7853_v43  ;;  %v7857_v44 = vpack.c.bf16 %v6751_v45, %v6739_v62  ;;  %v5421_v52 = vor.u32 %v6316_v36, %v5418_v37  ;;  %v832_v57 = vmul.f32 1.442695, %v720_v34  ;;  %v5530_v42 = vld [vmem:[#allocation3 + $0x250] sm:$0xf0] }
 0x10d   : > { %v6755_v54 = vpop.eup %6754  ;;  %6766 = vrcp.f32 %v904_v46  ;;  %v905_v55 = vadd.f32 1.0, %v6753_v50  ;;  %v613_v56 = vpop.f32.mrf.mxu2  ;;  %v834_v63 = vmul.f32 1.442695, %v721_v31  ;;  %v6280_v50 = vld [vmem:[#allocation3 + $0x44] sm:$0xf] }
 0x10e   : > { %v6757_v59 = vpop.eup %6756  ;;  %v906_v61 = vadd.f32 1.0, %v6755_v54  ;;  %6768 = vpow2.f32 %v830_v47  ;;  %v614_v0 = vadd.f32 %v613_v56, %v7736_v20  ;;  %v662_v1 = vpop.f32.mrf.mxu3  ;;  %2051 = vmatpush.bf16.msra.mxu1 %v5421_v52  ;;  %v5533_v47 = vor.u32 %v6344_v38, %v5530_v42  ;;  %v5274_v52 = vld [vmem:[#allocation3 + $0x50] sm:$0xf0] }
 0x10f   : > { %v517_v41 = vpop.f32.mrf.mxu0  ;;  %v6759_v3 = vpop.eup %6758  ;;  %6770 = vrcp.f32 %v905_v55  ;;  %v907_v6 = vadd.f32 1.0, %v6757_v59  ;;  %v663_v62 = vadd.f32 %v662_v1, %v7738_v21  ;;  %v5277_v59 = vor.u32 %v6280_v50, %v5274_v52  ;;  %v6312_v1 = vld [vmem:[#allocation3 + $0x144] sm:$0xf] }
 0x110   : > { %v518_v9 = vadd.f32 %v517_v41, %v7730_v4  ;;  %v566_v11 = vpop.f32.mrf.mxu1  ;;  %v6761_v12 = vpop.eup %6760  ;;  %6772 = vrcp.f32 %v906_v61  ;;  %v722_v14 = vsub.f32 0.0, %v614_v0  ;;  %1928 = vmatmul.bf16.gmra.mxu2 %v7857_v44  ;;  %v7863_v15 = vpack.c.bf16 %v6759_v3, %v6743_v17  ;;  %v6376_v61 = vld [vmem:[#allocation3 + $0x344] sm:$0xf]  ;;  %v5658_v0 = vld [vmem:[#allocation3 + $0x350] sm:$0xf0] }
 0x111   : > { %v567_v16 = vadd.f32 %v566_v11, %v7732_v7  ;;  %v6763_v18 = vpop.eup %6762  ;;  %6774 = vrcp.f32 %v907_v6  ;;  %v908_v19 = vadd.f32 1.0, %v6761_v12  ;;  %v723_v22 = vsub.f32 0.0, %v663_v62  ;;  %2101 = vmatpush.bf16.msra.mxu2 %v5533_v47  ;;  %v5402_v11 = vld [vmem:[#allocation3 + $0x150] sm:$0xf0]  ;;  %2003 = vmatpush.bf16.msra.mxu0 %v5277_v59  ;;  %v6372_v52 = vld [vmem:[#allocation3 + $0x324] sm:$0xf] }
 0x112   : > { %v724_v24 = vsub.f32 0.0, %v518_v9  ;;  %v6765_v25 = vpop.eup %6764  ;;  %v909_v8 = vadd.f32 1.0, %v6763_v18  ;;  %6776 = vpow2.f32 %v832_v57  ;;  %v836_v27 = vmul.f32 1.442695, %v722_v14  ;;  %v6340_v18 = vld [vmem:[#allocation3 + $0x224] sm:$0xf] }
 0x113   : > { %v725_v29 = vsub.f32 0.0, %v567_v16  ;;  %v6767_v30 = vpop.eup %6766  ;;  %6778 = vrcp.f32 %v908_v19  ;;  %v910_v33 = vadd.f32 1.0, %v6765_v25  ;;  %v838_v34 = vmul.f32 1.442695, %v723_v22  ;;  %v5514_v19 = vld [vmem:[#allocation3 + $0x230] sm:$0xf0] }
 0x114   : > { %v840_v36 = vmul.f32 1.442695, %v724_v24  ;;  %v6769_v37 = vpop.eup %6768  ;;  %6780 = vrcp.f32 %v909_v8  ;;  %1977 = vmatmul.bf16.gmra.mxu3 %v7863_v15  ;;  %v5661_v9 = vor.u32 %v6376_v61, %v5658_v0  ;;  %v5405_v16 = vor.u32 %v6312_v1, %v5402_v11 }
 0x115   : > { %v842_v17 = vmul.f32 1.442695, %v725_v29  ;;  %v6771_v31 = vpop.eup %6770  ;;  %6782 = vrcp.f32 %v910_v33  ;;  %v911_v45 = vadd.f32 1.0, %v6769_v37  ;;  %v615_v46 = vpop.f32.mrf.mxu2  ;;  %v6276_v29 = vld [vmem:[#allocation3 + $0x24] sm:$0xf] }
 0x116   : > { %v6773_v54 = vpop.eup %6772  ;;  %6784 = vpow2.f32 %v834_v63  ;;  %v616_v55 = vadd.f32 %v615_v46, %v7736_v20  ;;  %v664_v57 = vpop.f32.mrf.mxu3  ;;  %2150 = vmatpush.bf16.msra.mxu3 %v5661_v9  ;;  %2052 = vmatpush.bf16.msra.mxu1 %v5405_v16 }
 0x117   : > { %v520_v56 = vpop.f32.mrf.mxu0  ;;  %v6775_v41 = vpop.eup %6774  ;;  %6786 = vrcp.f32 %v911_v45  ;;  %v665_v3 = vadd.f32 %v664_v57, %v7738_v21 }
 0x118   : > { %v521_v6 = vadd.f32 %v520_v56, %v7730_v4  ;;  %v569_v62 = vpop.f32.mrf.mxu1  ;;  %v6777_v12 = vpop.eup %6776  ;;  %6788 = vpow2.f32 %v836_v27  ;;  %v726_v63 = vsub.f32 0.0, %v616_v55  ;;  %v5258_v27 = vld [vmem:[#allocation3 + $0x30] sm:$0xf0] }
 0x119   : > { %v570_v14 = vadd.f32 %v569_v62, %v7732_v7  ;;  %v6779_v22 = vpop.eup %6778  ;;  %v912_v24 = vadd.f32 1.0, %v6777_v12  ;;  %6790 = vpow2.f32 %v838_v34  ;;  %v727_v25 = vsub.f32 0.0, %v665_v3  ;;  %v5642_v56 = vld [vmem:[#allocation3 + $0x330] sm:$0xf0] }
 0x11a   : > { %v728_v8 = vsub.f32 0.0, %v521_v6  ;;  %v6781_v33 = vpop.eup %6780  ;;  %6792 = vpow2.f32 %v840_v36  ;;  %v844_v37 = vmul.f32 1.442695, %v726_v63  ;;  %v7871_v42 = vpack.c.bf16 %v6779_v22, %v6767_v30  ;;  %v6308_v30 = vld [vmem:[#allocation3 + $0x124] sm:$0xf] }
 0x11b   : > { %v729_v38 = vsub.f32 0.0, %v570_v14  ;;  %v6783_v45 = vpop.eup %6782  ;;  %6794 = vrcp.f32 %v912_v24  ;;  %v846_v46 = vmul.f32 1.442695, %v727_v25  ;;  %v7873_v50 = vpack.c.bf16 %v6781_v33, %v6771_v31  ;;  %v5386_v3 = vld [vmem:[#allocation3 + $0x130] sm:$0xf0] }
 0x11c   : > { %v848_v47 = vmul.f32 1.442695, %v728_v8  ;;  %v6785_v34 = vpop.eup %6784  ;;  %6796 = vpow2.f32 %v842_v17  ;;  %1835 = vmatmul.bf16.gmra.mxu0 %v7871_v42  ;;  %v7876_v57 = vpack.c.bf16 %v6783_v45, %v6773_v54  ;;  %v5517_v36 = vor.u32 %v6340_v18, %v5514_v19 }
 0x11d   : > { %v850_v55 = vmul.f32 1.442695, %v729_v38  ;;  %v6787_v59 = vpop.eup %6786  ;;  %v913_v61 = vadd.f32 1.0, %v6785_v34  ;;  %6798 = vpow2.f32 %v844_v37  ;;  %1884 = vmatmul.bf16.gmra.mxu1 %v7873_v50  ;;  %v618_v0 = vpop.f32.mrf.mxu2  ;;  %v5261_v1 = vor.u32 %v6276_v29, %v5258_v27 }
 0x11e   : > { %v5645_v31 = vor.u32 %v6372_v52, %v5642_v56  ;;  %v6789_v6 = vpop.eup %6788  ;;  %6800 = vpow2.f32 %v846_v46  ;;  %v619_v17 = vadd.f32 %v618_v0, %v7736_v20  ;;  %v667_v62 = vpop.f32.mrf.mxu3  ;;  %v7880_v9 = vpack.c.bf16 %v6787_v59, %v6775_v41  ;;  %2102 = vmatpush.bf16.msra.mxu2 %v5517_v36  ;;  %v6272_v59 = vld [vmem:[#allocation3 + $0x4] sm:$0xf] }
 0x11f   : > { %v522_v54 = vpop.f32.mrf.mxu0  ;;  %v5389_v11 = vor.u32 %v6308_v30, %v5386_v3  ;;  %v6791_v12 = vpop.eup %6790  ;;  %6802 = vrcp.f32 %v913_v61  ;;  %v914_v63 = vadd.f32 1.0, %v6789_v6  ;;  %v668_v14 = vadd.f32 %v667_v62, %v7738_v21  ;;  %2004 = vmatpush.bf16.msra.mxu0 %v5261_v1  ;;  %v5498_v30 = vld [vmem:[#allocation3 + $0x210] sm:$0xf0]  ;;  %v6368_v6 = vld [vmem:[#allocation3 + $0x304] sm:$0xf] }
 0x120   : > { %v523_v16 = vadd.f32 %v522_v54, %v7730_v4  ;;  %v571_v18 = vpop.f32.mrf.mxu1  ;;  %2151 = vmatpush.bf16.msra.mxu3 %v5645_v31  ;;  %v6793_v19 = vpop.eup %6792  ;;  %v915_v22 = vadd.f32 1.0, %v6791_v12  ;;  %6804 = vpow2.f32 %v848_v47  ;;  %v730_v24 = vsub.f32 0.0, %v619_v17  ;;  %1933 = vmatmul.bf16.gmra.mxu2 %v7876_v57  ;;  %v5242_v3 = vld [vmem:[#allocation3 + $0x10] sm:$0xf0]  ;;  %v6304_v12 = vld [vmem:[#allocation3 + $0x104] sm:$0xf] }
 0x121   : > { %v572_v41 = vadd.f32 %v571_v18, %v7732_v7  ;;  %2053 = vmatpush.bf16.msra.mxu1 %v5389_v11  ;;  %v6795_v25 = vpop.eup %6794  ;;  %6806 = vrcp.f32 %v914_v63  ;;  %v916_v8 = vadd.f32 1.0, %v6793_v19  ;;  %v731_v29 = vsub.f32 0.0, %v668_v14  ;;  %v6336_v7 = vld [vmem:[#allocation3 + $0x204] sm:$0xf]  ;;  %v5370_v63 = vld [vmem:[#allocation3 + $0x110] sm:$0xf0] }
 0x122   : > { %v6797_v33 = vpop.eup %6796  ;;  %6808 = vrcp.f32 %v915_v22  ;;  %v852_v38 = vmul.f32 1.442695, %v730_v24  ;;  %v732_v27 = vsub.f32 0.0, %v523_v16  ;;  %v5501_v31 = vor.u32 %v6336_v7, %v5498_v30 }
 0x123   : > { %v6799_v37 = vpop.eup %6798  ;;  %6810 = vrcp.f32 %v916_v8  ;;  %v917_v4 = vadd.f32 1.0, %v6797_v33  ;;  %v854_v47 = vmul.f32 1.442695, %v731_v29  ;;  %v733_v52 = vsub.f32 0.0, %v572_v41 }
 0x124   : > { %v6801_v45 = vpop.eup %6800  ;;  %v918_v46 = vadd.f32 1.0, %v6799_v37  ;;  %6812 = vpow2.f32 %v850_v55  ;;  %1982 = vmatmul.bf16.gmra.mxu3 %v7880_v9  ;;  %v5626_v55 = vld [vmem:[#allocation3 + $0x310] sm:$0xf0]  ;;  %v856_v62 = vmul.f32 1.442695, %v732_v27  ;;  %v5245_v11 = vor.u32 %v6272_v59, %v5242_v3  ;;  %2103 = vmatpush.bf16.msra.mxu2 %v5501_v31 }
 0x125   : > { %v6803_v34 = vpop.eup %6802  ;;  %6814 = vrcp.f32 %v917_v4  ;;  %v919_v36 = vadd.f32 1.0, %v6801_v45  ;;  %v620_v56 = vpop.f32.mrf.mxu2  ;;  %v858_v16 = vmul.f32 1.442695, %v733_v52  ;;  %v5629_v19 = vor.u32 %v6368_v6, %v5626_v55 }
 0x126   : > { %v6805_v61 = vpop.eup %6804  ;;  %6816 = vrcp.f32 %v918_v46  ;;  %v621_v0 = vadd.f32 %v620_v56, %v7736_v20  ;;  %v669_v1 = vpop.f32.mrf.mxu3  ;;  %v5373_v22 = vor.u32 %v6304_v12, %v5370_v63  ;;  %2005 = vmatpush.bf16.msra.mxu0 %v5245_v11  ;;  %v6399_v12 = vld [vmem:[#allocation3 + $0x3f4] sm:$0xf0] }
 0x127   : > { %v6807_v17 = vpop.eup %6806  ;;  %6818 = vrcp.f32 %v919_v36  ;;  %v670_v54 = vadd.f32 %v669_v1, %v7738_v21  ;;  %2152 = vmatpush.bf16.msra.mxu3 %v5629_v19  ;;  %v920_v45 = vadd.f32 1.0, %v6805_v61  ;;  %v5616_v61 = vld [vmem:[#allocation3 + $0x2e8] sm:$0xf] }
 0x128   : > { %v6809_v14 = vpop.eup %6808  ;;  %v734_v18 = vsub.f32 0.0, %v621_v0  ;;  %6820 = vpow2.f32 %v852_v38  ;;  %2054 = vmatpush.bf16.msra.mxu1 %v5373_v22  ;;  %v6367_v0 = vld [vmem:[#allocation3 + $0x2f4] sm:$0xf0]  ;;  %v5360_v1 = vld [vmem:[#allocation3 + $0xe8] sm:$0xf] }
 0x129   : > { %v6811_v20 = vpop.eup %6810  ;;  %v735_v24 = vsub.f32 0.0, %v670_v54  ;;  %6822 = vpow2.f32 %v854_v47  ;;  %v5617_v55 = vor.u32 %v6367_v0, %v5616_v61  ;;  %v5344_v61 = vld [vmem:[#allocation3 + $0xc8] sm:$0xf] }
 0x12a   : > { %v6813_v41 = vpop.eup %6812  ;;  %v860_v8 = vmul.f32 1.442695, %v734_v18  ;;  %v7889_v29 = vpack.c.bf16 %v6811_v20, %v6795_v25  ;;  %6824 = vpow2.f32 %v856_v62  ;;  %v5744_v62 = vld [vmem:[#allocation3 + $0x3e8] sm:$0xf] }
 0x12b   : > { %v6815_v21 = vpop.eup %6814  ;;  %v862_v33 = vmul.f32 1.442695, %v735_v24  ;;  %6826 = vpow2.f32 %v858_v16  ;;  %v921_v46 = vadd.f32 1.0, %v6813_v41  ;;  %2292 = vmatpush.bf16.msrb.mxu2 %v5617_v55  ;;  %v5745_v63 = vor.u32 %v6399_v12, %v5744_v62 }
 0x12c   : > { %v6817_v37 = vpop.eup %6816  ;;  %1840 = vmatmul.bf16.gmra.mxu0 %v7889_v29  ;;  %v7892_v4 = vpack.c.bf16 %v6815_v21, %v6803_v34  ;;  %6828 = vpow2.f32 %v860_v8 }
 0x12d   : > { %v6819_v27 = vpop.eup %6818  ;;  %v7894_v38 = vpack.c.bf16 %v6817_v37, %v6807_v17  ;;  %6830 = vpow2.f32 %v862_v33  ;;  %v6303_v17 = vld [vmem:[#allocation3 + $0xf4] sm:$0xf0]  ;;  %2341 = vmatpush.bf16.msrb.mxu3 %v5745_v63 }
 0x12e   : > { %1889 = vmatmul.bf16.gmra.mxu1 %v7892_v4  ;;  %v6821_v25 = vpop.eup %6820  ;;  %v7898_v52 = vpack.c.bf16 %v6819_v27, %v6809_v14  ;;  %6832 = vrcp.f32 %v920_v45  ;;  %v5361_v11 = vor.u32 %v6303_v17, %v5360_v1  ;;  %v7915_v27 = vld [vmem:[%s8820_s4] sm:$0xf]  ;;  %v6299_v1 = vld [vmem:[#allocation3 + $0xd4] sm:$0xf0] }
 0x12f   : > { %v6823_v47 = vpop.eup %6822  ;;  %v922_v34 = vadd.f32 1.0, %v6821_v25  ;;  %6834 = vrcp.f32 %v921_v46  ;;  %v7919_v45 = vperm.slane %v7915_v27, 0  ;;  %v5488_v25 = vld [vmem:[#allocation3 + $0x1e8] sm:$0xf]  ;;  %v6335_v46 = vld [vmem:[#allocation3 + $0x1f4] sm:$0xf0] }
 0x130   : > { %1938 = vmatmul.bf16.gmra.mxu2 %v7894_v38  ;;  %v6825_v7 = vpop.eup %6824  ;;  %v923_v3 = vadd.f32 1.0, %v6823_v47  ;;  %2194 = vmatpush.bf16.msrb.mxu0 %v5361_v11  ;;  %v5489_v47 = vor.u32 %v6335_v46, %v5488_v25 }
 0x131   : > { %v6827_v36 = vpop.eup %6826  ;;  %v924_v56 = vadd.f32 1.0, %v6825_v7 }
 0x132   : > { %v925_v30 = vadd.f32 1.0, %v6827_v36  ;;  %v6829_v59 = vpop.eup %6828  ;;  %2243 = vmatpush.bf16.msrb.mxu1 %v5489_v47 }
 0x133   : > { %6836 = vrcp.f32 %v924_v56  ;;  %v6831_v31 = vpop.eup %6830  ;;  %v926_v6 = vadd.f32 1.0, %v6829_v59  ;;  %v6363_v59 = vld [vmem:[#allocation3 + $0x2d4] sm:$0xf0] }
 0x134   : > { %1987 = vmatmul.bf16.gmra.mxu3 %v7898_v52  ;;  %6838 = vrcp.f32 %v925_v30  ;;  %v927_v54 = vadd.f32 1.0, %v6831_v31  ;;  %v6833_v14 = vpop.eup %6832  ;;  %v5600_v30 = vld [vmem:[#allocation3 + $0x2c8] sm:$0xf] }
 0x135   : > { %6840 = vrcp.f32 %v922_v34  ;;  %v6835_v16 = vpop.eup %6834  ;;  %v5601_v0 = vor.u32 %v6363_v59, %v5600_v30  ;;  %v5728_v31 = vld [vmem:[#allocation3 + $0x3c8] sm:$0xf]  ;;  %v6359_v59 = vld [vmem:[#allocation3 + $0x2b4] sm:$0xf0] }
 0x136   : > { %6842 = vrcp.f32 %v926_v6  ;;  %v5345_v6 = vor.u32 %v6299_v1, %v5344_v61  ;;  %v5584_v30 = vld [vmem:[#allocation3 + $0x2a8] sm:$0xf] }
 0x137   : > { %6844 = vrcp.f32 %v927_v54  ;;  %2293 = vmatpush.bf16.msrb.mxu2 %v5601_v0  ;;  %v5328_v61 = vld [vmem:[#allocation3 + $0xa8] sm:$0xf] }
 0x138   : > { %6846 = vrcp.f32 %v923_v3  ;;  %v6395_v3 = vld [vmem:[#allocation3 + $0x3d4] sm:$0xf0]  ;;  %2195 = vmatpush.bf16.msrb.mxu0 %v5345_v6  ;;  %v5712_v6 = vld [vmem:[#allocation3 + $0x3a8] sm:$0xf] }
 0x139   : > { %v6837_v18 = vpop.eup %6836  ;;  %v5729_v55 = vor.u32 %v6395_v3, %v5728_v31  ;;  %v5585_v31 = vor.u32 %v6359_v59, %v5584_v30  ;;  %v6295_v3 = vld [vmem:[#allocation3 + $0xb4] sm:$0xf0] }
 0x13a   : > { %v6839_v19 = vpop.eup %6838  ;;  %v7901_v22 = vpack.c.bf16 %v6837_v18, %v6833_v14  ;;  %v5472_v18 = vld [vmem:[#allocation3 + $0x1c8] sm:$0xf] }
 0x13b   : > { %v6841_v20 = vpop.eup %6840  ;;  %v7903_v24 = vpack.c.bf16 %v6839_v19, %v6835_v16  ;;  %2342 = vmatpush.bf16.msrb.mxu3 %v5729_v55  ;;  %v6331_v19 = vld [vmem:[#allocation3 + $0x1d4] sm:$0xf0]  ;;  %2294 = vmatpush.bf16.msrb.mxu2 %v5585_v31  ;;  %v5568_v31 = vld [vmem:[#allocation3 + $0x288] sm:$0xf] }
 0x13c   : > { %v6843_v41 = vpop.eup %6842  ;;  %1845 = vmatmul.bf16.gmra.mxu0 %v7901_v22 }
 0x13d   : > { %v6845_v8 = vpop.eup %6844  ;;  %v7907_v21 = vpack.c.bf16 %v6843_v41, %v6841_v20 }
 0x13e   : > { %1894 = vmatmul.bf16.gmra.mxu1 %v7903_v24  ;;  %v6847_v33 = vpop.eup %6846 }
 0x13f   : > { %v7910_v37 = vpack.c.bf16 %v6845_v8, %v6847_v33  ;;  %v5473_v8 = vor.u32 %v6331_v19, %v5472_v18 }
 0x140   : > { %1943 = vmatmul.bf16.gmra.mxu2 %v7907_v21 }
 0x141   : > { %2244 = vmatpush.bf16.msrb.mxu1 %v5473_v8 }
 0x144   : > { %1992 = vmatmul.bf16.gmra.mxu3 %v7910_v37 }
 0x147   : > { %v1811_v7 = vpop.f32.mrf.mxu0 }
 0x148   : > { %v1812_v36 = vadd.f32 %v1811_v7, %v7919_v45  ;;  %v1860_v34 = vpop.f32.mrf.mxu1 }
 0x14a   : > { %v1861_v56 = vadd.f32 %v1860_v34, %v1812_v36 }
 0x14c   : > { %2006 = vmatmul.bf16.vlgmr.msra.gmra.mxu0 %v7758_v60 }
 0x14e   : > { %2055 = vmatmul.bf16.vlgmr.msra.gmra.mxu1 %v7760_v2 }
 0x14f   : > { %v1813_v17 = vpop.f32.mrf.mxu0 }
 0x150   : > { %v1814_v62 = vadd.f32 %v1813_v17, %v7919_v45  ;;  %v1862_v54 = vpop.f32.mrf.mxu1  ;;  %2104 = vmatmul.bf16.vlgmr.msra.gmra.mxu2 %v7764_v13  ;;  %v5329_v17 = vor.u32 %v6295_v3, %v5328_v61  ;;  %v6355_v3 = vld [vmem:[#allocation3 + $0x294] sm:$0xf0] }
 0x151   : > { %v1909_v11 = vpop.f32.mrf.mxu2 }
 0x152   : > { %v1863_v12 = vadd.f32 %v1862_v54, %v1814_v62  ;;  %v1910_v63 = vadd.f32 %v1909_v11, %v1861_v56  ;;  %v6391_v62 = vld [vmem:[#allocation3 + $0x3b4] sm:$0xf0]  ;;  %2196 = vmatpush.bf16.msrb.mxu0 %v5329_v17 }
 0x154   : > { %2153 = vmatmul.bf16.vlgmr.msra.gmra.mxu3 %v7770_v28  ;;  %v1958_v14 = vpop.f32.mrf.mxu3 }
 0x155   : > { %v1959_v16 = vadd.f32 %v1958_v14, %v1910_v63 }
 0x157   : > { %v2586_v20 = vsub.f32 0.0, %v1959_v16  ;;  %v1816_v41 = vpop.f32.mrf.mxu0 }
 0x158   : > { %v1817_v33 = vadd.f32 %v1816_v41, %v7919_v45  ;;  %v6327_v41 = vld [vmem:[#allocation3 + $0x1b4] sm:$0xf0] }
 0x159   : > { %v1865_v25 = vpop.f32.mrf.mxu1  ;;  %v1911_v46 = vpop.f32.mrf.mxu2  ;;  %v2650_v47 = vmul.f32 1.442695, %v2586_v20  ;;  %v5456_v20 = vld [vmem:[#allocation3 + $0x1a8] sm:$0xf] }
 0x15a   : > { %v1866_v7 = vadd.f32 %v1865_v25, %v1817_v33  ;;  %v1912_v36 = vadd.f32 %v1911_v46, %v1863_v12  ;;  %v5713_v12 = vor.u32 %v6391_v62, %v5712_v6  ;;  %v5457_v46 = vor.u32 %v6327_v41, %v5456_v20  ;;  %v5312_v6 = vld [vmem:[#allocation3 + $0x88] sm:$0xf] }
 0x15b   : > { %6848 = vpow2.f32 %v2650_v47  ;;  %v5569_v62 = vor.u32 %v6355_v3, %v5568_v31 }
 0x15c   : > { %v1960_v34 = vpop.f32.mrf.mxu3  ;;  %2011 = vmatmul.bf16.gmra.mxu0 %v7782_v5  ;;  %2343 = vmatpush.bf16.msrb.mxu3 %v5713_v12  ;;  %v6387_v12 = vld [vmem:[#allocation3 + $0x394] sm:$0xf0] }
 0x15d   : > { %v1961_v56 = vadd.f32 %v1960_v34, %v1912_v36  ;;  %2245 = vmatpush.bf16.msrb.mxu1 %v5457_v46  ;;  %2295 = vmatpush.bf16.msrb.mxu2 %v5569_v62 }
 0x15e   : > { %2060 = vmatmul.bf16.gmra.mxu1 %v7786_v23 }
 0x15f   : > { %v2590_v0 = vsub.f32 0.0, %v1961_v56  ;;  %v1818_v1 = vpop.f32.mrf.mxu0 }
 0x160   : > { %v1819_v55 = vadd.f32 %v1818_v1, %v7919_v45  ;;  %2109 = vmatmul.bf16.gmra.mxu2 %v7791_v40 }
 0x161   : > { %v2658_v54 = vmul.f32 1.442695, %v2590_v0  ;;  %v1867_v11 = vpop.f32.mrf.mxu1  ;;  %v6849_v16 = vpop.eup %6848 }
 0x162   : > { %v1868_v63 = vadd.f32 %v1867_v11, %v1819_v55  ;;  %v2778_v8 = vadd.f32 1.0, %v6849_v16  ;;  %v5696_v11 = vld [vmem:[#allocation3 + $0x388] sm:$0xf] }
 0x163   : > { %6850 = vpow2.f32 %v2658_v54  ;;  %v1914_v14 = vpop.f32.mrf.mxu2  ;;  %v6291_v54 = vld [vmem:[#allocation3 + $0x94] sm:$0xf0]  ;;  %v5697_v16 = vor.u32 %v6387_v12, %v5696_v11 }
 0x164   : > { %2158 = vmatmul.bf16.gmra.mxu3 %v7798_v53  ;;  %v1915_v18 = vadd.f32 %v1914_v14, %v1866_v7  ;;  %6852 = vrcp.f32 %v2778_v8 }
 0x165   : > { %2344 = vmatpush.bf16.msrb.mxu3 %v5697_v16  ;;  %v5552_v16 = vld [vmem:[#allocation3 + $0x268] sm:$0xf] }
 0x166   : > { %v1963_v19 = vpop.f32.mrf.mxu3 }
 0x167   : > { %v1964_v33 = vadd.f32 %v1963_v19, %v1915_v18  ;;  %v1821_v25 = vpop.f32.mrf.mxu0 }
 0x168   : > { %v1822_v47 = vadd.f32 %v1821_v25, %v7919_v45 }
 0x169   : > { %v6851_v36 = vpop.eup %6850  ;;  %v2594_v34 = vsub.f32 0.0, %v1964_v33  ;;  %v1870_v56 = vpop.f32.mrf.mxu1 }
 0x16a   : > { %v2782_v30 = vadd.f32 1.0, %v6851_v36  ;;  %v1871_v59 = vadd.f32 %v1870_v56, %v1822_v47  ;;  %v6853_v18 = vpop.eup %6852 }
 0x16b   : > { %v1916_v61 = vpop.f32.mrf.mxu2  ;;  %v2666_v0 = vmul.f32 1.442695, %v2594_v34 }
 0x16c   : > { %6854 = vrcp.f32 %v2782_v30  ;;  %v1917_v7 = vadd.f32 %v1916_v61, %v1868_v63  ;;  %2016 = vmatmul.bf16.gmra.mxu0 %v7807_v32  ;;  %v5313_v63 = vor.u32 %v6291_v54, %v5312_v6 }
 0x16d   : > { %6856 = vpow2.f32 %v2666_v0  ;;  %v5440_v0 = vld [vmem:[#allocation3 + $0x188] sm:$0xf] }
 0x16e   : > { %2065 = vmatmul.bf16.gmra.mxu1 %v7809_v39  ;;  %v1965_v1 = vpop.f32.mrf.mxu3  ;;  %2197 = vmatpush.bf16.msrb.mxu0 %v5313_v63 }
 0x16f   : > { %v1966_v55 = vadd.f32 %v1965_v1, %v1917_v7  ;;  %v1823_v17 = vpop.f32.mrf.mxu0  ;;  %v6323_v7 = vld [vmem:[#allocation3 + $0x194] sm:$0xf0] }
 0x170   : > { %v1824_v14 = vadd.f32 %v1823_v17, %v7919_v45  ;;  %2114 = vmatmul.bf16.gmra.mxu2 %v7813_v49  ;;  %v5441_v6 = vor.u32 %v6323_v7, %v5440_v0 }
 0x171   : > { %v2598_v19 = vsub.f32 0.0, %v1966_v55  ;;  %v1872_v20 = vpop.f32.mrf.mxu1 }
 0x172   : > { %v6855_v41 = vpop.eup %6854  ;;  %v1873_v8 = vadd.f32 %v1872_v20, %v1824_v14  ;;  %2246 = vmatpush.bf16.msrb.mxu1 %v5441_v6 }
 0x173   : > { %v2674_v33 = vmul.f32 1.442695, %v2598_v19  ;;  %v1919_v25 = vpop.f32.mrf.mxu2  ;;  %v7938_v46 = vpack.c.bf16 %v6855_v41, %v6853_v18  ;;  %v6857_v36 = vpop.eup %6856  ;;  %v6351_v18 = vld [vmem:[#allocation3 + $0x274] sm:$0xf0]  ;;  %v5296_v19 = vld [vmem:[#allocation3 + $0x68] sm:$0xf] }
 0x174   : > { %2163 = vmatmul.bf16.gmra.mxu3 %v7820_v10  ;;  %v1920_v47 = vadd.f32 %v1919_v25, %v1871_v59  ;;  %v2786_v1 = vadd.f32 1.0, %v6857_v36  ;;  %v5553_v41 = vor.u32 %v6351_v18, %v5552_v16  ;;  %v6383_v25 = vld [vmem:[#allocation3 + $0x374] sm:$0xf0] }
 0x175   : > { %6858 = vpow2.f32 %v2674_v33  ;;  %v6287_v33 = vld [vmem:[#allocation3 + $0x74] sm:$0xf0] }
 0x176   : > { %v1968_v34 = vpop.f32.mrf.mxu3  ;;  %6860 = vrcp.f32 %v2786_v1  ;;  %2296 = vmatpush.bf16.msrb.mxu2 %v5553_v41 }
 0x177   : > { %v1969_v56 = vadd.f32 %v1968_v34, %v1920_v47  ;;  %v1826_v30 = vpop.f32.mrf.mxu0  ;;  %v5297_v34 = vor.u32 %v6287_v33, %v5296_v19 }
 0x178   : > { %v1827_v61 = vadd.f32 %v1826_v30, %v7919_v45 }
 0x179   : > { %v2602_v31 = vsub.f32 0.0, %v1969_v56  ;;  %v1875_v3 = vpop.f32.mrf.mxu1  ;;  %2198 = vmatpush.bf16.msrb.mxu0 %v5297_v34  ;;  %v5280_v34 = vld [vmem:[#allocation3 + $0x48] sm:$0xf] }
 0x17a   : > { %v1876_v55 = vadd.f32 %v1875_v3, %v1827_v61 }
 0x17b   : > { %v6859_v17 = vpop.eup %6858  ;;  %v1921_v62 = vpop.f32.mrf.mxu2  ;;  %v2682_v11 = vmul.f32 1.442695, %v2602_v31 }
 0x17c   : > { %v2790_v54 = vadd.f32 1.0, %v6859_v17  ;;  %v1922_v59 = vadd.f32 %v1921_v62, %v1873_v8  ;;  %2021 = vmatmul.bf16.gmra.mxu0 %v7829_v58  ;;  %v5680_v8 = vld [vmem:[#allocation3 + $0x368] sm:$0xf]  ;;  %v6861_v61 = vpop.eup %6860 }
 0x17d   : > { %v5681_v56 = vor.u32 %v6383_v25, %v5680_v8  ;;  %v5424_v62 = vld [vmem:[#allocation3 + $0x168] sm:$0xf] }
 0x17e   : > { %6862 = vrcp.f32 %v2790_v54  ;;  %2070 = vmatmul.bf16.gmra.mxu1 %v7833_v51  ;;  %v1970_v12 = vpop.f32.mrf.mxu3  ;;  %v6319_v54 = vld [vmem:[#allocation3 + $0x174] sm:$0xf0] }
 0x17f   : > { %v1971_v14 = vadd.f32 %v1970_v12, %v1922_v59  ;;  %v1828_v63 = vpop.f32.mrf.mxu0  ;;  %6864 = vpow2.f32 %v2682_v11  ;;  %2345 = vmatpush.bf16.msrb.mxu3 %v5681_v56  ;;  %v5425_v12 = vor.u32 %v6319_v54, %v5424_v62 }
 0x180   : > { %v1829_v20 = vadd.f32 %v1828_v63, %v7919_v45  ;;  %2119 = vmatmul.bf16.gmra.mxu2 %v7837_v26 }
 0x181   : > { %v2606_v47 = vsub.f32 0.0, %v1971_v14  ;;  %v1877_v36 = vpop.f32.mrf.mxu1  ;;  %2247 = vmatpush.bf16.msrb.mxu1 %v5425_v12 }
 0x182   : > { %v1878_v30 = vadd.f32 %v1877_v36, %v1829_v20  ;;  %v6347_v36 = vld [vmem:[#allocation3 + $0x254] sm:$0xf0] }
 0x183   : > { %v2690_v0 = vmul.f32 1.442695, %v2606_v47  ;;  %v1924_v7 = vpop.f32.mrf.mxu2  ;;  %v5536_v47 = vld [vmem:[#allocation3 + $0x248] sm:$0xf] }
 0x184   : > { %v6863_v1 = vpop.eup %6862  ;;  %2168 = vmatmul.bf16.gmra.mxu3 %v7844_v48  ;;  %v1925_v31 = vadd.f32 %v1924_v7, %v1876_v55  ;;  %v6283_v7 = vld [vmem:[#allocation3 + $0x54] sm:$0xf0] }
 0x185   : > { %6866 = vpow2.f32 %v2690_v0  ;;  %v7947_v3 = vpack.c.bf16 %v6863_v1, %v6861_v61  ;;  %v6865_v6 = vpop.eup %6864  ;;  %v5537_v0 = vor.u32 %v6347_v36, %v5536_v47  ;;  %v5664_v1 = vld [vmem:[#allocation3 + $0x348] sm:$0xf] }
 0x186   : > { %v2794_v14 = vadd.f32 1.0, %v6865_v6 }
 0x187   : > { %8851 = vst [vmem:[#allocation12_spill] sm:$0xff] %v7947_v3  ;;  %v1973_v17 = vpop.f32.mrf.mxu3  ;;  %2297 = vmatpush.bf16.msrb.mxu2 %v5537_v0 }
 0x188   : > { %v1974_v11 = vadd.f32 %v1973_v17, %v1925_v31  ;;  %v1831_v59 = vpop.f32.mrf.mxu0  ;;  %6868 = vrcp.f32 %v2794_v14  ;;  %v6379_v31 = vld [vmem:[#allocation3 + $0x354] sm:$0xf0]  ;;  %v5281_v17 = vor.u32 %v6283_v7, %v5280_v34 }
 0x189   : > { %v1832_v63 = vadd.f32 %v1831_v59, %v7919_v45  ;;  %v1880_v16 = vpop.f32.mrf.mxu1  ;;  %v5665_v62 = vor.u32 %v6379_v31, %v5664_v1 }
 0x18a   : > { %v2610_v18 = vsub.f32 0.0, %v1974_v11  ;;  %2199 = vmatpush.bf16.msrb.mxu0 %v5281_v17  ;;  %v5520_v17 = vld [vmem:[#allocation3 + $0x228] sm:$0xf] }
 0x18b   : > { %v6867_v19 = vpop.eup %6866  ;;  %v1881_v20 = vadd.f32 %v1880_v16, %v1832_v63  ;;  %v1926_v41 = vpop.f32.mrf.mxu2  ;;  %2346 = vmatpush.bf16.msrb.mxu3 %v5665_v62  ;;  %v6343_v62 = vld [vmem:[#allocation3 + $0x234] sm:$0xf0] }
 0x18c   : > { %v2798_v55 = vadd.f32 1.0, %v6867_v19  ;;  %v1927_v33 = vadd.f32 %v1926_v41, %v1878_v30  ;;  %v2698_v8 = vmul.f32 1.442695, %v2610_v18  ;;  %2026 = vmatmul.bf16.gmra.mxu0 %v7851_v35 }
 0x18e   : > { %6870 = vrcp.f32 %v2798_v55  ;;  %2075 = vmatmul.bf16.gmra.mxu1 %v7853_v43  ;;  %v6869_v11 = vpop.eup %6868  ;;  %v5408_v55 = vld [vmem:[#allocation3 + $0x148] sm:$0xf] }
 0x18f   : > { %v1975_v25 = vpop.f32.mrf.mxu3  ;;  %6872 = vpow2.f32 %v2698_v8 }
 0x190   : > { %v1976_v56 = vadd.f32 %v1975_v25, %v1927_v33  ;;  %v1833_v61 = vpop.f32.mrf.mxu0  ;;  %2124 = vmatmul.bf16.gmra.mxu2 %v7857_v44  ;;  %v6315_v33 = vld [vmem:[#allocation3 + $0x154] sm:$0xf0] }
 0x191   : > { %v1834_v30 = vadd.f32 %v1833_v61, %v7919_v45  ;;  %v1882_v6 = vpop.f32.mrf.mxu1  ;;  %v5409_v25 = vor.u32 %v6315_v33, %v5408_v55 }
 0x192   : > { %v2614_v54 = vsub.f32 0.0, %v1976_v56 }
 0x193   : > { %v1883_v59 = vadd.f32 %v1882_v6, %v1834_v30  ;;  %v1929_v12 = vpop.f32.mrf.mxu2  ;;  %2248 = vmatpush.bf16.msrb.mxu1 %v5409_v25 }
 0x194   : > { %v6871_v14 = vpop.eup %6870  ;;  %v2706_v63 = vmul.f32 1.442695, %v2614_v54  ;;  %2173 = vmatmul.bf16.gmra.mxu3 %v7863_v15  ;;  %v1930_v16 = vadd.f32 %v1929_v12, %v1881_v20  ;;  %v5264_v54 = vld [vmem:[#allocation3 + $0x28] sm:$0xf]  ;;  %v5521_v12 = vor.u32 %v6343_v62, %v5520_v17 }
 0x195   : > { %v7955_v18 = vpack.c.bf16 %v6871_v14, %v6869_v11  ;;  %v6873_v19 = vpop.eup %6872  ;;  %v6279_v14 = vld [vmem:[#allocation3 + $0x34] sm:$0xf0]  ;;  %v5248_v62 = vld [vmem:[#allocation3 + $0x8] sm:$0xf] }
 0x196   : > { %6874 = vpow2.f32 %v2706_v63  ;;  %v2802_v36 = vadd.f32 1.0, %v6873_v19  ;;  %v5648_v63 = vld [vmem:[#allocation3 + $0x328] sm:$0xf]  ;;  %v5265_v19 = vor.u32 %v6279_v14, %v5264_v54  ;;  %2298 = vmatpush.bf16.msrb.mxu2 %v5521_v12  ;;  %v6275_v54 = vld [vmem:[#allocation3 + $0x14] sm:$0xf0] }
 0x197   : > { %v1978_v41 = vpop.f32.mrf.mxu3  ;;  %v5249_v14 = vor.u32 %v6275_v54, %v5248_v62 }
 0x198   : > { %v1979_v8 = vadd.f32 %v1978_v41, %v1930_v16  ;;  %6876 = vrcp.f32 %v2802_v36  ;;  %v6375_v16 = vld [vmem:[#allocation3 + $0x334] sm:$0xf0]  ;;  %2200 = vmatpush.bf16.msrb.mxu0 %v5265_v19 }
 0x199   : > { %v1836_v47 = vpop.f32.mrf.mxu0  ;;  %v5649_v41 = vor.u32 %v6375_v16, %v5648_v63  ;;  %v6307_v63 = vld [vmem:[#allocation3 + $0x114] sm:$0xf0] }
 0x19a   : > { %v2618_v34 = vsub.f32 0.0, %v1979_v8  ;;  %v1837_v56 = vadd.f32 %v1836_v47, %v7919_v45  ;;  %v1885_v61 = vpop.f32.mrf.mxu1 }
 0x19b   : > { %v1931_v0 = vpop.f32.mrf.mxu2  ;;  %2347 = vmatpush.bf16.msrb.mxu3 %v5649_v41 }
 0x19c   : > { %v6875_v7 = vpop.eup %6874  ;;  %v1886_v1 = vadd.f32 %v1885_v61, %v1837_v56  ;;  %v1932_v20 = vadd.f32 %v1931_v0, %v1883_v59  ;;  %v2714_v30 = vmul.f32 1.442695, %v2618_v34  ;;  %2031 = vmatmul.bf16.gmra.mxu0 %v7871_v42  ;;  %v5392_v61 = vld [vmem:[#allocation3 + $0x128] sm:$0xf]  ;;  %v6311_v0 = vld [vmem:[#allocation3 + $0x134] sm:$0xf0] }
 0x19d   : > { %v2806_v31 = vadd.f32 1.0, %v6875_v7  ;;  %2201 = vmatpush.bf16.msrb.mxu0 %v5249_v14 }
 0x19e   : > { %2080 = vmatmul.bf16.gmra.mxu1 %v7873_v50  ;;  %v6877_v47 = vpop.eup %6876 }
 0x19f   : > { %6878 = vrcp.f32 %v2806_v31  ;;  %v1980_v6 = vpop.f32.mrf.mxu3 }
 0x1a0   : > { %v1981_v11 = vadd.f32 %v1980_v6, %v1932_v20  ;;  %2129 = vmatmul.bf16.gmra.mxu2 %v7876_v57  ;;  %6880 = vpow2.f32 %v2714_v30  ;;  %v5393_v20 = vor.u32 %v6311_v0, %v5392_v61  ;;  %v6339_v61 = vld [vmem:[#allocation3 + $0x214] sm:$0xf0]  ;;  %v5632_v0 = vld [vmem:[#allocation3 + $0x308] sm:$0xf] }
 0x1a1   : > { %v1838_v59 = vpop.f32.mrf.mxu0 }
 0x1a2   : > { %v2622_v55 = vsub.f32 0.0, %v1981_v11  ;;  %v1839_v33 = vadd.f32 %v1838_v59, %v7919_v45  ;;  %v1887_v8 = vpop.f32.mrf.mxu1  ;;  %2249 = vmatpush.bf16.msrb.mxu1 %v5393_v20  ;;  %v5376_v11 = vld [vmem:[#allocation3 + $0x108] sm:$0xf] }
 0x1a3   : > { %v1934_v25 = vpop.f32.mrf.mxu2  ;;  %v5377_v19 = vor.u32 %v6307_v63, %v5376_v11 }
 0x1a4   : > { %v2722_v36 = vmul.f32 1.442695, %v2622_v55  ;;  %v1888_v34 = vadd.f32 %v1887_v8, %v1839_v33  ;;  %2178 = vmatmul.bf16.gmra.mxu3 %v7880_v9  ;;  %v1935_v56 = vadd.f32 %v1934_v25, %v1886_v1 }
 0x1a5   : > { %v6879_v7 = vpop.eup %6878 }
 0x1a6   : > { %6882 = vpow2.f32 %v2722_v36  ;;  %v7963_v31 = vpack.c.bf16 %v6879_v7, %v6877_v47  ;;  %v6881_v30 = vpop.eup %6880  ;;  %2250 = vmatpush.bf16.msrb.mxu1 %v5377_v19 }
 0x1a7   : > { %v1983_v6 = vpop.f32.mrf.mxu3  ;;  %v2810_v16 = vadd.f32 1.0, %v6881_v30  ;;  %v6371_v30 = vld [vmem:[#allocation3 + $0x314] sm:$0xf0] }
 0x1a8   : > { %v1984_v17 = vadd.f32 %v1983_v6, %v1935_v56  ;;  %v5504_v56 = vld [vmem:[#allocation3 + $0x208] sm:$0xf] }
 0x1a9   : > { %v1841_v12 = vpop.f32.mrf.mxu0  ;;  %6884 = vrcp.f32 %v2810_v16  ;;  %v5505_v20 = vor.u32 %v6339_v61, %v5504_v56 }
 0x1aa   : > { %v2626_v59 = vsub.f32 0.0, %v1984_v17  ;;  %v1842_v1 = vadd.f32 %v1841_v12, %v7919_v45  ;;  %v5633_v17 = vor.u32 %v6371_v30, %v5632_v0 }
 0x1ab   : > { %v1890_v41 = vpop.f32.mrf.mxu1  ;;  %v1936_v55 = vpop.f32.mrf.mxu2  ;;  %2299 = vmatpush.bf16.msrb.mxu2 %v5505_v20 }
 0x1ac   : > { %v6883_v33 = vpop.eup %6882  ;;  %v1891_v8 = vadd.f32 %v1890_v41, %v1842_v1  ;;  %v1937_v25 = vadd.f32 %v1936_v55, %v1888_v34  ;;  %v2730_v36 = vmul.f32 1.442695, %v2626_v59  ;;  %2036 = vmatmul.bf16.gmra.mxu0 %v7889_v29  ;;  %2348 = vmatpush.bf16.msrb.mxu3 %v5633_v17 }
 0x1ad   : > { %v2814_v47 = vadd.f32 1.0, %v6883_v33 }
 0x1ae   : > { %2085 = vmatmul.bf16.gmra.mxu1 %v7892_v4 }
 0x1af   : > { %6886 = vrcp.f32 %v2814_v47  ;;  %v1985_v7 = vpop.f32.mrf.mxu3  ;;  %v6885_v14 = vpop.eup %6884 }
 0x1b0   : > { %v1986_v6 = vadd.f32 %v1985_v7, %v1937_v25  ;;  %2134 = vmatmul.bf16.gmra.mxu2 %v7894_v38  ;;  %6888 = vpow2.f32 %v2730_v36 }
 0x1b1   : > { %v1843_v34 = vpop.f32.mrf.mxu0 }
 0x1b2   : > { %v2630_v62 = vsub.f32 0.0, %v1986_v6  ;;  %v1844_v54 = vadd.f32 %v1843_v34, %v7919_v45  ;;  %v6365_v34 = vld [vmem:[#allocation3 + $0x2ec] sm:$0xf] }
 0x1b3   : > { %v1892_v11 = vpop.f32.mrf.mxu1  ;;  %v1939_v12 = vpop.f32.mrf.mxu2 }
 0x1b4   : > { %v2738_v63 = vmul.f32 1.442695, %v2630_v62  ;;  %v1893_v16 = vadd.f32 %v1892_v11, %v1844_v54  ;;  %2183 = vmatmul.bf16.gmra.mxu3 %v7898_v52  ;;  %v1940_v59 = vadd.f32 %v1939_v12, %v1891_v8  ;;  %v5618_v62 = vld [vmem:[#allocation3 + $0x2f8] sm:$0xf0]  ;;  %v6301_v54 = vld [vmem:[#allocation3 + $0xec] sm:$0xf] }
 0x1b5   : > { %v6887_v1 = vpop.eup %6886  ;;  %v5621_v12 = vor.u32 %v6365_v34, %v5618_v62  ;;  %v5490_v34 = vld [vmem:[#allocation3 + $0x1f8] sm:$0xf0] }
 0x1b6   : > { %6890 = vpow2.f32 %v2738_v63  ;;  %v7971_v19 = vpack.c.bf16 %v6887_v1, %v6885_v14  ;;  %v6889_v41 = vpop.eup %6888  ;;  %v5362_v14 = vld [vmem:[#allocation3 + $0xf8] sm:$0xf0]  ;;  %v6397_v63 = vld [vmem:[#allocation3 + $0x3ec] sm:$0xf] }
 0x1b7   : > { %v1988_v55 = vpop.f32.mrf.mxu3  ;;  %v2818_v25 = vadd.f32 1.0, %v6889_v41  ;;  %2488 = vmatpush.bf16.msra.mxu2 %v5621_v12 }
 0x1b8   : > { %8852 = vst [vmem:[#allocation13_spill] sm:$0xff] %v7971_v19  ;;  %v1989_v33 = vadd.f32 %v1988_v55, %v1940_v59  ;;  %v5365_v59 = vor.u32 %v6301_v54, %v5362_v14 }
 0x1b9   : > { %v1846_v36 = vpop.f32.mrf.mxu0  ;;  %6892 = vrcp.f32 %v2818_v25 }
 0x1ba   : > { %v2634_v47 = vsub.f32 0.0, %v1989_v33  ;;  %v1847_v56 = vadd.f32 %v1846_v36, %v7919_v45  ;;  %2390 = vmatpush.bf16.msra.mxu0 %v5365_v59 }
 0x1bb   : > { %v1895_v61 = vpop.f32.mrf.mxu1  ;;  %v1941_v0 = vpop.f32.mrf.mxu2 }
 0x1bc   : > { %v6891_v7 = vpop.eup %6890  ;;  %v1942_v20 = vadd.f32 %v1941_v0, %v1893_v16  ;;  %v2746_v6 = vmul.f32 1.442695, %v2634_v47  ;;  %v1896_v17 = vadd.f32 %v1895_v61, %v1847_v56  ;;  %2041 = vmatmul.bf16.gmra.mxu0 %v7901_v22  ;;  %v5746_v16 = vld [vmem:[#allocation3 + $0x3f8] sm:$0xf0] }
 0x1bd   : > { %v2822_v30 = vadd.f32 1.0, %v6891_v7  ;;  %v5749_v1 = vor.u32 %v6397_v63, %v5746_v16 }
 0x1be   : > { %2090 = vmatmul.bf16.gmra.mxu1 %v7903_v24 }
 0x1bf   : > { %6894 = vrcp.f32 %v2822_v30  ;;  %v1990_v8 = vpop.f32.mrf.mxu3  ;;  %2537 = vmatpush.bf16.msra.mxu3 %v5749_v1  ;;  %v6893_v36 = vpop.eup %6892 }
 0x1c0   : > { %v1991_v11 = vadd.f32 %v1990_v8, %v1942_v20  ;;  %2139 = vmatmul.bf16.gmra.mxu2 %v7907_v21  ;;  %6896 = vpow2.f32 %v2746_v6  ;;  %v7982_v8 = vperm.slane %v7915_v27, 1 }
 0x1c1   : > { %v1848_v55 = vpop.f32.mrf.mxu0 }
 0x1c2   : > { %v2638_v41 = vsub.f32 0.0, %v1991_v11  ;;  %v1849_v33 = vadd.f32 %v1848_v55, %v7919_v45  ;;  %v6333_v45 = vld [vmem:[#allocation3 + $0x1ec] sm:$0xf] }
 0x1c3   : > { %v1897_v25 = vpop.f32.mrf.mxu1  ;;  %v1944_v47 = vpop.f32.mrf.mxu2  ;;  %v5493_v54 = vor.u32 %v6333_v45, %v5490_v34 }
 0x1c4   : > { %v2754_v56 = vmul.f32 1.442695, %v2638_v41  ;;  %2188 = vmatmul.bf16.gmra.mxu3 %v7910_v37  ;;  %v1945_v61 = vadd.f32 %v1944_v47, %v1896_v17  ;;  %v1898_v7 = vadd.f32 %v1897_v25, %v1849_v33  ;;  %v6361_v25 = vld [vmem:[#allocation3 + $0x2cc] sm:$0xf]  ;;  %v5602_v47 = vld [vmem:[#allocation3 + $0x2d8] sm:$0xf0] }
 0x1c5   : > { %v6895_v0 = vpop.eup %6894  ;;  %2439 = vmatpush.bf16.msra.mxu1 %v5493_v54 }
 0x1c6   : > { %6898 = vpow2.f32 %v2754_v56  ;;  %v7979_v20 = vpack.c.bf16 %v6895_v0, %v6893_v36  ;;  %v6897_v30 = vpop.eup %6896  ;;  %v6297_v36 = vld [vmem:[#allocation3 + $0xcc] sm:$0xf]  ;;  %v5346_v0 = vld [vmem:[#allocation3 + $0xd8] sm:$0xf0] }
 0x1c7   : > { %v1993_v6 = vpop.f32.mrf.mxu3  ;;  %v2826_v11 = vadd.f32 1.0, %v6897_v30  ;;  %v6393_v30 = vld [vmem:[#allocation3 + $0x3cc] sm:$0xf] }
 0x1c8   : > { %8853 = vst [vmem:[#allocation14_spill] sm:$0xff] %v7979_v20  ;;  %v1994_v62 = vadd.f32 %v1993_v6, %v1945_v61  ;;  %v5605_v61 = vor.u32 %v6361_v25, %v5602_v47  ;;  %v5349_v6 = vor.u32 %v6297_v36, %v5346_v0  ;;  %v5474_v25 = vld [vmem:[#allocation3 + $0x1d8] sm:$0xf0] }
 0x1c9   : > { %v2007_v14 = vpop.f32.mrf.mxu0  ;;  %6900 = vrcp.f32 %v2826_v11 }
 0x1ca   : > { %v2642_v12 = vsub.f32 0.0, %v1994_v62  ;;  %v2008_v17 = vadd.f32 %v2007_v14, %v7982_v8  ;;  %2489 = vmatpush.bf16.msra.mxu2 %v5605_v61  ;;  %2391 = vmatpush.bf16.msra.mxu0 %v5349_v6 }
 0x1cb   : > { %v2056_v63 = vpop.f32.mrf.mxu1  ;;  %v1946_v16 = vpop.f32.mrf.mxu2 }
 0x1cc   : > { %v6899_v59 = vpop.eup %6898  ;;  %v1947_v1 = vadd.f32 %v1946_v16, %v1898_v7  ;;  %v2762_v55 = vmul.f32 1.442695, %v2642_v12  ;;  %v2057_v33 = vadd.f32 %v2056_v63, %v2008_v17  ;;  %2202 = vmatmul.bf16.vlgmr.msrb.gmra.mxu0 %v7758_v60  ;;  %v5730_v7 = vld [vmem:[#allocation3 + $0x3d8] sm:$0xf0] }
 0x1cd   : > { %v2830_v41 = vadd.f32 1.0, %v6899_v59  ;;  %v5733_v45 = vor.u32 %v6393_v30, %v5730_v7 }
 0x1ce   : > { %2251 = vmatmul.bf16.vlgmr.msrb.gmra.mxu1 %v7760_v2 }
 0x1cf   : > { %6902 = vrcp.f32 %v2830_v41  ;;  %v1995_v27 = vpop.f32.mrf.mxu3  ;;  %2538 = vmatpush.bf16.msra.mxu3 %v5733_v45  ;;  %v6901_v14 = vpop.eup %6900 }
 0x1d0   : > { %v1996_v56 = vadd.f32 %v1995_v27, %v1947_v1  ;;  %2300 = vmatmul.bf16.vlgmr.msrb.gmra.mxu2 %v7764_v13  ;;  %6904 = vpow2.f32 %v2762_v55  ;;  %v6329_v27 = vld [vmem:[#allocation3 + $0x1cc] sm:$0xf] }
 0x1d1   : > { %v2009_v62 = vpop.f32.mrf.mxu0  ;;  %v5477_v36 = vor.u32 %v6329_v27, %v5474_v25 }
 0x1d2   : > { %v2646_v34 = vsub.f32 0.0, %v1996_v56  ;;  %v2010_v54 = vadd.f32 %v2009_v62, %v7982_v8 }
 0x1d3   : > { %v2058_v11 = vpop.f32.mrf.mxu1  ;;  %v2105_v12 = vpop.f32.mrf.mxu2  ;;  %2440 = vmatpush.bf16.msra.mxu1 %v5477_v36 }
 0x1d4   : > { %v2770_v17 = vmul.f32 1.442695, %v2646_v34  ;;  %2349 = vmatmul.bf16.vlgmr.msrb.gmra.mxu3 %v7770_v28  ;;  %v2106_v63 = vadd.f32 %v2105_v12, %v2057_v33  ;;  %v2059_v59 = vadd.f32 %v2058_v11, %v2010_v54  ;;  %v6357_v12 = vld [vmem:[#allocation3 + $0x2ac] sm:$0xf] }
 0x1d5   : > { %v6903_v16 = vpop.eup %6902 }
 0x1d6   : > { %6906 = vpow2.f32 %v2770_v17  ;;  %v7990_v1 = vpack.c.bf16 %v6903_v16, %v6901_v14  ;;  %v6905_v41 = vpop.eup %6904  ;;  %v5586_v14 = vld [vmem:[#allocation3 + $0x2b8] sm:$0xf0]  ;;  %v6293_v17 = vld [vmem:[#allocation3 + $0xac] sm:$0xf] }
 0x1d7   : > { %v2154_v55 = vpop.f32.mrf.mxu3  ;;  %v2834_v56 = vadd.f32 1.0, %v6905_v41  ;;  %v5589_v16 = vor.u32 %v6357_v12, %v5586_v14  ;;  %v5330_v41 = vld [vmem:[#allocation3 + $0xb8] sm:$0xf0]  ;;  %v6325_v12 = vld [vmem:[#allocation3 + $0x1ac] sm:$0xf] }
 0x1d8   : > { %8854 = vst [vmem:[#allocation15_spill] sm:$0xff] %v7990_v1  ;;  %v2155_v47 = vadd.f32 %v2154_v55, %v2106_v63  ;;  %v6389_v55 = vld [vmem:[#allocation3 + $0x3ac] sm:$0xf]  ;;  %v5333_v27 = vor.u32 %v6293_v17, %v5330_v41  ;;  %v5458_v14 = vld [vmem:[#allocation3 + $0x1b8] sm:$0xf0] }
 0x1d9   : > { %v2012_v0 = vpop.f32.mrf.mxu0  ;;  %6908 = vrcp.f32 %v2834_v56  ;;  %2490 = vmatpush.bf16.msra.mxu2 %v5589_v16 }
 0x1da   : > { %v2587_v61 = vsub.f32 0.0, %v2155_v47  ;;  %v2013_v30 = vadd.f32 %v2012_v0, %v7982_v8  ;;  %2392 = vmatpush.bf16.msra.mxu0 %v5333_v27 }
 0x1db   : > { %v2061_v7 = vpop.f32.mrf.mxu1  ;;  %v2107_v6 = vpop.f32.mrf.mxu2 }
 0x1dc   : > { %v6907_v33 = vpop.eup %6906  ;;  %v2108_v45 = vadd.f32 %v2107_v6, %v2059_v59  ;;  %v2652_v62 = vmul.f32 1.442695, %v2587_v61  ;;  %v2062_v54 = vadd.f32 %v2061_v7, %v2013_v30  ;;  %2207 = vmatmul.bf16.gmra.mxu0 %v7782_v5  ;;  %v5714_v59 = vld [vmem:[#allocation3 + $0x3b8] sm:$0xf0] }
 0x1dd   : > { %v2838_v34 = vadd.f32 1.0, %v6907_v33  ;;  %v5717_v25 = vor.u32 %v6389_v55, %v5714_v59 }
 0x1de   : > { %2256 = vmatmul.bf16.gmra.mxu1 %v7786_v23 }
 0x1df   : > { %6910 = vrcp.f32 %v2838_v34  ;;  %v2156_v11 = vpop.f32.mrf.mxu3  ;;  %2539 = vmatpush.bf16.msra.mxu3 %v5717_v25  ;;  %v6909_v30 = vpop.eup %6908 }
 0x1e0   : > { %v2157_v63 = vadd.f32 %v2156_v11, %v2108_v45  ;;  %2305 = vmatmul.bf16.gmra.mxu2 %v7791_v40  ;;  %6912 = vpow2.f32 %v2652_v62 }
 0x1e1   : > { %v2014_v36 = vpop.f32.mrf.mxu0 }
 0x1e2   : > { %v2591_v47 = vsub.f32 0.0, %v2157_v63  ;;  %v2015_v56 = vadd.f32 %v2014_v36, %v7982_v8  ;;  %v5461_v63 = vor.u32 %v6325_v12, %v5458_v14  ;;  %v6385_v12 = vld [vmem:[#allocation3 + $0x38c] sm:$0xf] }
 0x1e3   : > { %v2063_v61 = vpop.f32.mrf.mxu1  ;;  %v2110_v0 = vpop.f32.mrf.mxu2 }
 0x1e4   : > { %v2660_v7 = vmul.f32 1.442695, %v2591_v47  ;;  %2354 = vmatmul.bf16.gmra.mxu3 %v7798_v53  ;;  %v2111_v6 = vadd.f32 %v2110_v0, %v2062_v54  ;;  %v2064_v45 = vadd.f32 %v2063_v61, %v2015_v56  ;;  %2441 = vmatpush.bf16.msra.mxu1 %v5461_v63 }
 0x1e5   : > { %v6911_v33 = vpop.eup %6910 }
 0x1e6   : > { %6914 = vpow2.f32 %v2660_v7  ;;  %v7998_v34 = vpack.c.bf16 %v6911_v33, %v6909_v30  ;;  %v6913_v62 = vpop.eup %6912  ;;  %v6353_v30 = vld [vmem:[#allocation3 + $0x28c] sm:$0xf]  ;;  %v5570_v7 = vld [vmem:[#allocation3 + $0x298] sm:$0xf0] }
 0x1e7   : > { %v2159_v11 = vpop.f32.mrf.mxu3  ;;  %v2779_v16 = vadd.f32 1.0, %v6913_v62  ;;  %v5573_v62 = vor.u32 %v6353_v30, %v5570_v7  ;;  %v6321_v7 = vld [vmem:[#allocation3 + $0x18c] sm:$0xf] }
 0x1e8   : > { %8855 = vst [vmem:[#allocation16_spill] sm:$0xff] %v7998_v34  ;;  %v2160_v17 = vadd.f32 %v2159_v11, %v2111_v6  ;;  %v6289_v6 = vld [vmem:[#allocation3 + $0x8c] sm:$0xf]  ;;  %v5314_v11 = vld [vmem:[#allocation3 + $0x98] sm:$0xf0] }
 0x1e9   : > { %v2017_v55 = vpop.f32.mrf.mxu0  ;;  %6916 = vrcp.f32 %v2779_v16  ;;  %v5317_v14 = vor.u32 %v6289_v6, %v5314_v11  ;;  %2491 = vmatpush.bf16.msra.mxu2 %v5573_v62  ;;  %v5442_v6 = vld [vmem:[#allocation3 + $0x198] sm:$0xf0] }
 0x1ea   : > { %v2595_v41 = vsub.f32 0.0, %v2160_v17  ;;  %v2018_v59 = vadd.f32 %v2017_v55, %v7982_v8  ;;  %v5445_v62 = vor.u32 %v6321_v7, %v5442_v6  ;;  %v5298_v7 = vld [vmem:[#allocation3 + $0x78] sm:$0xf0]  ;;  %v6381_v6 = vld [vmem:[#allocation3 + $0x36c] sm:$0xf] }
 0x1eb   : > { %v2066_v27 = vpop.f32.mrf.mxu1  ;;  %v2112_v25 = vpop.f32.mrf.mxu2  ;;  %2393 = vmatpush.bf16.msra.mxu0 %v5317_v14 }
 0x1ec   : > { %v6915_v54 = vpop.eup %6914  ;;  %v2113_v47 = vadd.f32 %v2112_v25, %v2064_v45  ;;  %v2668_v56 = vmul.f32 1.442695, %v2595_v41  ;;  %v2067_v61 = vadd.f32 %v2066_v27, %v2018_v59  ;;  %2212 = vmatmul.bf16.gmra.mxu0 %v7807_v32  ;;  %v5698_v45 = vld [vmem:[#allocation3 + $0x398] sm:$0xf0]  ;;  %2442 = vmatpush.bf16.msra.mxu1 %v5445_v62 }
 0x1ed   : > { %v2783_v36 = vadd.f32 1.0, %v6915_v54  ;;  %v5701_v17 = vor.u32 %v6385_v12, %v5698_v45 }
 0x1ee   : > { %2261 = vmatmul.bf16.gmra.mxu1 %v7809_v39 }
 0x1ef   : > { %6918 = vrcp.f32 %v2783_v36  ;;  %v2161_v0 = vpop.f32.mrf.mxu3  ;;  %2540 = vmatpush.bf16.msra.mxu3 %v5701_v17  ;;  %v6917_v27 = vpop.eup %6916 }
 0x1f0   : > { %v2162_v33 = vadd.f32 %v2161_v0, %v2113_v47  ;;  %2310 = vmatmul.bf16.gmra.mxu2 %v7813_v49  ;;  %6920 = vpow2.f32 %v2668_v56 }
 0x1f1   : > { %v2019_v41 = vpop.f32.mrf.mxu0 }
 0x1f2   : > { %v2599_v63 = vsub.f32 0.0, %v2162_v33  ;;  %v2020_v16 = vadd.f32 %v2019_v41, %v7982_v8 }
 0x1f3   : > { %v2068_v55 = vpop.f32.mrf.mxu1  ;;  %v2115_v59 = vpop.f32.mrf.mxu2 }
 0x1f4   : > { %v2676_v25 = vmul.f32 1.442695, %v2599_v63  ;;  %2359 = vmatmul.bf16.gmra.mxu3 %v7820_v10  ;;  %v2116_v54 = vadd.f32 %v2115_v59, %v2067_v61  ;;  %v2069_v36 = vadd.f32 %v2068_v55, %v2020_v16 }
 0x1f5   : > { %v6919_v47 = vpop.eup %6918 }
 0x1f6   : > { %6922 = vpow2.f32 %v2676_v25  ;;  %v8006_v56 = vpack.c.bf16 %v6919_v47, %v6917_v27  ;;  %v6921_v0 = vpop.eup %6920  ;;  %v6349_v25 = vld [vmem:[#allocation3 + $0x26c] sm:$0xf] }
 0x1f7   : > { %v2164_v30 = vpop.f32.mrf.mxu3  ;;  %v2787_v11 = vadd.f32 1.0, %v6921_v0  ;;  %v6285_v47 = vld [vmem:[#allocation3 + $0x6c] sm:$0xf] }
 0x1f8   : > { %v2165_v33 = vadd.f32 %v2164_v30, %v2116_v54  ;;  %v5554_v54 = vld [vmem:[#allocation3 + $0x278] sm:$0xf0] }
 0x1f9   : > { %v2022_v45 = vpop.f32.mrf.mxu0  ;;  %6924 = vrcp.f32 %v2787_v11  ;;  %v5557_v30 = vor.u32 %v6349_v25, %v5554_v54 }
 0x1fa   : > { %v2603_v12 = vsub.f32 0.0, %v2165_v33  ;;  %v2023_v14 = vadd.f32 %v2022_v45, %v7982_v8  ;;  %v5301_v33 = vor.u32 %v6285_v47, %v5298_v7  ;;  %v6317_v47 = vld [vmem:[#allocation3 + $0x16c] sm:$0xf] }
 0x1fb   : > { %v2071_v17 = vpop.f32.mrf.mxu1  ;;  %v2117_v63 = vpop.f32.mrf.mxu2  ;;  %2492 = vmatpush.bf16.msra.mxu2 %v5557_v30 }
 0x1fc   : > { %v6923_v61 = vpop.eup %6922  ;;  %v2118_v41 = vadd.f32 %v2117_v63, %v2069_v36  ;;  %v2684_v55 = vmul.f32 1.442695, %v2603_v12  ;;  %v2072_v59 = vadd.f32 %v2071_v17, %v2023_v14  ;;  %2217 = vmatmul.bf16.gmra.mxu0 %v7829_v58  ;;  %v5682_v36 = vld [vmem:[#allocation3 + $0x378] sm:$0xf0] }
 0x1fd   : > { %v2791_v16 = vadd.f32 1.0, %v6923_v61  ;;  %v5685_v62 = vor.u32 %v6381_v6, %v5682_v36  ;;  %2394 = vmatpush.bf16.msra.mxu0 %v5301_v33 }
 0x1fe   : > { %2266 = vmatmul.bf16.gmra.mxu1 %v7833_v51 }
 0x1ff   : > { %6926 = vrcp.f32 %v2791_v16  ;;  %v2166_v27 = vpop.f32.mrf.mxu3  ;;  %2541 = vmatpush.bf16.msra.mxu3 %v5685_v62  ;;  %v6925_v63 = vpop.eup %6924 }
 0x200   : > { %v2167_v0 = vadd.f32 %v2166_v27, %v2118_v41  ;;  %2315 = vmatmul.bf16.gmra.mxu2 %v7837_v26  ;;  %6928 = vpow2.f32 %v2684_v55 }
 0x201   : > { %v2024_v45 = vpop.f32.mrf.mxu0 }
 0x202   : > { %v2607_v12 = vsub.f32 0.0, %v2167_v0  ;;  %v2025_v11 = vadd.f32 %v2024_v45, %v7982_v8  ;;  %v5426_v0 = vld [vmem:[#allocation3 + $0x178] sm:$0xf0] }
 0x203   : > { %v2073_v14 = vpop.f32.mrf.mxu1  ;;  %v2120_v17 = vpop.f32.mrf.mxu2  ;;  %v5429_v7 = vor.u32 %v6317_v47, %v5426_v0  ;;  %v5282_v0 = vld [vmem:[#allocation3 + $0x58] sm:$0xf0] }
 0x204   : > { %v2692_v61 = vmul.f32 1.442695, %v2607_v12  ;;  %2364 = vmatmul.bf16.gmra.mxu3 %v7844_v48  ;;  %v2121_v41 = vadd.f32 %v2120_v17, %v2072_v59  ;;  %v2074_v27 = vadd.f32 %v2073_v14, %v2025_v11 }
 0x205   : > { %v6927_v16 = vpop.eup %6926  ;;  %2443 = vmatpush.bf16.msra.mxu1 %v5429_v7 }
 0x206   : > { %6930 = vpow2.f32 %v2692_v61  ;;  %v8014_v55 = vpack.c.bf16 %v6927_v16, %v6925_v63  ;;  %v6929_v25 = vpop.eup %6928  ;;  %v5538_v16 = vld [vmem:[#allocation3 + $0x258] sm:$0xf0] }
 0x207   : > { %v2169_v54 = vpop.f32.mrf.mxu3  ;;  %v2795_v6 = vadd.f32 1.0, %v6929_v25  ;;  %v6281_v25 = vld [vmem:[#allocation3 + $0x4c] sm:$0xf] }
 0x208   : > { %8856 = vst [vmem:[#allocation17_spill] sm:$0xff] %v8014_v55  ;;  %v2170_v30 = vadd.f32 %v2169_v54, %v2121_v41  ;;  %v6345_v41 = vld [vmem:[#allocation3 + $0x24c] sm:$0xf]  ;;  %v5285_v7 = vor.u32 %v6281_v25, %v5282_v0 }
 0x209   : > { %v2027_v33 = vpop.f32.mrf.mxu0  ;;  %6932 = vrcp.f32 %v2795_v6  ;;  %v5541_v47 = vor.u32 %v6345_v41, %v5538_v16 }
 0x20a   : > { %v2611_v36 = vsub.f32 0.0, %v2170_v30  ;;  %v2028_v62 = vadd.f32 %v2027_v33, %v7982_v8  ;;  %v6377_v30 = vld [vmem:[#allocation3 + $0x34c] sm:$0xf]  ;;  %2395 = vmatpush.bf16.msra.mxu0 %v5285_v7 }
 0x20b   : > { %v2076_v12 = vpop.f32.mrf.mxu1  ;;  %v2122_v45 = vpop.f32.mrf.mxu2  ;;  %2493 = vmatpush.bf16.msra.mxu2 %v5541_v47  ;;  %v5410_v47 = vld [vmem:[#allocation3 + $0x158] sm:$0xf0] }
 0x20c   : > { %v6931_v59 = vpop.eup %6930  ;;  %v2123_v17 = vadd.f32 %v2122_v45, %v2074_v27  ;;  %v2700_v14 = vmul.f32 1.442695, %v2611_v36  ;;  %v2077_v63 = vadd.f32 %v2076_v12, %v2028_v62  ;;  %2222 = vmatmul.bf16.gmra.mxu0 %v7851_v35  ;;  %v5666_v27 = vld [vmem:[#allocation3 + $0x358] sm:$0xf0] }
 0x20d   : > { %v2799_v11 = vadd.f32 1.0, %v6931_v59  ;;  %v5669_v36 = vor.u32 %v6377_v30, %v5666_v27 }
 0x20e   : > { %2271 = vmatmul.bf16.gmra.mxu1 %v7853_v43 }
 0x20f   : > { %6934 = vrcp.f32 %v2799_v11  ;;  %v2171_v61 = vpop.f32.mrf.mxu3  ;;  %2542 = vmatpush.bf16.msra.mxu3 %v5669_v36  ;;  %v6933_v59 = vpop.eup %6932 }
 0x210   : > { %v2172_v54 = vadd.f32 %v2171_v61, %v2123_v17  ;;  %2320 = vmatmul.bf16.gmra.mxu2 %v7857_v44  ;;  %6936 = vpow2.f32 %v2700_v14 }
 0x211   : > { %v2029_v62 = vpop.f32.mrf.mxu0 }
 0x212   : > { %v2615_v33 = vsub.f32 0.0, %v2172_v54  ;;  %v2030_v6 = vadd.f32 %v2029_v62, %v7982_v8  ;;  %v6313_v54 = vld [vmem:[#allocation3 + $0x14c] sm:$0xf] }
 0x213   : > { %v2078_v12 = vpop.f32.mrf.mxu1  ;;  %v2125_v45 = vpop.f32.mrf.mxu2  ;;  %v5413_v30 = vor.u32 %v6313_v54, %v5410_v47  ;;  %v5266_v47 = vld [vmem:[#allocation3 + $0x38] sm:$0xf0] }
 0x214   : > { %v2708_v17 = vmul.f32 1.442695, %v2615_v33  ;;  %2369 = vmatmul.bf16.gmra.mxu3 %v7863_v15  ;;  %v2126_v11 = vadd.f32 %v2125_v45, %v2077_v63  ;;  %v2079_v41 = vadd.f32 %v2078_v12, %v2030_v6 }
 0x215   : > { %v6935_v61 = vpop.eup %6934  ;;  %2444 = vmatpush.bf16.msra.mxu1 %v5413_v30 }
 0x216   : > { %6938 = vpow2.f32 %v2708_v17  ;;  %v8022_v14 = vpack.c.bf16 %v6935_v61, %v6933_v59  ;;  %v6937_v16 = vpop.eup %6936  ;;  %v5522_v61 = vld [vmem:[#allocation3 + $0x238] sm:$0xf0] }
 0x217   : > { %v2174_v25 = vpop.f32.mrf.mxu3  ;;  %v2803_v27 = vadd.f32 1.0, %v6937_v16  ;;  %v6277_v16 = vld [vmem:[#allocation3 + $0x2c] sm:$0xf] }
 0x218   : > { %8857 = vst [vmem:[#allocation18_spill] sm:$0xff] %v8022_v14  ;;  %v2175_v0 = vadd.f32 %v2174_v25, %v2126_v11  ;;  %v6341_v11 = vld [vmem:[#allocation3 + $0x22c] sm:$0xf] }
 0x219   : > { %v2032_v7 = vpop.f32.mrf.mxu0  ;;  %6940 = vrcp.f32 %v2803_v27  ;;  %v5525_v54 = vor.u32 %v6341_v11, %v5522_v61  ;;  %v5394_v11 = vld [vmem:[#allocation3 + $0x138] sm:$0xf0] }
 0x21a   : > { %v2619_v62 = vsub.f32 0.0, %v2175_v0  ;;  %v2033_v36 = vadd.f32 %v2032_v7, %v7982_v8  ;;  %v6373_v0 = vld [vmem:[#allocation3 + $0x32c] sm:$0xf] }
 0x21b   : > { %v2081_v33 = vpop.f32.mrf.mxu1  ;;  %v2127_v34 = vpop.f32.mrf.mxu2  ;;  %2494 = vmatpush.bf16.msra.mxu2 %v5525_v54 }
 0x21c   : > { %v6939_v63 = vpop.eup %6938  ;;  %v2128_v45 = vadd.f32 %v2127_v34, %v2079_v41  ;;  %v2716_v12 = vmul.f32 1.442695, %v2619_v62  ;;  %v2082_v59 = vadd.f32 %v2081_v33, %v2033_v36  ;;  %2227 = vmatmul.bf16.gmra.mxu0 %v7871_v42  ;;  %v5650_v34 = vld [vmem:[#allocation3 + $0x338] sm:$0xf0]  ;;  %v5269_v41 = vor.u32 %v6277_v16, %v5266_v47 }
 0x21d   : > { %v2807_v6 = vadd.f32 1.0, %v6939_v63  ;;  %v5653_v30 = vor.u32 %v6373_v0, %v5650_v34  ;;  %v6273_v34 = vld [vmem:[#allocation3 + $0xc] sm:$0xf] }
 0x21e   : > { %2276 = vmatmul.bf16.gmra.mxu1 %v7873_v50  ;;  %2396 = vmatpush.bf16.msra.mxu0 %v5269_v41  ;;  %v5250_v41 = vld [vmem:[#allocation3 + $0x18] sm:$0xf0] }
 0x21f   : > { %6942 = vrcp.f32 %v2807_v6  ;;  %v2176_v17 = vpop.f32.mrf.mxu3  ;;  %2543 = vmatpush.bf16.msra.mxu3 %v5653_v30  ;;  %v6941_v63 = vpop.eup %6940  ;;  %v6305_v30 = vld [vmem:[#allocation3 + $0x10c] sm:$0xf] }
 0x220   : > { %v2177_v25 = vadd.f32 %v2176_v17, %v2128_v45  ;;  %2325 = vmatmul.bf16.gmra.mxu2 %v7876_v57  ;;  %6944 = vpow2.f32 %v2716_v12  ;;  %v6309_v17 = vld [vmem:[#allocation3 + $0x12c] sm:$0xf] }
 0x221   : > { %v2034_v7 = vpop.f32.mrf.mxu0  ;;  %v5397_v16 = vor.u32 %v6309_v17, %v5394_v11 }
 0x222   : > { %v2623_v62 = vsub.f32 0.0, %v2177_v25  ;;  %v2035_v27 = vadd.f32 %v2034_v7, %v7982_v8  ;;  %v5253_v7 = vor.u32 %v6273_v34, %v5250_v41  ;;  %v5634_v34 = vld [vmem:[#allocation3 + $0x318] sm:$0xf0] }
 0x223   : > { %v2083_v36 = vpop.f32.mrf.mxu1  ;;  %v2130_v33 = vpop.f32.mrf.mxu2  ;;  %2445 = vmatpush.bf16.msra.mxu1 %v5397_v16  ;;  %v5506_v16 = vld [vmem:[#allocation3 + $0x218] sm:$0xf0] }
 0x224   : > { %v2724_v45 = vmul.f32 1.442695, %v2623_v62  ;;  %2374 = vmatmul.bf16.gmra.mxu3 %v7880_v9  ;;  %v2131_v6 = vadd.f32 %v2130_v33, %v2082_v59  ;;  %v2084_v12 = vadd.f32 %v2083_v36, %v2035_v27  ;;  %v5378_v62 = vld [vmem:[#allocation3 + $0x118] sm:$0xf0]  ;;  %2397 = vmatpush.bf16.msra.mxu0 %v5253_v7 }
 0x225   : > { %v6943_v61 = vpop.eup %6942  ;;  %v5381_v33 = vor.u32 %v6305_v30, %v5378_v62 }
 0x226   : > { %6946 = vpow2.f32 %v2724_v45  ;;  %v8030_v25 = vpack.c.bf16 %v6943_v61, %v6941_v63  ;;  %v6945_v54 = vpop.eup %6944  ;;  %v6337_v61 = vld [vmem:[#allocation3 + $0x20c] sm:$0xf] }
 0x227   : > { %v2179_v47 = vpop.f32.mrf.mxu3  ;;  %v2811_v1 = vadd.f32 1.0, %v6945_v54  ;;  %2446 = vmatpush.bf16.msra.mxu1 %v5381_v33  ;;  %v6369_v54 = vld [vmem:[#allocation3 + $0x30c] sm:$0xf] }
 0x228   : > { %8858 = vst [vmem:[#allocation19_spill] sm:$0xff] %v8030_v25  ;;  %v2180_v0 = vadd.f32 %v2179_v47, %v2131_v6 }
 0x229   : > { %v2037_v59 = vpop.f32.mrf.mxu0  ;;  %6948 = vrcp.f32 %v2811_v1 }
 0x22a   : > { %v2627_v20 = vsub.f32 0.0, %v2180_v0  ;;  %v2038_v19 = vadd.f32 %v2037_v59, %v7982_v8  ;;  %v5509_v0 = vor.u32 %v6337_v61, %v5506_v16 }
 0x22b   : > { %v2086_v27 = vpop.f32.mrf.mxu1  ;;  %v2132_v36 = vpop.f32.mrf.mxu2 }
 0x22c   : > { %v6947_v63 = vpop.eup %6946  ;;  %v2133_v45 = vadd.f32 %v2132_v36, %v2084_v12  ;;  %v2732_v11 = vmul.f32 1.442695, %v2627_v20  ;;  %v2087_v6 = vadd.f32 %v2086_v27, %v2038_v19  ;;  %2232 = vmatmul.bf16.gmra.mxu0 %v7889_v29  ;;  %v5637_v12 = vor.u32 %v6369_v54, %v5634_v34  ;;  %2495 = vmatpush.bf16.msra.mxu2 %v5509_v0 }
 0x22d   : > { %v2815_v17 = vadd.f32 1.0, %v6947_v63 }
 0x22e   : > { %2281 = vmatmul.bf16.gmra.mxu1 %v7892_v4  ;;  %2544 = vmatpush.bf16.msra.mxu3 %v5637_v12 }
 0x22f   : > { %6950 = vrcp.f32 %v2815_v17  ;;  %v2181_v47 = vpop.f32.mrf.mxu3  ;;  %v6949_v62 = vpop.eup %6948 }
 0x230   : > { %v2182_v41 = vadd.f32 %v2181_v47, %v2133_v45  ;;  %2330 = vmatmul.bf16.gmra.mxu2 %v7894_v38  ;;  %6952 = vpow2.f32 %v2732_v11 }
 0x231   : > { %v2039_v19 = vpop.f32.mrf.mxu0 }
 0x232   : > { %v2631_v20 = vsub.f32 0.0, %v2182_v41  ;;  %v2040_v1 = vadd.f32 %v2039_v19, %v7982_v8 }
 0x233   : > { %v2088_v30 = vpop.f32.mrf.mxu1  ;;  %v2135_v7 = vpop.f32.mrf.mxu2 }
 0x234   : > { %v2740_v59 = vmul.f32 1.442695, %v2631_v20  ;;  %2379 = vmatmul.bf16.gmra.mxu3 %v7898_v52  ;;  %v2136_v33 = vadd.f32 %v2135_v7, %v2087_v6  ;;  %v2089_v36 = vadd.f32 %v2088_v30, %v2040_v1 }
 0x235   : > { %v6951_v27 = vpop.eup %6950 }
 0x236   : > { %6954 = vpow2.f32 %v2740_v59  ;;  %v8038_v63 = vpack.c.bf16 %v6951_v27, %v6949_v62  ;;  %v6953_v45 = vpop.eup %6952 }
 0x237   : > { %v2184_v17 = vpop.f32.mrf.mxu3  ;;  %v2819_v61 = vadd.f32 1.0, %v6953_v45 }
 0x238   : > { %8859 = vst [vmem:[#allocation20_spill] sm:$0xff] %v8038_v63  ;;  %v2185_v11 = vadd.f32 %v2184_v17, %v2136_v33 }
 0x239   : > { %v2042_v54 = vpop.f32.mrf.mxu0  ;;  %6956 = vrcp.f32 %v2819_v61 }
 0x23a   : > { %v2635_v16 = vsub.f32 0.0, %v2185_v11  ;;  %v2043_v47 = vadd.f32 %v2042_v54, %v7982_v8 }
 0x23b   : > { %v2091_v0 = vpop.f32.mrf.mxu1  ;;  %v2137_v34 = vpop.f32.mrf.mxu2 }
 0x23c   : > { %v6955_v41 = vpop.eup %6954  ;;  %v2138_v12 = vadd.f32 %v2137_v34, %v2089_v36  ;;  %v2748_v19 = vmul.f32 1.442695, %v2635_v16  ;;  %v2092_v6 = vadd.f32 %v2091_v0, %v2043_v47  ;;  %2237 = vmatmul.bf16.gmra.mxu0 %v7901_v22  ;;  %v8051_v0 = vld [vmem:[%s8820_s4] sm:$0xf] }
 0x23d   : > { %v2823_v20 = vadd.f32 1.0, %v6955_v41 }
 0x23e   : > { %2286 = vmatmul.bf16.gmra.mxu1 %v7903_v24 }
 0x23f   : > { %6958 = vrcp.f32 %v2823_v20  ;;  %v2186_v1 = vpop.f32.mrf.mxu3  ;;  %v6957_v36 = vpop.eup %6956 }
 0x240   : > { %v2187_v30 = vadd.f32 %v2186_v1, %v2138_v12  ;;  %2335 = vmatmul.bf16.gmra.mxu2 %v7907_v21  ;;  %6960 = vpow2.f32 %v2748_v19 }
 0x241   : > { %v2044_v62 = vpop.f32.mrf.mxu0 }
 0x242   : > { %v2639_v7 = vsub.f32 0.0, %v2187_v30  ;;  %v2045_v59 = vadd.f32 %v2044_v62, %v7982_v8  ;;  %v8054_v8 = vperm.slane %v8051_v0, 2 }
 0x243   : > { %v2093_v33 = vpop.f32.mrf.mxu1  ;;  %v2140_v27 = vpop.f32.mrf.mxu2 }
 0x244   : > { %v2756_v45 = vmul.f32 1.442695, %v2639_v7  ;;  %2384 = vmatmul.bf16.gmra.mxu3 %v7910_v37  ;;  %v2141_v17 = vadd.f32 %v2140_v27, %v2092_v6  ;;  %v2094_v61 = vadd.f32 %v2093_v33, %v2045_v59 }
 0x245   : > { %v6959_v11 = vpop.eup %6958 }
 0x246   : > { %6962 = vpow2.f32 %v2756_v45  ;;  %v8046_v16 = vpack.c.bf16 %v6959_v11, %v6957_v36  ;;  %v6961_v54 = vpop.eup %6960 }
 0x247   : > { %v2189_v47 = vpop.f32.mrf.mxu3  ;;  %v2827_v41 = vadd.f32 1.0, %v6961_v54 }
 0x248   : > { %8860 = vst [vmem:[#allocation21_spill] sm:$0xff] %v8046_v16  ;;  %v2190_v34 = vadd.f32 %v2189_v47, %v2141_v17 }
 0x249   : > { %v2203_v20 = vpop.f32.mrf.mxu0  ;;  %6964 = vrcp.f32 %v2827_v41 }
 0x24a   : > { %v2643_v12 = vsub.f32 0.0, %v2190_v34  ;;  %v2204_v19 = vadd.f32 %v2203_v20, %v8054_v8 }
 0x24b   : > { %v2252_v6 = vpop.f32.mrf.mxu1  ;;  %v2142_v1 = vpop.f32.mrf.mxu2 }
 0x24c   : > { %v6963_v30 = vpop.eup %6962  ;;  %v2143_v7 = vadd.f32 %v2142_v1, %v2094_v61  ;;  %v2764_v59 = vmul.f32 1.442695, %v2643_v12  ;;  %v2253_v33 = vadd.f32 %v2252_v6, %v2204_v19  ;;  %2398 = vmatmul.bf16.vlgmr.msra.gmra.mxu0 %v7758_v60 }
 0x24d   : > { %v2831_v62 = vadd.f32 1.0, %v6963_v30 }
 0x24e   : > { %2447 = vmatmul.bf16.vlgmr.msra.gmra.mxu1 %v7760_v2 }
 0x24f   : > { %6966 = vrcp.f32 %v2831_v62  ;;  %v2191_v27 = vpop.f32.mrf.mxu3  ;;  %v6965_v47 = vpop.eup %6964 }
 0x250   : > { %v2192_v36 = vadd.f32 %v2191_v27, %v2143_v7  ;;  %2496 = vmatmul.bf16.vlgmr.msra.gmra.mxu2 %v7764_v13  ;;  %6968 = vpow2.f32 %v2764_v59 }
 0x251   : > { %v2205_v17 = vpop.f32.mrf.mxu0 }
 0x252   : > { %v2647_v45 = vsub.f32 0.0, %v2192_v36  ;;  %v2206_v11 = vadd.f32 %v2205_v17, %v8054_v8 }
 0x253   : > { %v2254_v54 = vpop.f32.mrf.mxu1  ;;  %v2301_v61 = vpop.f32.mrf.mxu2 }
 0x254   : > { %v2772_v34 = vmul.f32 1.442695, %v2647_v45  ;;  %2545 = vmatmul.bf16.vlgmr.msra.gmra.mxu3 %v7770_v28  ;;  %v2302_v60 = vadd.f32 %v2301_v61, %v2253_v33  ;;  %v2255_v12 = vadd.f32 %v2254_v54, %v2206_v11 }
 0x255   : > { %v6967_v41 = vpop.eup %6966 }
 0x256   : > { %6970 = vpow2.f32 %v2772_v34  ;;  %v8062_v2 = vpack.c.bf16 %v6967_v41, %v6965_v47  ;;  %v6969_v20 = vpop.eup %6968 }
 0x257   : > { %v2350_v19 = vpop.f32.mrf.mxu3  ;;  %v2835_v6 = vadd.f32 1.0, %v6969_v20 }
 0x258   : > { %v2351_v13 = vadd.f32 %v2350_v19, %v2302_v60 }
 0x259   : > { %v2208_v30 = vpop.f32.mrf.mxu0  ;;  %6972 = vrcp.f32 %v2835_v6 }
 0x25a   : > { %v2588_v1 = vsub.f32 0.0, %v2351_v13  ;;  %v2209_v7 = vadd.f32 %v2208_v30, %v8054_v8  ;;  %v5864_v30 = vld [vmem:[#allocation6 + $0xe0] sm:$0xf] }
 0x25b   : > { %v2257_v62 = vpop.f32.mrf.mxu1  ;;  %v2303_v59 = vpop.f32.mrf.mxu2 }
 0x25c   : > { %v6971_v27 = vpop.eup %6970  ;;  %v2304_v36 = vadd.f32 %v2303_v59, %v2255_v12  ;;  %v2654_v28 = vmul.f32 1.442695, %v2588_v1  ;;  %v2258_v33 = vadd.f32 %v2257_v62, %v2209_v7  ;;  %2403 = vmatmul.bf16.gmra.mxu0 %v7782_v5  ;;  %v6494_v1 = vld [vmem:[#allocation6 + $0x2ec] sm:$0xf0] }
 0x25d   : > { %v2839_v45 = vadd.f32 1.0, %v6971_v27  ;;  %v6430_v59 = vld [vmem:[#allocation6 + $0xec] sm:$0xf0]  ;;  %v6248_v27 = vld [vmem:[#allocation6 + $0x3e0] sm:$0xf] }
 0x25e   : > { %2452 = vmatmul.bf16.gmra.mxu1 %v7786_v23 }
 0x25f   : > { %6974 = vrcp.f32 %v2839_v45  ;;  %v2352_v17 = vpop.f32.mrf.mxu3  ;;  %v6973_v41 = vpop.eup %6972  ;;  %v5865_v45 = vor.u32 %v6430_v59, %v5864_v30 }
 0x260   : > { %v2353_v11 = vadd.f32 %v2352_v17, %v2304_v36  ;;  %2501 = vmatmul.bf16.gmra.mxu2 %v7791_v40  ;;  %6976 = vpow2.f32 %v2654_v28  ;;  %v6120_v40 = vld [vmem:[#allocation6 + $0x2e0] sm:$0xf]  ;;  %v6526_v36 = vld [vmem:[#allocation6 + $0x3ec] sm:$0xf0] }
 0x261   : > { %v2210_v61 = vpop.f32.mrf.mxu0  ;;  %v6121_v62 = vor.u32 %v6494_v1, %v6120_v40  ;;  %v6249_v28 = vor.u32 %v6526_v36, %v6248_v27  ;;  %v5992_v17 = vld [vmem:[#allocation6 + $0x1e0] sm:$0xf]  ;;  %3716 = vmatpush.bf16.msrb.mxu0 %v5865_v45 }
 0x262   : > { %v2592_v54 = vsub.f32 0.0, %v2353_v11  ;;  %v2211_v47 = vadd.f32 %v2210_v61, %v8054_v8 }
 0x263   : > { %v2259_v34 = vpop.f32.mrf.mxu1  ;;  %v2306_v60 = vpop.f32.mrf.mxu2  ;;  %3814 = vmatpush.bf16.msrb.mxu2 %v6121_v62  ;;  %3863 = vmatpush.bf16.msrb.mxu3 %v6249_v28 }
 0x264   : > { %v2662_v12 = vmul.f32 1.442695, %v2592_v54  ;;  %2550 = vmatmul.bf16.gmra.mxu3 %v7798_v53  ;;  %v2307_v5 = vadd.f32 %v2306_v60, %v2258_v33  ;;  %v2260_v19 = vadd.f32 %v2259_v34, %v2211_v47  ;;  %v6462_v53 = vld [vmem:[#allocation6 + $0x1ec] sm:$0xf0] }
 0x265   : > { %v6975_v20 = vpop.eup %6974  ;;  %v5993_v61 = vor.u32 %v6462_v53, %v5992_v17  ;;  %v6490_v53 = vld [vmem:[#allocation6 + $0x2cc] sm:$0xf0] }
 0x266   : > { %6978 = vpow2.f32 %v2662_v12  ;;  %v8070_v23 = vpack.c.bf16 %v6975_v20, %v6973_v41  ;;  %v6977_v13 = vpop.eup %6976 }
 0x267   : > { %v2355_v6 = vpop.f32.mrf.mxu3  ;;  %v2780_v33 = vadd.f32 1.0, %v6977_v13  ;;  %3765 = vmatpush.bf16.msrb.mxu1 %v5993_v61  ;;  %v6426_v61 = vld [vmem:[#allocation6 + $0xcc] sm:$0xf0] }
 0x268   : > { %v2356_v7 = vadd.f32 %v2355_v6, %v2307_v5 }
 0x269   : > { %v2213_v54 = vpop.f32.mrf.mxu0  ;;  %6980 = vrcp.f32 %v2780_v33  ;;  %v5848_v33 = vld [vmem:[#allocation6 + $0xc0] sm:$0xf] }
 0x26a   : > { %v2596_v11 = vsub.f32 0.0, %v2356_v7  ;;  %v2214_v47 = vadd.f32 %v2213_v54, %v8054_v8 }
 0x26b   : > { %v2262_v34 = vpop.f32.mrf.mxu1  ;;  %v2308_v60 = vpop.f32.mrf.mxu2 }
 0x26c   : > { %v6979_v41 = vpop.eup %6978  ;;  %v2309_v12 = vadd.f32 %v2308_v60, %v2260_v19  ;;  %v2670_v20 = vmul.f32 1.442695, %v2596_v11  ;;  %v2263_v6 = vadd.f32 %v2262_v34, %v2214_v47  ;;  %2408 = vmatmul.bf16.gmra.mxu0 %v7807_v32  ;;  %v6232_v47 = vld [vmem:[#allocation6 + $0x3c0] sm:$0xf]  ;;  %v6522_v34 = vld [vmem:[#allocation6 + $0x3cc] sm:$0xf0]  ;;  %v5849_v60 = vor.u32 %v6426_v61, %v5848_v33 }
 0x26d   : > { %v2784_v5 = vadd.f32 1.0, %v6979_v41  ;;  %v6233_v41 = vor.u32 %v6522_v34, %v6232_v47 }
 0x26e   : > { %2457 = vmatmul.bf16.gmra.mxu1 %v7809_v39  ;;  %3717 = vmatpush.bf16.msrb.mxu0 %v5849_v60  ;;  %v6486_v60 = vld [vmem:[#allocation6 + $0x2ac] sm:$0xf0] }
 0x26f   : > { %6982 = vrcp.f32 %v2784_v5  ;;  %v2357_v13 = vpop.f32.mrf.mxu3  ;;  %v6981_v59 = vpop.eup %6980  ;;  %3864 = vmatpush.bf16.msrb.mxu3 %v6233_v41  ;;  %v5832_v41 = vld [vmem:[#allocation6 + $0xa0] sm:$0xf] }
 0x270   : > { %v2358_v40 = vadd.f32 %v2357_v13, %v2309_v12  ;;  %2506 = vmatmul.bf16.gmra.mxu2 %v7813_v49  ;;  %6984 = vpow2.f32 %v2670_v20  ;;  %v6104_v49 = vld [vmem:[#allocation6 + $0x2c0] sm:$0xf] }
 0x271   : > { %v2215_v30 = vpop.f32.mrf.mxu0  ;;  %v6105_v54 = vor.u32 %v6490_v53, %v6104_v49  ;;  %v5976_v12 = vld [vmem:[#allocation6 + $0x1c0] sm:$0xf] }
 0x272   : > { %v2600_v1 = vsub.f32 0.0, %v2358_v40  ;;  %v2216_v7 = vadd.f32 %v2215_v30, %v8054_v8 }
 0x273   : > { %v2264_v19 = vpop.f32.mrf.mxu1  ;;  %v2311_v62 = vpop.f32.mrf.mxu2  ;;  %3815 = vmatpush.bf16.msrb.mxu2 %v6105_v54 }
 0x274   : > { %v2678_v27 = vmul.f32 1.442695, %v2600_v1  ;;  %2555 = vmatmul.bf16.gmra.mxu3 %v7820_v10  ;;  %v2312_v32 = vadd.f32 %v2311_v62, %v2263_v6  ;;  %v2265_v45 = vadd.f32 %v2264_v19, %v2216_v7  ;;  %v6458_v10 = vld [vmem:[#allocation6 + $0x1cc] sm:$0xf0] }
 0x275   : > { %v6983_v36 = vpop.eup %6982  ;;  %v5977_v13 = vor.u32 %v6458_v10, %v5976_v12 }
 0x276   : > { %6986 = vpow2.f32 %v2678_v27  ;;  %v8078_v39 = vpack.c.bf16 %v6983_v36, %v6981_v59  ;;  %v6985_v28 = vpop.eup %6984 }
 0x277   : > { %v2360_v17 = vpop.f32.mrf.mxu3  ;;  %v2788_v5 = vadd.f32 1.0, %v6985_v28  ;;  %3766 = vmatpush.bf16.msrb.mxu1 %v5977_v13 }
 0x278   : > { %8861 = vst [vmem:[#allocation22_spill] sm:$0xff] %v8078_v39  ;;  %v2361_v11 = vadd.f32 %v2360_v17, %v2312_v32 }
 0x279   : > { %v2218_v6 = vpop.f32.mrf.mxu0  ;;  %6988 = vrcp.f32 %v2788_v5  ;;  %v6422_v5 = vld [vmem:[#allocation6 + $0xac] sm:$0xf0] }
 0x27a   : > { %v2604_v20 = vsub.f32 0.0, %v2361_v11  ;;  %v2219_v40 = vadd.f32 %v2218_v6, %v8054_v8  ;;  %v6518_v6 = vld [vmem:[#allocation6 + $0x3ac] sm:$0xf0]  ;;  %v5833_v13 = vor.u32 %v6422_v5, %v5832_v41 }
 0x27b   : > { %v2267_v1 = vpop.f32.mrf.mxu1  ;;  %v2313_v30 = vpop.f32.mrf.mxu2  ;;  %v6482_v5 = vld [vmem:[#allocation6 + $0x28c] sm:$0xf0] }
 0x27c   : > { %v6987_v7 = vpop.eup %6986  ;;  %v2314_v19 = vadd.f32 %v2313_v30, %v2265_v45  ;;  %v2686_v59 = vmul.f32 1.442695, %v2604_v20  ;;  %v2268_v27 = vadd.f32 %v2267_v1, %v2219_v40  ;;  %2413 = vmatmul.bf16.gmra.mxu0 %v7829_v58  ;;  %v6216_v20 = vld [vmem:[#allocation6 + $0x3a0] sm:$0xf] }
 0x27d   : > { %v2792_v62 = vadd.f32 1.0, %v6987_v7  ;;  %v6217_v40 = vor.u32 %v6518_v6, %v6216_v20  ;;  %v5960_v1 = vld [vmem:[#allocation6 + $0x1a0] sm:$0xf]  ;;  %3718 = vmatpush.bf16.msrb.mxu0 %v5833_v13 }
 0x27e   : > { %2462 = vmatmul.bf16.gmra.mxu1 %v7833_v51  ;;  %v5816_v20 = vld [vmem:[#allocation6 + $0x80] sm:$0xf] }
 0x27f   : > { %6990 = vrcp.f32 %v2792_v62  ;;  %v2362_v32 = vpop.f32.mrf.mxu3  ;;  %v6989_v33 = vpop.eup %6988  ;;  %3865 = vmatpush.bf16.msrb.mxu3 %v6217_v40  ;;  %v6418_v40 = vld [vmem:[#allocation6 + $0x8c] sm:$0xf0] }
 0x280   : > { %v2363_v36 = vadd.f32 %v2362_v32, %v2314_v19  ;;  %2511 = vmatmul.bf16.gmra.mxu2 %v7837_v26  ;;  %6992 = vpow2.f32 %v2686_v59  ;;  %v6088_v26 = vld [vmem:[#allocation6 + $0x2a0] sm:$0xf] }
 0x281   : > { %v2220_v17 = vpop.f32.mrf.mxu0  ;;  %v6089_v10 = vor.u32 %v6486_v60, %v6088_v26 }
 0x282   : > { %v2608_v28 = vsub.f32 0.0, %v2363_v36  ;;  %v2221_v49 = vadd.f32 %v2220_v17, %v8054_v8 }
 0x283   : > { %v2269_v45 = vpop.f32.mrf.mxu1  ;;  %v2316_v53 = vpop.f32.mrf.mxu2  ;;  %3816 = vmatpush.bf16.msrb.mxu2 %v6089_v10 }
 0x284   : > { %v2694_v11 = vmul.f32 1.442695, %v2608_v28  ;;  %2560 = vmatmul.bf16.gmra.mxu3 %v7844_v48  ;;  %v2317_v58 = vadd.f32 %v2316_v53, %v2268_v27  ;;  %v2270_v61 = vadd.f32 %v2269_v45, %v2221_v49  ;;  %v6454_v48 = vld [vmem:[#allocation6 + $0x1ac] sm:$0xf0] }
 0x285   : > { %v6991_v54 = vpop.eup %6990  ;;  %v5961_v62 = vor.u32 %v6454_v48, %v5960_v1  ;;  %v6200_v1 = vld [vmem:[#allocation6 + $0x380] sm:$0xf]  ;;  %v6514_v48 = vld [vmem:[#allocation6 + $0x38c] sm:$0xf0] }
 0x286   : > { %6994 = vpow2.f32 %v2694_v11  ;;  %v8086_v51 = vpack.c.bf16 %v6991_v54, %v6989_v33  ;;  %v6993_v47 = vpop.eup %6992 }
 0x287   : > { %v2365_v34 = vpop.f32.mrf.mxu3  ;;  %v2796_v30 = vadd.f32 1.0, %v6993_v47  ;;  %3767 = vmatpush.bf16.msrb.mxu1 %v5961_v62 }
 0x288   : > { %8862 = vst [vmem:[#allocation23_spill] sm:$0xff] %v8086_v51  ;;  %v2366_v12 = vadd.f32 %v2365_v34, %v2317_v58 }
 0x289   : > { %v2223_v19 = vpop.f32.mrf.mxu0  ;;  %6996 = vrcp.f32 %v2796_v30  ;;  %v5817_v30 = vor.u32 %v6418_v40, %v5816_v20 }
 0x28a   : > { %v2612_v7 = vsub.f32 0.0, %v2366_v12  ;;  %v2224_v59 = vadd.f32 %v2223_v19, %v8054_v8  ;;  %v5944_v19 = vld [vmem:[#allocation6 + $0x180] sm:$0xf] }
 0x28b   : > { %v2272_v27 = vpop.f32.mrf.mxu1  ;;  %v2318_v32 = vpop.f32.mrf.mxu2  ;;  %3719 = vmatpush.bf16.msrb.mxu0 %v5817_v30 }
 0x28c   : > { %v6995_v36 = vpop.eup %6994  ;;  %v2319_v28 = vadd.f32 %v2318_v32, %v2270_v61  ;;  %v2702_v49 = vmul.f32 1.442695, %v2612_v7  ;;  %v2273_v45 = vadd.f32 %v2272_v27, %v2224_v59  ;;  %2418 = vmatmul.bf16.gmra.mxu0 %v7851_v35  ;;  %v6201_v7 = vor.u32 %v6514_v48, %v6200_v1 }
 0x28d   : > { %v2800_v17 = vadd.f32 1.0, %v6995_v36 }
 0x28e   : > { %2467 = vmatmul.bf16.gmra.mxu1 %v7853_v43  ;;  %3866 = vmatpush.bf16.msrb.mxu3 %v6201_v7 }
 0x28f   : > { %6998 = vrcp.f32 %v2800_v17  ;;  %v2367_v53 = vpop.f32.mrf.mxu3  ;;  %v6997_v34 = vpop.eup %6996 }
 0x290   : > { %v2368_v33 = vadd.f32 %v2367_v53, %v2319_v28  ;;  %2516 = vmatmul.bf16.gmra.mxu2 %v7857_v44  ;;  %7000 = vpow2.f32 %v2702_v49  ;;  %v6072_v44 = vld [vmem:[#allocation6 + $0x280] sm:$0xf] }
 0x291   : > { %v2225_v58 = vpop.f32.mrf.mxu0  ;;  %v6073_v13 = vor.u32 %v6482_v5, %v6072_v44 }
 0x292   : > { %v2616_v11 = vsub.f32 0.0, %v2368_v33  ;;  %v2226_v54 = vadd.f32 %v2225_v58, %v8054_v8  ;;  %v5800_v33 = vld [vmem:[#allocation6 + $0x60] sm:$0xf] }
 0x293   : > { %v2274_v61 = vpop.f32.mrf.mxu1  ;;  %v2321_v47 = vpop.f32.mrf.mxu2  ;;  %3817 = vmatpush.bf16.msrb.mxu2 %v6073_v13  ;;  %v6478_v13 = vld [vmem:[#allocation6 + $0x26c] sm:$0xf0] }
 0x294   : > { %v2710_v26 = vmul.f32 1.442695, %v2616_v11  ;;  %2565 = vmatmul.bf16.gmra.mxu3 %v7863_v15  ;;  %v2322_v35 = vadd.f32 %v2321_v47, %v2273_v45  ;;  %v2275_v41 = vadd.f32 %v2274_v61, %v2226_v54  ;;  %v6450_v15 = vld [vmem:[#allocation6 + $0x18c] sm:$0xf0]  ;;  %v5928_v47 = vld [vmem:[#allocation6 + $0x160] sm:$0xf] }
 0x295   : > { %v6999_v60 = vpop.eup %6998  ;;  %v5945_v32 = vor.u32 %v6450_v15, %v5944_v19  ;;  %v6414_v11 = vld [vmem:[#allocation6 + $0x6c] sm:$0xf0]  ;;  %v5768_v15 = vld [vmem:[#allocation6 + $0x20] sm:$0xf] }
 0x296   : > { %7002 = vpow2.f32 %v2710_v26  ;;  %v8094_v43 = vpack.c.bf16 %v6999_v60, %v6997_v34  ;;  %v7001_v12 = vpop.eup %7000  ;;  %v5801_v61 = vor.u32 %v6414_v11, %v5800_v33  ;;  %v6446_v34 = vld [vmem:[#allocation6 + $0x16c] sm:$0xf0] }
 0x297   : > { %v2370_v10 = vpop.f32.mrf.mxu3  ;;  %v2804_v62 = vadd.f32 1.0, %v7001_v12  ;;  %3768 = vmatpush.bf16.msrb.mxu1 %v5945_v32  ;;  %v5929_v26 = vor.u32 %v6446_v34, %v5928_v47  ;;  %v6410_v12 = vld [vmem:[#allocation6 + $0x4c] sm:$0xf0]  ;;  %v5752_v34 = vld [vmem:[#allocation6] sm:$0xf] }
 0x298   : > { %8863 = vst [vmem:[#allocation24_spill] sm:$0xff] %v8094_v43  ;;  %v2371_v6 = vadd.f32 %v2370_v10, %v2322_v35  ;;  %3720 = vmatpush.bf16.msrb.mxu0 %v5801_v61  ;;  %v5912_v10 = vld [vmem:[#allocation6 + $0x140] sm:$0xf] }
 0x299   : > { %v2228_v27 = vpop.f32.mrf.mxu0  ;;  %7004 = vrcp.f32 %v2804_v62  ;;  %v6406_v62 = vld [vmem:[#allocation6 + $0x2c] sm:$0xf0] }
 0x29a   : > { %v2620_v59 = vsub.f32 0.0, %v2371_v6  ;;  %v2229_v36 = vadd.f32 %v2228_v27, %v8054_v8  ;;  %v6056_v6 = vld [vmem:[#allocation6 + $0x260] sm:$0xf]  ;;  %v5769_v32 = vor.u32 %v6406_v62, %v5768_v15  ;;  %v6466_v15 = vld [vmem:[#allocation6 + $0x20c] sm:$0xf0] }
 0x29b   : > { %v2277_v28 = vpop.f32.mrf.mxu1  ;;  %v2323_v17 = vpop.f32.mrf.mxu2  ;;  %3769 = vmatpush.bf16.msrb.mxu1 %v5929_v26  ;;  %v6057_v30 = vor.u32 %v6478_v13, %v6056_v6  ;;  %v6402_v26 = vld [vmem:[#allocation6 + $0xc] sm:$0xf0] }
 0x29c   : > { %v7003_v49 = vpop.eup %7002  ;;  %v2718_v45 = vmul.f32 1.442695, %v2620_v59  ;;  %v2324_v53 = vadd.f32 %v2323_v17, %v2275_v41  ;;  %v2278_v54 = vadd.f32 %v2277_v28, %v2229_v36  ;;  %2423 = vmatmul.bf16.gmra.mxu0 %v7871_v42  ;;  %v5784_v41 = vld [vmem:[#allocation6 + $0x40] sm:$0xf]  ;;  %v6442_v42 = vld [vmem:[#allocation6 + $0x14c] sm:$0xf0] }
 0x29d   : > { %v2808_v58 = vadd.f32 1.0, %v7003_v49  ;;  %v5785_v44 = vor.u32 %v6410_v12, %v5784_v41  ;;  %v5913_v40 = vor.u32 %v6442_v42, %v5912_v10  ;;  %3818 = vmatpush.bf16.msrb.mxu2 %v6057_v30  ;;  %v5896_v36 = vld [vmem:[#allocation6 + $0x120] sm:$0xf]  ;;  %v6438_v28 = vld [vmem:[#allocation6 + $0x12c] sm:$0xf0] }
 0x29e   : > { %2472 = vmatmul.bf16.gmra.mxu1 %v7873_v50  ;;  %v5897_v17 = vor.u32 %v6438_v28, %v5896_v36  ;;  %v6040_v49 = vld [vmem:[#allocation6 + $0x240] sm:$0xf]  ;;  %v6434_v41 = vld [vmem:[#allocation6 + $0x10c] sm:$0xf0] }
 0x29f   : > { %7006 = vrcp.f32 %v2808_v58  ;;  %v2372_v35 = vpop.f32.mrf.mxu3  ;;  %3721 = vmatpush.bf16.msrb.mxu0 %v5785_v44  ;;  %v7005_v7 = vpop.eup %7004  ;;  %3770 = vmatpush.bf16.msrb.mxu1 %v5913_v40  ;;  %v6184_v58 = vld [vmem:[#allocation6 + $0x360] sm:$0xf] }
 0x2a0   : > { %v2373_v60 = vadd.f32 %v2372_v35, %v2324_v53  ;;  %2521 = vmatmul.bf16.gmra.mxu2 %v7876_v57  ;;  %7008 = vpow2.f32 %v2718_v45  ;;  %v6474_v45 = vld [vmem:[#allocation6 + $0x24c] sm:$0xf0]  ;;  %v5880_v35 = vld [vmem:[#allocation6 + $0x100] sm:$0xf] }
 0x2a1   : > { %v2230_v20 = vpop.f32.mrf.mxu0  ;;  %v5881_v42 = vor.u32 %v6434_v41, %v5880_v35 }
 0x2a2   : > { %v2624_v5 = vsub.f32 0.0, %v2373_v60  ;;  %v2231_v50 = vadd.f32 %v2230_v20, %v8054_v8  ;;  %v5753_v60 = vor.u32 %v6402_v26, %v5752_v34  ;;  %v6470_v20 = vld [vmem:[#allocation6 + $0x22c] sm:$0xf0] }
 0x2a3   : > { %v2279_v1 = vpop.f32.mrf.mxu1  ;;  %v2326_v48 = vpop.f32.mrf.mxu2  ;;  %3722 = vmatpush.bf16.msrb.mxu0 %v5769_v32  ;;  %3771 = vmatpush.bf16.msrb.mxu1 %v5897_v17 }
 0x2a4   : > { %v2726_v57 = vmul.f32 1.442695, %v2624_v5  ;;  %2570 = vmatmul.bf16.gmra.mxu3 %v7880_v9  ;;  %v2327_v19 = vadd.f32 %v2326_v48, %v2278_v54  ;;  %v2280_v27 = vadd.f32 %v2279_v1, %v2231_v50  ;;  %v6510_v9 = vld [vmem:[#allocation6 + $0x36c] sm:$0xf0]  ;;  %v6041_v54 = vor.u32 %v6474_v45, %v6040_v49  ;;  %v6024_v5 = vld [vmem:[#allocation6 + $0x220] sm:$0xf] }
 0x2a5   : > { %v7007_v59 = vpop.eup %7006  ;;  %v6185_v47 = vor.u32 %v6510_v9, %v6184_v58  ;;  %v6025_v50 = vor.u32 %v6470_v20, %v6024_v5 }
 0x2a6   : > { %7010 = vpow2.f32 %v2726_v57  ;;  %v8102_v53 = vpack.c.bf16 %v7007_v59, %v7005_v7  ;;  %v7009_v33 = vpop.eup %7008  ;;  %3819 = vmatpush.bf16.msrb.mxu2 %v6041_v54  ;;  %v6168_v54 = vld [vmem:[#allocation6 + $0x340] sm:$0xf] }
 0x2a7   : > { %v2375_v11 = vpop.f32.mrf.mxu3  ;;  %v2812_v12 = vadd.f32 1.0, %v7009_v33  ;;  %3867 = vmatpush.bf16.msrb.mxu3 %v6185_v47  ;;  %3723 = vmatpush.bf16.msrb.mxu0 %v5753_v60 }
 0x2a8   : > { %8864 = vst [vmem:[#allocation25_spill] sm:$0xff] %v8102_v53  ;;  %v2376_v61 = vadd.f32 %v2375_v11, %v2327_v19  ;;  %3772 = vmatpush.bf16.msrb.mxu1 %v5881_v42  ;;  %v6008_v19 = vld [vmem:[#allocation6 + $0x200] sm:$0xf] }
 0x2a9   : > { %v2233_v44 = vpop.f32.mrf.mxu0  ;;  %7012 = vrcp.f32 %v2812_v12  ;;  %v6009_v59 = vor.u32 %v6466_v15, %v6008_v19 }
 0x2aa   : > { %v2628_v10 = vsub.f32 0.0, %v2376_v61  ;;  %v2234_v6 = vadd.f32 %v2233_v44, %v8054_v8  ;;  %3820 = vmatpush.bf16.msrb.mxu2 %v6025_v50  ;;  %v6506_v61 = vld [vmem:[#allocation6 + $0x34c] sm:$0xf0] }
 0x2ab   : > { %v2282_v13 = vpop.f32.mrf.mxu1  ;;  %v2328_v40 = vpop.f32.mrf.mxu2  ;;  %v6169_v34 = vor.u32 %v6506_v61, %v6168_v54 }
 0x2ac   : > { %v7011_v1 = vpop.eup %7010  ;;  %v2329_v48 = vadd.f32 %v2328_v40, %v2280_v27  ;;  %v2734_v7 = vmul.f32 1.442695, %v2628_v10  ;;  %v2283_v57 = vadd.f32 %v2282_v13, %v2234_v6  ;;  %2428 = vmatmul.bf16.gmra.mxu0 %v7889_v29 }
 0x2ad   : > { %v2816_v30 = vadd.f32 1.0, %v7011_v1  ;;  %3868 = vmatpush.bf16.msrb.mxu3 %v6169_v34 }
 0x2ae   : > { %2477 = vmatmul.bf16.gmra.mxu1 %v7892_v4  ;;  %3821 = vmatpush.bf16.msrb.mxu2 %v6009_v59 }
 0x2af   : > { %7014 = vrcp.f32 %v2816_v30  ;;  %v2377_v62 = vpop.f32.mrf.mxu3  ;;  %v7013_v49 = vpop.eup %7012 }
 0x2b0   : > { %v2378_v32 = vadd.f32 %v2377_v62, %v2329_v48  ;;  %2526 = vmatmul.bf16.gmra.mxu2 %v7894_v38  ;;  %7016 = vpow2.f32 %v2734_v7 }
 0x2b1   : > { %v2235_v36 = vpop.f32.mrf.mxu0 }
 0x2b2   : > { %v2632_v27 = vsub.f32 0.0, %v2378_v32  ;;  %v2236_v28 = vadd.f32 %v2235_v36, %v8054_v8  ;;  %v6502_v32 = vld [vmem:[#allocation6 + $0x32c] sm:$0xf0] }
 0x2b3   : > { %v2284_v17 = vpop.f32.mrf.mxu1  ;;  %v2331_v29 = vpop.f32.mrf.mxu2 }
 0x2b4   : > { %v2742_v45 = vmul.f32 1.442695, %v2632_v27  ;;  %2575 = vmatmul.bf16.gmra.mxu3 %v7898_v52  ;;  %v2332_v4 = vadd.f32 %v2331_v29, %v2283_v57  ;;  %v2285_v11 = vadd.f32 %v2284_v17, %v2236_v28  ;;  %v8121_v17 = vperm.slane %v8051_v0, 3 }
 0x2b5   : > { %v7015_v33 = vpop.eup %7014 }
 0x2b6   : > { %7018 = vpow2.f32 %v2742_v45  ;;  %v8110_v58 = vpack.c.bf16 %v7015_v33, %v7013_v49  ;;  %v7017_v9 = vpop.eup %7016 }
 0x2b7   : > { %v2380_v38 = vpop.f32.mrf.mxu3  ;;  %v2820_v26 = vadd.f32 1.0, %v7017_v9 }
 0x2b8   : > { %8865 = vst [vmem:[#allocation26_spill] sm:$0xff] %v8110_v58  ;;  %v2381_v47 = vadd.f32 %v2380_v38, %v2332_v4 }
 0x2b9   : > { %v2238_v60 = vpop.f32.mrf.mxu0  ;;  %7020 = vrcp.f32 %v2820_v26 }
 0x2ba   : > { %v2636_v35 = vsub.f32 0.0, %v2381_v47  ;;  %v2239_v41 = vadd.f32 %v2238_v60, %v8054_v8 }
 0x2bb   : > { %v2287_v12 = vpop.f32.mrf.mxu1  ;;  %v2333_v52 = vpop.f32.mrf.mxu2 }
 0x2bc   : > { %v7019_v10 = vpop.eup %7018  ;;  %v2334_v44 = vadd.f32 %v2333_v52, %v2285_v11  ;;  %v2750_v5 = vmul.f32 1.442695, %v2636_v35  ;;  %v2288_v20 = vadd.f32 %v2287_v12, %v2239_v41  ;;  %2433 = vmatmul.bf16.gmra.mxu0 %v7901_v22  ;;  %v6136_v12 = vld [vmem:[#allocation6 + $0x300] sm:$0xf]  ;;  %v6498_v52 = vld [vmem:[#allocation6 + $0x30c] sm:$0xf0] }
 0x2bd   : > { %v2824_v42 = vadd.f32 1.0, %v7019_v10 }
 0x2be   : > { %2482 = vmatmul.bf16.gmra.mxu1 %v7903_v24 }
 0x2bf   : > { %7022 = vrcp.f32 %v2824_v42  ;;  %v2382_v6 = vpop.f32.mrf.mxu3  ;;  %v7021_v7 = vpop.eup %7020 }
 0x2c0   : > { %v2383_v13 = vadd.f32 %v2382_v6, %v2334_v44  ;;  %2531 = vmatmul.bf16.gmra.mxu2 %v7907_v21  ;;  %7024 = vpow2.f32 %v2750_v5  ;;  %v6152_v21 = vld [vmem:[#allocation6 + $0x320] sm:$0xf]  ;;  %v6137_v44 = vor.u32 %v6498_v52, %v6136_v12  ;;  %v6460_v12 = vld [vmem:[#allocation6 + $0x1e4] sm:$0xf]  ;;  %v5994_v52 = vld [vmem:[#allocation6 + $0x1f0] sm:$0xf0] }
 0x2c1   : > { %v2240_v50 = vpop.f32.mrf.mxu0  ;;  %v6153_v36 = vor.u32 %v6502_v32, %v6152_v21 }
 0x2c2   : > { %v2640_v40 = vsub.f32 0.0, %v2383_v13  ;;  %v2241_v1 = vadd.f32 %v2240_v50, %v8054_v8 }
 0x2c3   : > { %v2289_v48 = vpop.f32.mrf.mxu1  ;;  %v2336_v30 = vpop.f32.mrf.mxu2  ;;  %3869 = vmatpush.bf16.msrb.mxu3 %v6153_v36 }
 0x2c4   : > { %v2758_v57 = vmul.f32 1.442695, %v2640_v40  ;;  %2580 = vmatmul.bf16.gmra.mxu3 %v7910_v37  ;;  %v2337_v22 = vadd.f32 %v2336_v30, %v2288_v20  ;;  %v2290_v15 = vadd.f32 %v2289_v48, %v2241_v1 }
 0x2c5   : > { %v7023_v19 = vpop.eup %7022 }
 0x2c6   : > { %7026 = vpow2.f32 %v2758_v57  ;;  %v8118_v24 = vpack.c.bf16 %v7023_v19, %v7021_v7  ;;  %v7025_v62 = vpop.eup %7024 }
 0x2c7   : > { %v2385_v59 = vpop.f32.mrf.mxu3  ;;  %v2828_v28 = vadd.f32 1.0, %v7025_v62  ;;  %3870 = vmatpush.bf16.msrb.mxu3 %v6137_v44 }
 0x2c8   : > { %8866 = vst [vmem:[#allocation27_spill] sm:$0xff] %v8118_v24  ;;  %v2386_v27 = vadd.f32 %v2385_v59, %v2337_v22 }
 0x2c9   : > { %v2399_v29 = vpop.f32.mrf.mxu0  ;;  %7028 = vrcp.f32 %v2828_v28 }
 0x2ca   : > { %v2644_v8 = vsub.f32 0.0, %v2386_v27  ;;  %v2400_v9 = vadd.f32 %v2399_v29, %v8121_v17 }
 0x2cb   : > { %v2448_v37 = vpop.f32.mrf.mxu1  ;;  %v2338_v49 = vpop.f32.mrf.mxu2 }
 0x2cc   : > { %v7027_v45 = vpop.eup %7026  ;;  %v2339_v4 = vadd.f32 %v2338_v49, %v2290_v15  ;;  %v2766_v11 = vmul.f32 1.442695, %v2644_v8  ;;  %3724 = vmatmul.bf16.vlgmr.msrb.gmra.mxu0 %v7938_v46  ;;  %v2449_v0 = vadd.f32 %v2448_v37, %v2400_v9 }
 0x2cd   : > { %v2832_v33 = vadd.f32 1.0, %v7027_v45 }
 0x2ce   : > { %3773 = vmatmul.bf16.vlgmr.msrb.gmra.mxu1 %v8006_v56 }
 0x2cf   : > { %7030 = vrcp.f32 %v2832_v33  ;;  %v2387_v38 = vpop.f32.mrf.mxu3  ;;  %v7029_v35 = vpop.eup %7028 }
 0x2d0   : > { %v2388_v54 = vadd.f32 %v2387_v38, %v2339_v4  ;;  %3822 = vmatmul.bf16.vlgmr.msrb.gmra.mxu2 %v8078_v39  ;;  %7032 = vpow2.f32 %v2766_v11  ;;  %v6492_v38 = vld [vmem:[#allocation6 + $0x2e4] sm:$0xf] }
 0x2d1   : > { %v2401_v47 = vpop.f32.mrf.mxu0 }
 0x2d2   : > { %v2648_v61 = vsub.f32 0.0, %v2388_v54  ;;  %v2402_v42 = vadd.f32 %v2401_v47, %v8121_v17  ;;  %v6122_v54 = vld [vmem:[#allocation6 + $0x2f0] sm:$0xf0] }
 0x2d3   : > { %v2450_v34 = vpop.f32.mrf.mxu1  ;;  %v2497_v26 = vpop.f32.mrf.mxu2  ;;  %v6125_v47 = vor.u32 %v6492_v38, %v6122_v54  ;;  %v5850_v54 = vld [vmem:[#allocation6 + $0xd0] sm:$0xf0] }
 0x2d4   : > { %v2774_v60 = vmul.f32 1.442695, %v2648_v61  ;;  %v2498_v41 = vadd.f32 %v2497_v26, %v2449_v0  ;;  %v2451_v50 = vadd.f32 %v2450_v34, %v2402_v42  ;;  %v6428_v0 = vld [vmem:[#allocation6 + $0xe4] sm:$0xf]  ;;  %v5866_v34 = vld [vmem:[#allocation6 + $0xf0] sm:$0xf0] }
 0x2d5   : > { %v7031_v10 = vpop.eup %7030  ;;  %v6524_v26 = vld [vmem:[#allocation6 + $0x3e4] sm:$0xf]  ;;  %4010 = vmatpush.bf16.msra.mxu2 %v6125_v47 }
 0x2d6   : > { %7034 = vpow2.f32 %v2774_v60  ;;  %v8128_v5 = vpack.c.bf16 %v7031_v10, %v7029_v35  ;;  %v7033_v20 = vpop.eup %7032  ;;  %v6250_v35 = vld [vmem:[#allocation6 + $0x3f0] sm:$0xf0]  ;;  %v5869_v60 = vor.u32 %v6428_v0, %v5866_v34  ;;  %v6520_v0 = vld [vmem:[#allocation6 + $0x3c4] sm:$0xf] }
 0x2d7   : > { %v2546_v6 = vpop.f32.mrf.mxu3  ;;  %v2836_v40 = vadd.f32 1.0, %v7033_v20 }
 0x2d8   : > { %v2547_v13 = vadd.f32 %v2546_v6, %v2498_v41  ;;  %v6253_v41 = vor.u32 %v6524_v26, %v6250_v35  ;;  %v5997_v6 = vor.u32 %v6460_v12, %v5994_v52  ;;  %3912 = vmatpush.bf16.msra.mxu0 %v5869_v60  ;;  %v6456_v26 = vld [vmem:[#allocation6 + $0x1c4] sm:$0xf]  ;;  %v5978_v35 = vld [vmem:[#allocation6 + $0x1d0] sm:$0xf0] }
 0x2d9   : > { %v2404_v48 = vpop.f32.mrf.mxu0  ;;  %7036 = vrcp.f32 %v2836_v40 }
 0x2da   : > { %v2589_v1 = vsub.f32 0.0, %v2547_v13  ;;  %v2405_v62 = vadd.f32 %v2404_v48, %v8121_v17  ;;  %4059 = vmatpush.bf16.msra.mxu3 %v6253_v41  ;;  %3961 = vmatpush.bf16.msra.mxu1 %v5997_v6 }
 0x2db   : > { %v2453_v30 = vpop.f32.mrf.mxu1  ;;  %v2499_v7 = vpop.f32.mrf.mxu2 }
 0x2dc   : > { %v7035_v57 = vpop.eup %7034  ;;  %v2500_v22 = vadd.f32 %v2499_v7, %v2451_v50  ;;  %v2656_v15 = vmul.f32 1.442695, %v2589_v1  ;;  %3729 = vmatmul.bf16.gmra.mxu0 %v7947_v3  ;;  %v2454_v32 = vadd.f32 %v2453_v30, %v2405_v62 }
 0x2dd   : > { %v2840_v19 = vadd.f32 1.0, %v7035_v57 }
 0x2de   : > { %3778 = vmatmul.bf16.gmra.mxu1 %v8014_v55 }
 0x2df   : > { %7038 = vrcp.f32 %v2840_v19  ;;  %v2548_v59 = vpop.f32.mrf.mxu3  ;;  %v7037_v29 = vpop.eup %7036 }
 0x2e0   : > { %v2549_v21 = vadd.f32 %v2548_v59, %v2500_v22  ;;  %3827 = vmatmul.bf16.gmra.mxu2 %v8086_v51  ;;  %7040 = vpow2.f32 %v2656_v15 }
 0x2e1   : > { %v2406_v36 = vpop.f32.mrf.mxu0 }
 0x2e2   : > { %v2593_v27 = vsub.f32 0.0, %v2549_v21  ;;  %v2407_v4 = vadd.f32 %v2406_v36, %v8121_v17 }
 0x2e3   : > { %v2455_v28 = vpop.f32.mrf.mxu1  ;;  %v2502_v8 = vpop.f32.mrf.mxu2 }
 0x2e4   : > { %v2664_v37 = vmul.f32 1.442695, %v2593_v27  ;;  %v2503_v49 = vadd.f32 %v2502_v8, %v2454_v32  ;;  %v2456_v44 = vadd.f32 %v2455_v28, %v2407_v4  ;;  %v6106_v4 = vld [vmem:[#allocation6 + $0x2d0] sm:$0xf0] }
 0x2e5   : > { %v7039_v45 = vpop.eup %7038 }
 0x2e6   : > { %7042 = vpow2.f32 %v2664_v37  ;;  %v8135_v33 = vpack.c.bf16 %v7039_v45, %v7037_v29  ;;  %v7041_v11 = vpop.eup %7040  ;;  %v6488_v45 = vld [vmem:[#allocation6 + $0x2c4] sm:$0xf] }
 0x2e7   : > { %v2551_v9 = vpop.f32.mrf.mxu3  ;;  %v2781_v10 = vadd.f32 1.0, %v7041_v11  ;;  %v6424_v11 = vld [vmem:[#allocation6 + $0xc4] sm:$0xf]  ;;  %v6109_v38 = vor.u32 %v6488_v45, %v6106_v4 }
 0x2e8   : > { %v2552_v61 = vadd.f32 %v2551_v9, %v2503_v49  ;;  %v5853_v47 = vor.u32 %v6424_v11, %v5850_v54  ;;  %v5834_v11 = vld [vmem:[#allocation6 + $0xb0] sm:$0xf0] }
 0x2e9   : > { %v2409_v20 = vpop.f32.mrf.mxu0  ;;  %7044 = vrcp.f32 %v2781_v10  ;;  %4011 = vmatpush.bf16.msra.mxu2 %v6109_v38  ;;  %v5981_v10 = vor.u32 %v6456_v26, %v5978_v35  ;;  %v6218_v38 = vld [vmem:[#allocation6 + $0x3b0] sm:$0xf0] }
 0x2ea   : > { %v2597_v42 = vsub.f32 0.0, %v2552_v61  ;;  %v2410_v7 = vadd.f32 %v2409_v20, %v8121_v17  ;;  %v6234_v61 = vld [vmem:[#allocation6 + $0x3d0] sm:$0xf0]  ;;  %3913 = vmatpush.bf16.msra.mxu0 %v5853_v47 }
 0x2eb   : > { %v2458_v13 = vpop.f32.mrf.mxu1  ;;  %v2504_v40 = vpop.f32.mrf.mxu2  ;;  %v6237_v34 = vor.u32 %v6520_v0, %v6234_v61  ;;  %3962 = vmatpush.bf16.msra.mxu1 %v5981_v10  ;;  %v6452_v61 = vld [vmem:[#allocation6 + $0x1a4] sm:$0xf]  ;;  %v5962_v47 = vld [vmem:[#allocation6 + $0x1b0] sm:$0xf0] }
 0x2ec   : > { %v7043_v50 = vpop.eup %7042  ;;  %v2505_v1 = vadd.f32 %v2504_v40, %v2456_v44  ;;  %v2672_v30 = vmul.f32 1.442695, %v2597_v42  ;;  %3734 = vmatmul.bf16.gmra.mxu0 %v7955_v18  ;;  %v2459_v19 = vadd.f32 %v2458_v13, %v2410_v7 }
 0x2ed   : > { %v2785_v48 = vadd.f32 1.0, %v7043_v50  ;;  %4060 = vmatpush.bf16.msra.mxu3 %v6237_v34 }
 0x2ee   : > { %3783 = vmatmul.bf16.gmra.mxu1 %v8022_v14 }
 0x2ef   : > { %7046 = vrcp.f32 %v2785_v48  ;;  %v2553_v57 = vpop.f32.mrf.mxu3  ;;  %v7045_v32 = vpop.eup %7044 }
 0x2f0   : > { %v2554_v22 = vadd.f32 %v2553_v57, %v2505_v1  ;;  %3832 = vmatmul.bf16.gmra.mxu2 %v8094_v43  ;;  %7048 = vpow2.f32 %v2672_v30 }
 0x2f1   : > { %v2411_v62 = vpop.f32.mrf.mxu0 }
 0x2f2   : > { %v2601_v15 = vsub.f32 0.0, %v2554_v22  ;;  %v2412_v8 = vadd.f32 %v2411_v62, %v8121_v17 }
 0x2f3   : > { %v2460_v59 = vpop.f32.mrf.mxu1  ;;  %v2507_v21 = vpop.f32.mrf.mxu2 }
 0x2f4   : > { %v2680_v27 = vmul.f32 1.442695, %v2601_v15  ;;  %v2508_v36 = vadd.f32 %v2507_v21, %v2459_v19  ;;  %v2461_v41 = vadd.f32 %v2460_v59, %v2412_v8  ;;  %v6484_v8 = vld [vmem:[#allocation6 + $0x2a4] sm:$0xf] }
 0x2f5   : > { %v7047_v28 = vpop.eup %7046 }
 0x2f6   : > { %7050 = vpow2.f32 %v2680_v27  ;;  %v8142_v29 = vpack.c.bf16 %v7047_v28, %v7045_v32  ;;  %v7049_v37 = vpop.eup %7048 }
 0x2f7   : > { %v2556_v49 = vpop.f32.mrf.mxu3  ;;  %v2789_v60 = vadd.f32 1.0, %v7049_v37  ;;  %v6090_v37 = vld [vmem:[#allocation6 + $0x2b0] sm:$0xf0] }
 0x2f8   : > { %v2557_v9 = vadd.f32 %v2556_v49, %v2508_v36  ;;  %3871 = vmatmul.bf16.vlgmr.msrb.gmra.mxu3 %v8142_v29  ;;  %v6420_v49 = vld [vmem:[#allocation6 + $0xa4] sm:$0xf]  ;;  %v6093_v4 = vor.u32 %v6484_v8, %v6090_v37  ;;  %v6074_v8 = vld [vmem:[#allocation6 + $0x290] sm:$0xf0] }
 0x2f9   : > { %v2414_v52 = vpop.f32.mrf.mxu0  ;;  %7052 = vrcp.f32 %v2789_v60  ;;  %v5837_v54 = vor.u32 %v6420_v49, %v5834_v11  ;;  %v6416_v37 = vld [vmem:[#allocation6 + $0x84] sm:$0xf] }
 0x2fa   : > { %v2605_v12 = vsub.f32 0.0, %v2557_v9  ;;  %v2415_v50 = vadd.f32 %v2414_v52, %v8121_v17  ;;  %v6516_v9 = vld [vmem:[#allocation6 + $0x3a4] sm:$0xf]  ;;  %4012 = vmatpush.bf16.msra.mxu2 %v6093_v4  ;;  %v5818_v4 = vld [vmem:[#allocation6 + $0x90] sm:$0xf0] }
 0x2fb   : > { %v2463_v44 = vpop.f32.mrf.mxu1  ;;  %v2509_v42 = vpop.f32.mrf.mxu2  ;;  %v6221_v0 = vor.u32 %v6516_v9, %v6218_v38  ;;  %3914 = vmatpush.bf16.msra.mxu0 %v5837_v54  ;;  %v6512_v11 = vld [vmem:[#allocation6 + $0x384] sm:$0xf]  ;;  %v6202_v9 = vld [vmem:[#allocation6 + $0x390] sm:$0xf0]  ;;  %v5821_v38 = vor.u32 %v6416_v37, %v5818_v4 }
 0x2fc   : > { %v7051_v20 = vpop.eup %7050  ;;  %v2510_v6 = vadd.f32 %v2509_v42, %v2461_v41  ;;  %v2688_v40 = vmul.f32 1.442695, %v2605_v12  ;;  %3739 = vmatmul.bf16.gmra.mxu0 %v7963_v31  ;;  %v2464_v30 = vadd.f32 %v2463_v44, %v2415_v50  ;;  %v5965_v41 = vor.u32 %v6452_v61, %v5962_v47  ;;  %v5946_v61 = vld [vmem:[#allocation6 + $0x190] sm:$0xf0]  ;;  %v6476_v37 = vld [vmem:[#allocation6 + $0x264] sm:$0xf] }
 0x2fd   : > { %v2793_v13 = vadd.f32 1.0, %v7051_v20  ;;  %4061 = vmatpush.bf16.msra.mxu3 %v6221_v0  ;;  %v6205_v54 = vor.u32 %v6512_v11, %v6202_v9  ;;  %v6448_v0 = vld [vmem:[#allocation6 + $0x184] sm:$0xf] }
 0x2fe   : > { %3788 = vmatmul.bf16.gmra.mxu1 %v8030_v25 }
 0x2ff   : > { %7054 = vrcp.f32 %v2793_v13  ;;  %v2558_v1 = vpop.f32.mrf.mxu3  ;;  %v7053_v15 = vpop.eup %7052  ;;  %3963 = vmatpush.bf16.msra.mxu1 %v5965_v41  ;;  %3915 = vmatpush.bf16.msra.mxu0 %v5821_v38 }
 0x300   : > { %v2559_v48 = vadd.f32 %v2558_v1, %v2510_v6  ;;  %3837 = vmatmul.bf16.gmra.mxu2 %v8102_v53  ;;  %7056 = vpow2.f32 %v2688_v40  ;;  %v8868_v6 = vld [vmem:[#allocation13_spill] sm:$0xff] }
 0x301   : > { %v2416_v57 = vpop.f32.mrf.mxu0  ;;  %4062 = vmatpush.bf16.msra.mxu3 %v6205_v54 }
 0x302   : > { %v2609_v7 = vsub.f32 0.0, %v2559_v48  ;;  %v2417_v32 = vadd.f32 %v2416_v57, %v8121_v17 }
 0x303   : > { %v2465_v22 = vpop.f32.mrf.mxu1  ;;  %v2512_v19 = vpop.f32.mrf.mxu2 }
 0x304   : > { %v2696_v62 = vmul.f32 1.442695, %v2609_v7  ;;  %v2513_v59 = vadd.f32 %v2512_v19, %v2464_v30  ;;  %v2466_v26 = vadd.f32 %v2465_v22, %v2417_v32 }
 0x305   : > { %v7055_v21 = vpop.eup %7054 }
 0x306   : > { %7058 = vpow2.f32 %v2696_v62  ;;  %v8150_v27 = vpack.c.bf16 %v7055_v21, %v7053_v15  ;;  %v7057_v36 = vpop.eup %7056 }
 0x307   : > { %v2561_v28 = vpop.f32.mrf.mxu3  ;;  %v2797_v34 = vadd.f32 1.0, %v7057_v36 }
 0x308   : > { %8867 = vst [vmem:[#allocation28_spill] sm:$0xff] %v8150_v27  ;;  %v2562_v45 = vadd.f32 %v2561_v28, %v2513_v59  ;;  %3876 = vmatmul.bf16.gmra.mxu3 %v8150_v27  ;;  %v6480_v28 = vld [vmem:[#allocation6 + $0x284] sm:$0xf] }
 0x309   : > { %v2419_v60 = vpop.f32.mrf.mxu0  ;;  %7060 = vrcp.f32 %v2797_v34 }
 0x30a   : > { %v2613_v35 = vsub.f32 0.0, %v2562_v45  ;;  %v2420_v13 = vadd.f32 %v2419_v60, %v8121_v17  ;;  %v6077_v45 = vor.u32 %v6480_v28, %v6074_v8  ;;  %v5949_v60 = vor.u32 %v6448_v0, %v5946_v61  ;;  %v6404_v61 = vld [vmem:[#allocation6 + $0x24] sm:$0xf] }
 0x30b   : > { %v2468_v12 = vpop.f32.mrf.mxu1  ;;  %v2514_v52 = vpop.f32.mrf.mxu2 }
 0x30c   : > { %v7059_v10 = vpop.eup %7058  ;;  %v2515_v44 = vadd.f32 %v2514_v52, %v2466_v26  ;;  %v2704_v20 = vmul.f32 1.442695, %v2613_v35  ;;  %3744 = vmatmul.bf16.gmra.mxu0 %v8868_v6  ;;  %v2469_v1 = vadd.f32 %v2468_v12, %v2420_v13  ;;  %4013 = vmatpush.bf16.msra.mxu2 %v6077_v45 }
 0x30d   : > { %v2801_v42 = vadd.f32 1.0, %v7059_v10  ;;  %3964 = vmatpush.bf16.msra.mxu1 %v5949_v60  ;;  %v5898_v60 = vld [vmem:[#allocation6 + $0x130] sm:$0xf0] }
 0x30e   : > { %3793 = vmatmul.bf16.gmra.mxu1 %v8038_v63 }
 0x30f   : > { %7062 = vrcp.f32 %v2801_v42  ;;  %v2563_v40 = vpop.f32.mrf.mxu3  ;;  %v7061_v22 = vpop.eup %7060  ;;  %v6412_v42 = vld [vmem:[#allocation6 + $0x64] sm:$0xf] }
 0x310   : > { %v2564_v50 = vadd.f32 %v2563_v40, %v2515_v44  ;;  %3842 = vmatmul.bf16.gmra.mxu2 %v8110_v58  ;;  %7064 = vpow2.f32 %v2704_v20  ;;  %v5802_v20 = vld [vmem:[#allocation6 + $0x70] sm:$0xf0] }
 0x311   : > { %v2421_v30 = vpop.f32.mrf.mxu0  ;;  %v8869_v40 = vld [vmem:[#allocation14_spill] sm:$0xff] }
 0x312   : > { %v2617_v48 = vsub.f32 0.0, %v2564_v50  ;;  %v2422_v59 = vadd.f32 %v2421_v30, %v8121_v17  ;;  %v5805_v50 = vor.u32 %v6412_v42, %v5802_v20 }
 0x313   : > { %v2470_v7 = vpop.f32.mrf.mxu1  ;;  %v2517_v57 = vpop.f32.mrf.mxu2 }
 0x314   : > { %v2712_v19 = vmul.f32 1.442695, %v2617_v48  ;;  %v2518_v15 = vadd.f32 %v2517_v57, %v2469_v1  ;;  %v2471_v34 = vadd.f32 %v2470_v7, %v2422_v59  ;;  %v6444_v1 = vld [vmem:[#allocation6 + $0x164] sm:$0xf]  ;;  %v5930_v48 = vld [vmem:[#allocation6 + $0x170] sm:$0xf0]  ;;  %3916 = vmatpush.bf16.msra.mxu0 %v5805_v50 }
 0x315   : > { %v7063_v62 = vpop.eup %7062  ;;  %v5933_v7 = vor.u32 %v6444_v1, %v5930_v48  ;;  %v6186_v50 = vld [vmem:[#allocation6 + $0x370] sm:$0xf0] }
 0x316   : > { %7066 = vpow2.f32 %v2712_v19  ;;  %v8158_v21 = vpack.c.bf16 %v7063_v62, %v7061_v22  ;;  %v7065_v32 = vpop.eup %7064  ;;  %v6408_v19 = vld [vmem:[#allocation6 + $0x44] sm:$0xf] }
 0x317   : > { %v2566_v36 = vpop.f32.mrf.mxu3  ;;  %v2805_v47 = vadd.f32 1.0, %v7065_v32  ;;  %3965 = vmatpush.bf16.msra.mxu1 %v5933_v7  ;;  %v6440_v62 = vld [vmem:[#allocation6 + $0x144] sm:$0xf]  ;;  %v5914_v32 = vld [vmem:[#allocation6 + $0x150] sm:$0xf0] }
 0x318   : > { %v2567_v49 = vadd.f32 %v2566_v36, %v2518_v15  ;;  %3881 = vmatmul.bf16.gmra.mxu3 %v8158_v21  ;;  %v5786_v15 = vld [vmem:[#allocation6 + $0x50] sm:$0xf0]  ;;  %v5917_v45 = vor.u32 %v6440_v62, %v5914_v32  ;;  %v6400_v7 = vld [vmem:[#allocation6 + $0x4] sm:$0xf] }
 0x319   : > { %v2424_v35 = vpop.f32.mrf.mxu0  ;;  %7068 = vrcp.f32 %v2805_v47  ;;  %v5789_v59 = vor.u32 %v6408_v19, %v5786_v15  ;;  %v5770_v47 = vld [vmem:[#allocation6 + $0x30] sm:$0xf0] }
 0x31a   : > { %v2621_v26 = vsub.f32 0.0, %v2567_v49  ;;  %v2425_v30 = vadd.f32 %v2424_v35, %v8121_v17  ;;  %v6058_v49 = vld [vmem:[#allocation6 + $0x270] sm:$0xf0]  ;;  %v6436_v35 = vld [vmem:[#allocation6 + $0x124] sm:$0xf] }
 0x31b   : > { %v2473_v41 = vpop.f32.mrf.mxu1  ;;  %v2519_v12 = vpop.f32.mrf.mxu2  ;;  %v6061_v9 = vor.u32 %v6476_v37, %v6058_v49  ;;  %3917 = vmatpush.bf16.msra.mxu0 %v5789_v59  ;;  %3966 = vmatpush.bf16.msra.mxu1 %v5917_v45  ;;  %v5882_v15 = vld [vmem:[#allocation6 + $0x110] sm:$0xf0] }
 0x31c   : > { %v7067_v52 = vpop.eup %7066  ;;  %v2720_v10 = vmul.f32 1.442695, %v2621_v26  ;;  %v2520_v44 = vadd.f32 %v2519_v12, %v2471_v34  ;;  %3749 = vmatmul.bf16.gmra.mxu0 %v8869_v40  ;;  %v2474_v36 = vadd.f32 %v2473_v41, %v2425_v30  ;;  %v5773_v26 = vor.u32 %v6404_v61, %v5770_v47  ;;  %v6026_v37 = vld [vmem:[#allocation6 + $0x230] sm:$0xf0]  ;;  %v8870_v61 = vld [vmem:[#allocation15_spill] sm:$0xff] }
 0x31d   : > { %v2809_v13 = vadd.f32 1.0, %v7067_v52  ;;  %4014 = vmatpush.bf16.msra.mxu2 %v6061_v9  ;;  %v5901_v52 = vor.u32 %v6436_v35, %v5898_v60  ;;  %v6464_v47 = vld [vmem:[#allocation6 + $0x204] sm:$0xf] }
 0x31e   : > { %3798 = vmatmul.bf16.gmra.mxu1 %v8046_v16 }
 0x31f   : > { %7070 = vrcp.f32 %v2809_v13  ;;  %v2568_v57 = vpop.f32.mrf.mxu3  ;;  %v7069_v38 = vpop.eup %7068  ;;  %v6508_v13 = vld [vmem:[#allocation6 + $0x364] sm:$0xf]  ;;  %3918 = vmatpush.bf16.msra.mxu0 %v5773_v26  ;;  %3967 = vmatpush.bf16.msra.mxu1 %v5901_v52 }
 0x320   : > { %v2569_v22 = vadd.f32 %v2568_v57, %v2520_v44  ;;  %3847 = vmatmul.bf16.gmra.mxu2 %v8118_v24  ;;  %7072 = vpow2.f32 %v2720_v10  ;;  %v6472_v10 = vld [vmem:[#allocation6 + $0x244] sm:$0xf]  ;;  %v6042_v44 = vld [vmem:[#allocation6 + $0x250] sm:$0xf0]  ;;  %v6189_v30 = vor.u32 %v6508_v13, %v6186_v50 }
 0x321   : > { %v2426_v8 = vpop.f32.mrf.mxu0  ;;  %v6045_v1 = vor.u32 %v6472_v10, %v6042_v44  ;;  %v5754_v57 = vld [vmem:[#allocation6 + $0x10] sm:$0xf0] }
 0x322   : > { %v2625_v28 = vsub.f32 0.0, %v2569_v22  ;;  %v2427_v41 = vadd.f32 %v2426_v8, %v8121_v17  ;;  %v6432_v22 = vld [vmem:[#allocation6 + $0x104] sm:$0xf]  ;;  %v5757_v19 = vor.u32 %v6400_v7, %v5754_v57  ;;  %4063 = vmatpush.bf16.msra.mxu3 %v6189_v30 }
 0x323   : > { %v2475_v4 = vpop.f32.mrf.mxu1  ;;  %v2522_v11 = vpop.f32.mrf.mxu2  ;;  %4015 = vmatpush.bf16.msra.mxu2 %v6045_v1  ;;  %v6468_v8 = vld [vmem:[#allocation6 + $0x224] sm:$0xf] }
 0x324   : > { %v2728_v54 = vmul.f32 1.442695, %v2625_v28  ;;  %v2523_v0 = vadd.f32 %v2522_v11, %v2474_v36  ;;  %v2476_v59 = vadd.f32 %v2475_v4, %v2427_v41  ;;  %v5885_v28 = vor.u32 %v6432_v22, %v5882_v15  ;;  %3919 = vmatpush.bf16.msra.mxu0 %v5757_v19  ;;  %v6504_v22 = vld [vmem:[#allocation6 + $0x344] sm:$0xf]  ;;  %v6170_v19 = vld [vmem:[#allocation6 + $0x350] sm:$0xf0] }
 0x325   : > { %v7071_v34 = vpop.eup %7070  ;;  %v6029_v11 = vor.u32 %v6468_v8, %v6026_v37 }
 0x326   : > { %7074 = vpow2.f32 %v2728_v54  ;;  %v8166_v12 = vpack.c.bf16 %v7071_v34, %v7069_v38  ;;  %v7073_v42 = vpop.eup %7072  ;;  %3968 = vmatpush.bf16.msra.mxu1 %v5885_v28  ;;  %v6010_v34 = vld [vmem:[#allocation6 + $0x210] sm:$0xf0] }
 0x327   : > { %v2571_v20 = vpop.f32.mrf.mxu3  ;;  %v2813_v62 = vadd.f32 1.0, %v7073_v42  ;;  %4016 = vmatpush.bf16.msra.mxu2 %v6029_v11  ;;  %v6013_v35 = vor.u32 %v6464_v47, %v6010_v34  ;;  %v6154_v47 = vld [vmem:[#allocation6 + $0x330] sm:$0xf0] }
 0x328   : > { %v2572_v48 = vadd.f32 %v2571_v20, %v2523_v0  ;;  %3886 = vmatmul.bf16.gmra.mxu3 %v8166_v12 }
 0x329   : > { %v2429_v36 = vpop.f32.mrf.mxu0  ;;  %7076 = vrcp.f32 %v2813_v62  ;;  %v6173_v62 = vor.u32 %v6504_v22, %v6170_v19 }
 0x32a   : > { %v2629_v32 = vsub.f32 0.0, %v2572_v48  ;;  %v2430_v4 = vadd.f32 %v2429_v36, %v8121_v17 }
 0x32b   : > { %v2478_v49 = vpop.f32.mrf.mxu1  ;;  %v2524_v45 = vpop.f32.mrf.mxu2  ;;  %4017 = vmatpush.bf16.msra.mxu2 %v6013_v35  ;;  %4064 = vmatpush.bf16.msra.mxu3 %v6173_v62  ;;  %v6138_v62 = vld [vmem:[#allocation6 + $0x310] sm:$0xf0] }
 0x32c   : > { %v7075_v9 = vpop.eup %7074  ;;  %v2525_v38 = vadd.f32 %v2524_v45, %v2476_v59  ;;  %v2736_v0 = vmul.f32 1.442695, %v2629_v32  ;;  %3754 = vmatmul.bf16.gmra.mxu0 %v8870_v61  ;;  %v2479_v41 = vadd.f32 %v2478_v49, %v2430_v4  ;;  %v6500_v4 = vld [vmem:[#allocation6 + $0x324] sm:$0xf] }
 0x32d   : > { %v2817_v54 = vadd.f32 1.0, %v7075_v9 }
 0x32e   : > { %3803 = vmatmul.bf16.gmra.mxu1 %v8062_v2 }
 0x32f   : > { %7078 = vrcp.f32 %v2817_v54  ;;  %v2573_v26 = vpop.f32.mrf.mxu3  ;;  %v7077_v20 = vpop.eup %7076 }
 0x330   : > { %v2574_v60 = vadd.f32 %v2573_v26, %v2525_v38  ;;  %3852 = vmatmul.bf16.gmra.mxu2 %v8128_v5  ;;  %7080 = vpow2.f32 %v2736_v0  ;;  %v8871_v38 = vld [vmem:[#allocation16_spill] sm:$0xff]  ;;  %v6157_v26 = vor.u32 %v6500_v4, %v6154_v47 }
 0x331   : > { %v2431_v10 = vpop.f32.mrf.mxu0 }
 0x332   : > { %v2633_v52 = vsub.f32 0.0, %v2574_v60  ;;  %v2432_v48 = vadd.f32 %v2431_v10, %v8121_v17  ;;  %4065 = vmatpush.bf16.msra.mxu3 %v6157_v26 }
 0x333   : > { %v2480_v44 = vpop.f32.mrf.mxu1  ;;  %v2527_v42 = vpop.f32.mrf.mxu2 }
 0x334   : > { %v2744_v13 = vmul.f32 1.442695, %v2633_v52  ;;  %v2528_v50 = vadd.f32 %v2527_v42, %v2479_v41  ;;  %v2481_v32 = vadd.f32 %v2480_v44, %v2432_v48 }
 0x335   : > { %v7079_v1 = vpop.eup %7078 }
 0x336   : > { %7082 = vpow2.f32 %v2744_v13  ;;  %v8174_v30 = vpack.c.bf16 %v7079_v1, %v7077_v20  ;;  %v7081_v7 = vpop.eup %7080  ;;  %v8184_v13 = vld [vmem:[%s8822_s6] sm:$0xf] }
 0x337   : > { %v2576_v57 = vpop.f32.mrf.mxu3  ;;  %v2821_v59 = vadd.f32 1.0, %v7081_v7  ;;  %v8190_v22 = vperm.slane %v8184_v13, 0 }
 0x338   : > { %v2577_v15 = vadd.f32 %v2576_v57, %v2528_v50  ;;  %3891 = vmatmul.bf16.gmra.mxu3 %v8174_v30 }
 0x339   : > { %v2434_v28 = vpop.f32.mrf.mxu0  ;;  %7084 = vrcp.f32 %v2821_v59 }
 0x33a   : > { %v2637_v36 = vsub.f32 0.0, %v2577_v15  ;;  %v2435_v54 = vadd.f32 %v2434_v28, %v8121_v17  ;;  %v6496_v15 = vld [vmem:[#allocation6 + $0x304] sm:$0xf] }
 0x33b   : > { %v2483_v8 = vpop.f32.mrf.mxu1  ;;  %v2529_v37 = vpop.f32.mrf.mxu2  ;;  %v6141_v59 = vor.u32 %v6496_v15, %v6138_v62  ;;  %v5872_v15 = vld [vmem:[#allocation6 + $0xe8] sm:$0xf]  ;;  %v6431_v62 = vld [vmem:[#allocation6 + $0xf4] sm:$0xf0] }
 0x33c   : > { %v7083_v49 = vpop.eup %7082  ;;  %v2530_v45 = vadd.f32 %v2529_v37, %v2481_v32  ;;  %v2752_v9 = vmul.f32 1.442695, %v2637_v36  ;;  %3759 = vmatmul.bf16.gmra.mxu0 %v8871_v38  ;;  %v2484_v35 = vadd.f32 %v2483_v8, %v2435_v54 }
 0x33d   : > { %v2825_v11 = vadd.f32 1.0, %v7083_v49  ;;  %4066 = vmatpush.bf16.msra.mxu3 %v6141_v59  ;;  %v6256_v59 = vld [vmem:[#allocation6 + $0x3e8] sm:$0xf] }
 0x33e   : > { %3808 = vmatmul.bf16.gmra.mxu1 %v8070_v23 }
 0x33f   : > { %7086 = vrcp.f32 %v2825_v11  ;;  %v2578_v0 = vpop.f32.mrf.mxu3  ;;  %v7085_v44 = vpop.eup %7084 }
 0x340   : > { %v2579_v34 = vadd.f32 %v2578_v0, %v2530_v45  ;;  %3857 = vmatmul.bf16.gmra.mxu2 %v8135_v33  ;;  %7088 = vpow2.f32 %v2752_v9 }
 0x341   : > { %v2436_v41 = vpop.f32.mrf.mxu0 }
 0x342   : > { %v2641_v60 = vsub.f32 0.0, %v2579_v34  ;;  %v2437_v1 = vadd.f32 %v2436_v41, %v8121_v17 }
 0x343   : > { %v2485_v52 = vpop.f32.mrf.mxu1  ;;  %v2532_v10 = vpop.f32.mrf.mxu2 }
 0x344   : > { %v2760_v42 = vmul.f32 1.442695, %v2641_v60  ;;  %v2533_v20 = vadd.f32 %v2532_v10, %v2484_v35  ;;  %v2486_v36 = vadd.f32 %v2485_v52, %v2437_v1  ;;  %v6495_v1 = vld [vmem:[#allocation6 + $0x2f4] sm:$0xf0] }
 0x345   : > { %v7087_v50 = vpop.eup %7086 }
 0x346   : > { %7090 = vpow2.f32 %v2760_v42  ;;  %v8187_v48 = vpack.c.bf16 %v7087_v50, %v7085_v44  ;;  %v7089_v7 = vpop.eup %7088  ;;  %v6128_v50 = vld [vmem:[#allocation6 + $0x2e8] sm:$0xf] }
 0x347   : > { %v2581_v57 = vpop.f32.mrf.mxu3  ;;  %v2829_v32 = vadd.f32 1.0, %v7089_v7 }
 0x348   : > { %v2582_v19 = vadd.f32 %v2581_v57, %v2533_v20  ;;  %3896 = vmatmul.bf16.gmra.mxu3 %v8187_v48  ;;  %v6129_v57 = vor.u32 %v6495_v1, %v6128_v50 }
 0x349   : > { %v3725_v8 = vpop.f32.mrf.mxu0  ;;  %7092 = vrcp.f32 %v2829_v32  ;;  %v5873_v32 = vor.u32 %v6431_v62, %v5872_v15 }
 0x34a   : > { %v2645_v28 = vsub.f32 0.0, %v2582_v19  ;;  %v3726_v37 = vadd.f32 %v3725_v8, %v8190_v22  ;;  %4206 = vmatpush.bf16.msrb.mxu2 %v6129_v57 }
 0x34b   : > { %v3774_v17 = vpop.f32.mrf.mxu1  ;;  %v2534_v49 = vpop.f32.mrf.mxu2  ;;  %4108 = vmatpush.bf16.msrb.mxu0 %v5873_v32 }
 0x34c   : > { %v7091_v45 = vpop.eup %7090  ;;  %v2535_v11 = vadd.f32 %v2534_v49, %v2486_v36  ;;  %v2768_v54 = vmul.f32 1.442695, %v2645_v28  ;;  %v3775_v0 = vadd.f32 %v3774_v17, %v3726_v37  ;;  %3920 = vmatmul.bf16.vlgmr.msra.gmra.mxu0 %v7938_v46  ;;  %v6527_v36 = vld [vmem:[#allocation6 + $0x3f4] sm:$0xf0] }
 0x34d   : > { %v2833_v9 = vadd.f32 1.0, %v7091_v45  ;;  %v6257_v37 = vor.u32 %v6527_v36, %v6256_v59 }
 0x34e   : > { %3969 = vmatmul.bf16.vlgmr.msra.gmra.mxu1 %v8006_v56 }
 0x34f   : > { %7094 = vrcp.f32 %v2833_v9  ;;  %v2583_v4 = vpop.f32.mrf.mxu3  ;;  %v7093_v52 = vpop.eup %7092  ;;  %4255 = vmatpush.bf16.msrb.mxu3 %v6257_v37  ;;  %v6112_v37 = vld [vmem:[#allocation6 + $0x2c8] sm:$0xf] }
 0x350   : > { %v2584_v47 = vadd.f32 %v2583_v4, %v2535_v11  ;;  %4018 = vmatmul.bf16.vlgmr.msra.gmra.mxu2 %v8078_v39  ;;  %7096 = vpow2.f32 %v2768_v54  ;;  %v6000_v4 = vld [vmem:[#allocation6 + $0x1e8] sm:$0xf] }
 0x351   : > { %v3727_v26 = vpop.f32.mrf.mxu0 }
 0x352   : > { %v2649_v34 = vsub.f32 0.0, %v2584_v47  ;;  %v3728_v35 = vadd.f32 %v3727_v26, %v8190_v22  ;;  %v6463_v47 = vld [vmem:[#allocation6 + $0x1f4] sm:$0xf0] }
 0x353   : > { %v3776_v60 = vpop.f32.mrf.mxu1  ;;  %v3823_v41 = vpop.f32.mrf.mxu2 }
 0x354   : > { %v2776_v10 = vmul.f32 1.442695, %v2649_v34  ;;  %v8198_v44 = vadd.f32 %v3823_v41, %v3775_v0  ;;  %v3777_v20 = vadd.f32 %v3776_v60, %v3728_v35  ;;  %v6001_v34 = vor.u32 %v6463_v47, %v6000_v4  ;;  %v6523_v4 = vld [vmem:[#allocation6 + $0x3d4] sm:$0xf0] }
 0x355   : > { %v7095_v42 = vpop.eup %7094 }
 0x356   : > { %7098 = vpow2.f32 %v2776_v10  ;;  %v8200_v7 = vpack.c.bf16 %v7095_v42, %v7093_v52  ;;  %v7097_v19 = vpop.eup %7096  ;;  %4157 = vmatpush.bf16.msrb.mxu1 %v6001_v34 }
 0x357   : > { %v2837_v28 = vadd.f32 1.0, %v7097_v19 }
 0x358   : > { %8872 = vst [vmem:[#allocation14_spill] sm:$0xff] %v8200_v7  ;;  %3901 = vmatmul.bf16.gmra.mxu3 %v8200_v7 }
 0x359   : > { %v3730_v8 = vpop.f32.mrf.mxu0  ;;  %7100 = vrcp.f32 %v2837_v28 }
 0x35a   : > { %v3731_v17 = vadd.f32 %v3730_v8, %v8190_v22 }
 0x35b   : > { %v3779_v49 = vpop.f32.mrf.mxu1  ;;  %v3825_v45 = vpop.f32.mrf.mxu2 }
 0x35c   : > { %v7099_v11 = vpop.eup %7098  ;;  %v8204_v9 = vadd.f32 %v3825_v45, %v3777_v20  ;;  %v3780_v0 = vadd.f32 %v3779_v49, %v3731_v17  ;;  %3925 = vmatmul.bf16.gmra.mxu0 %v7947_v3  ;;  %v6491_v17 = vld [vmem:[#allocation6 + $0x2d4] sm:$0xf0]  ;;  %v5856_v49 = vld [vmem:[#allocation6 + $0xc8] sm:$0xf] }
 0x35d   : > { %v2841_v54 = vadd.f32 1.0, %v7099_v11  ;;  %v6113_v11 = vor.u32 %v6491_v17, %v6112_v37  ;;  %v6096_v37 = vld [vmem:[#allocation6 + $0x2a8] sm:$0xf]  ;;  %v6487_v17 = vld [vmem:[#allocation6 + $0x2b4] sm:$0xf0] }
 0x35e   : > { %3974 = vmatmul.bf16.gmra.mxu1 %v8014_v55 }
 0x35f   : > { %7102 = vrcp.f32 %v2841_v54  ;;  %v7101_v52 = vpop.eup %7100  ;;  %v6427_v54 = vld [vmem:[#allocation6 + $0xd4] sm:$0xf0]  ;;  %4207 = vmatpush.bf16.msrb.mxu2 %v6113_v11 }
 0x360   : > { %4023 = vmatmul.bf16.gmra.mxu2 %v8086_v51  ;;  %v5857_v34 = vor.u32 %v6427_v54, %v5856_v49  ;;  %v5840_v49 = vld [vmem:[#allocation6 + $0xa8] sm:$0xf]  ;;  %v6097_v54 = vor.u32 %v6487_v17, %v6096_v37 }
 0x361   : > { %v3732_v26 = vpop.f32.mrf.mxu0 }
 0x362   : > { %v3733_v35 = vadd.f32 %v3732_v26, %v8190_v22  ;;  %4109 = vmatpush.bf16.msrb.mxu0 %v5857_v34 }
 0x363   : > { %v3781_v60 = vpop.f32.mrf.mxu1  ;;  %v3828_v41 = vpop.f32.mrf.mxu2  ;;  %4208 = vmatpush.bf16.msrb.mxu2 %v6097_v54  ;;  %v6483_v54 = vld [vmem:[#allocation6 + $0x294] sm:$0xf0] }
 0x364   : > { %v8210_v10 = vadd.f32 %v3828_v41, %v3780_v0  ;;  %v3782_v20 = vadd.f32 %v3781_v60, %v3733_v35  ;;  %v6240_v0 = vld [vmem:[#allocation6 + $0x3c8] sm:$0xf]  ;;  %v6459_v60 = vld [vmem:[#allocation6 + $0x1d4] sm:$0xf0] }
 0x365   : > { %v7103_v42 = vpop.eup %7102  ;;  %v6241_v26 = vor.u32 %v6523_v4, %v6240_v0  ;;  %v5984_v35 = vld [vmem:[#allocation6 + $0x1c8] sm:$0xf]  ;;  %v6423_v0 = vld [vmem:[#allocation6 + $0xb4] sm:$0xf0] }
 0x366   : > { %v8212_v50 = vpack.c.bf16 %v7103_v42, %v7101_v52  ;;  %v5985_v41 = vor.u32 %v6459_v60, %v5984_v35  ;;  %v6224_v4 = vld [vmem:[#allocation6 + $0x3a8] sm:$0xf]  ;;  %v5841_v35 = vor.u32 %v6423_v0, %v5840_v49 }
 0x367   : > { %4256 = vmatpush.bf16.msrb.mxu3 %v6241_v26  ;;  %v5824_v0 = vld [vmem:[#allocation6 + $0x88] sm:$0xf] }
 0x368   : > { %3906 = vmatmul.bf16.gmra.mxu3 %v8212_v50  ;;  %4158 = vmatpush.bf16.msrb.mxu1 %v5985_v41  ;;  %v5968_v41 = vld [vmem:[#allocation6 + $0x1a8] sm:$0xf] }
 0x369   : > { %v3735_v1 = vpop.f32.mrf.mxu0  ;;  %4110 = vmatpush.bf16.msrb.mxu0 %v5841_v35  ;;  %v6419_v35 = vld [vmem:[#allocation6 + $0x94] sm:$0xf0] }
 0x36a   : > { %v3736_v57 = vadd.f32 %v3735_v1, %v8190_v22 }
 0x36b   : > { %v3784_v19 = vpop.f32.mrf.mxu1  ;;  %v3830_v15 = vpop.f32.mrf.mxu2 }
 0x36c   : > { %v8216_v62 = vadd.f32 %v3830_v15, %v3782_v20  ;;  %v3785_v59 = vadd.f32 %v3784_v19, %v3736_v57  ;;  %3930 = vmatmul.bf16.gmra.mxu0 %v7955_v18 }
 0x36e   : > { %3979 = vmatmul.bf16.gmra.mxu1 %v8022_v14 }
 0x370   : > { %4028 = vmatmul.bf16.gmra.mxu2 %v8094_v43 }
 0x371   : > { %v3737_v32 = vpop.f32.mrf.mxu0 }
 0x372   : > { %v3738_v36 = vadd.f32 %v3737_v32, %v8190_v22 }
 0x373   : > { %v3786_v28 = vpop.f32.mrf.mxu1  ;;  %v3833_v8 = vpop.f32.mrf.mxu2 }
 0x374   : > { %v8222_v45 = vadd.f32 %v3833_v8, %v3785_v59  ;;  %v3787_v47 = vadd.f32 %v3786_v28, %v3738_v36 }
 0x378   : > { %4067 = vmatmul.bf16.vlgmr.msra.gmra.mxu3 %v8142_v29 }
 0x379   : > { %v3740_v52 = vpop.f32.mrf.mxu0 }
 0x37a   : > { %v3741_v42 = vadd.f32 %v3740_v52, %v8190_v22  ;;  %v6455_v52 = vld [vmem:[#allocation6 + $0x1b4] sm:$0xf0] }
 0x37b   : > { %v3789_v20 = vpop.f32.mrf.mxu1  ;;  %v3872_v1 = vpop.f32.mrf.mxu3 }
 0x37c   : > { %v8227_v57 = vadd.f32 %v3872_v1, %v8198_v44  ;;  %v3835_v19 = vpop.f32.mrf.mxu2  ;;  %v3790_v15 = vadd.f32 %v3789_v20, %v3741_v42  ;;  %3935 = vmatmul.bf16.gmra.mxu0 %v7963_v31  ;;  %v5969_v42 = vor.u32 %v6455_v52, %v5968_v41 }
 0x37d   : > { %v8230_v59 = vadd.f32 %v3835_v19, %v3787_v47  ;;  %v6519_v47 = vld [vmem:[#allocation6 + $0x3b4] sm:$0xf0] }
 0x37e   : > { %3984 = vmatmul.bf16.gmra.mxu1 %v8030_v25  ;;  %v6225_v60 = vor.u32 %v6519_v47, %v6224_v4 }
 0x37f   : > { %4159 = vmatpush.bf16.msrb.mxu1 %v5969_v42  ;;  %v5825_v42 = vor.u32 %v6419_v35, %v5824_v0  ;;  %v6447_v35 = vld [vmem:[#allocation6 + $0x174] sm:$0xf0] }
 0x380   : > { %4033 = vmatmul.bf16.gmra.mxu2 %v8102_v53  ;;  %4257 = vmatpush.bf16.msrb.mxu3 %v6225_v60  ;;  %v6515_v60 = vld [vmem:[#allocation6 + $0x394] sm:$0xf0] }
 0x381   : > { %v3742_v32 = vpop.f32.mrf.mxu0  ;;  %4111 = vmatpush.bf16.msrb.mxu0 %v5825_v42 }
 0x382   : > { %v3743_v36 = vadd.f32 %v3742_v32, %v8190_v22 }
 0x383   : > { %v3791_v28 = vpop.f32.mrf.mxu1  ;;  %v3874_v8 = vpop.f32.mrf.mxu3 }
 0x384   : > { %v8236_v44 = vadd.f32 %v3874_v8, %v8204_v9  ;;  %v3838_v11 = vpop.f32.mrf.mxu2  ;;  %v3792_v34 = vadd.f32 %v3791_v28, %v3743_v36 }
 0x385   : > { %v8238_v26 = vadd.f32 %v3838_v11, %v3790_v15  ;;  %v6080_v11 = vld [vmem:[#allocation6 + $0x288] sm:$0xf] }
 0x386   : > { %v6081_v47 = vor.u32 %v6483_v54, %v6080_v11  ;;  %v6415_v11 = vld [vmem:[#allocation6 + $0x74] sm:$0xf0]  ;;  %v5936_v54 = vld [vmem:[#allocation6 + $0x168] sm:$0xf] }
 0x388   : > { %4072 = vmatmul.bf16.gmra.mxu3 %v8150_v27  ;;  %4209 = vmatpush.bf16.msrb.mxu2 %v6081_v47 }
 0x389   : > { %v3745_v9 = vpop.f32.mrf.mxu0 }
 0x38a   : > { %v3746_v20 = vadd.f32 %v3745_v9, %v8190_v22 }
 0x38b   : > { %v3794_v1 = vpop.f32.mrf.mxu1  ;;  %v3877_v19 = vpop.f32.mrf.mxu3 }
 0x38c   : > { %v8243_v32 = vadd.f32 %v3877_v19, %v8210_v10  ;;  %v3840_v15 = vpop.f32.mrf.mxu2  ;;  %v3795_v36 = vadd.f32 %v3794_v1, %v3746_v20  ;;  %3940 = vmatmul.bf16.gmra.mxu0 %v8868_v6  ;;  %v5952_v20 = vld [vmem:[#allocation6 + $0x188] sm:$0xf]  ;;  %v6451_v1 = vld [vmem:[#allocation6 + $0x194] sm:$0xf0] }
 0x38d   : > { %v8246_v28 = vadd.f32 %v3840_v15, %v3792_v34  ;;  %v6208_v34 = vld [vmem:[#allocation6 + $0x388] sm:$0xf]  ;;  %v5953_v19 = vor.u32 %v6451_v1, %v5952_v20  ;;  %v6443_v20 = vld [vmem:[#allocation6 + $0x154] sm:$0xf0] }
 0x38e   : > { %3989 = vmatmul.bf16.gmra.mxu1 %v8038_v63  ;;  %v6209_v9 = vor.u32 %v6515_v60, %v6208_v34  ;;  %v5937_v34 = vor.u32 %v6447_v35, %v5936_v54  ;;  %v6411_v60 = vld [vmem:[#allocation6 + $0x54] sm:$0xf0] }
 0x38f   : > { %4160 = vmatpush.bf16.msrb.mxu1 %v5953_v19  ;;  %v6064_v19 = vld [vmem:[#allocation6 + $0x268] sm:$0xf] }
 0x390   : > { %4038 = vmatmul.bf16.gmra.mxu2 %v8110_v58  ;;  %4258 = vmatpush.bf16.msrb.mxu3 %v6209_v9  ;;  %v5920_v9 = vld [vmem:[#allocation6 + $0x148] sm:$0xf] }
 0x391   : > { %v3747_v8 = vpop.f32.mrf.mxu0 }
 0x392   : > { %v3748_v37 = vadd.f32 %v3747_v8, %v8190_v22 }
 0x393   : > { %v3796_v17 = vpop.f32.mrf.mxu1  ;;  %v3879_v49 = vpop.f32.mrf.mxu3  ;;  %4161 = vmatpush.bf16.msrb.mxu1 %v5937_v34  ;;  %v5776_v34 = vld [vmem:[#allocation6 + $0x28] sm:$0xf] }
 0x394   : > { %v8252_v10 = vadd.f32 %v3879_v49, %v8216_v62  ;;  %v3843_v4 = vpop.f32.mrf.mxu2  ;;  %v3797_v41 = vadd.f32 %v3796_v17, %v3748_v37  ;;  %v5808_v17 = vld [vmem:[#allocation6 + $0x68] sm:$0xf] }
 0x395   : > { %v8254_v52 = vadd.f32 %v3843_v4, %v3795_v36  ;;  %v5809_v47 = vor.u32 %v6415_v11, %v5808_v17  ;;  %v6192_v17 = vld [vmem:[#allocation6 + $0x368] sm:$0xf]  ;;  %v6511_v11 = vld [vmem:[#allocation6 + $0x374] sm:$0xf0] }
 0x396   : > { %v6193_v35 = vor.u32 %v6511_v11, %v6192_v17  ;;  %v5888_v17 = vld [vmem:[#allocation6 + $0x108] sm:$0xf]  ;;  %v6471_v11 = vld [vmem:[#allocation6 + $0x234] sm:$0xf0] }
 0x397   : > { %4112 = vmatpush.bf16.msrb.mxu0 %v5809_v47 }
 0x398   : > { %4077 = vmatmul.bf16.gmra.mxu3 %v8158_v21 }
 0x399   : > { %v3750_v62 = vpop.f32.mrf.mxu0  ;;  %4259 = vmatpush.bf16.msrb.mxu3 %v6193_v35 }
 0x39a   : > { %v3751_v15 = vadd.f32 %v3750_v62, %v8190_v22  ;;  %v6479_v62 = vld [vmem:[#allocation6 + $0x274] sm:$0xf0] }
 0x39b   : > { %v3799_v8 = vpop.f32.mrf.mxu1  ;;  %v3882_v49 = vpop.f32.mrf.mxu3 }
 0x39c   : > { %v8259_v37 = vadd.f32 %v3882_v49, %v8222_v45  ;;  %v3845_v36 = vpop.f32.mrf.mxu2  ;;  %v3800_v0 = vadd.f32 %v3799_v8, %v3751_v15  ;;  %3945 = vmatmul.bf16.gmra.mxu0 %v8869_v40  ;;  %v5792_v45 = vld [vmem:[#allocation6 + $0x48] sm:$0xf]  ;;  %v5921_v15 = vor.u32 %v6443_v20, %v5920_v9  ;;  %v6439_v20 = vld [vmem:[#allocation6 + $0x134] sm:$0xf0] }
 0x39d   : > { %v8262_v4 = vadd.f32 %v3845_v36, %v3797_v41  ;;  %v5793_v42 = vor.u32 %v6411_v60, %v5792_v45  ;;  %v6065_v36 = vor.u32 %v6479_v62, %v6064_v19  ;;  %v6407_v45 = vld [vmem:[#allocation6 + $0x34] sm:$0xf0]  ;;  %v5904_v60 = vld [vmem:[#allocation6 + $0x128] sm:$0xf] }
 0x39e   : > { %3994 = vmatmul.bf16.gmra.mxu1 %v8046_v16  ;;  %v5777_v9 = vor.u32 %v6407_v45, %v5776_v34  ;;  %v6048_v19 = vld [vmem:[#allocation6 + $0x248] sm:$0xf]  ;;  %v6475_v62 = vld [vmem:[#allocation6 + $0x254] sm:$0xf0] }
 0x39f   : > { %4113 = vmatpush.bf16.msrb.mxu0 %v5793_v42  ;;  %4162 = vmatpush.bf16.msrb.mxu1 %v5921_v15  ;;  %v6049_v42 = vor.u32 %v6475_v62, %v6048_v19  ;;  %v6403_v15 = vld [vmem:[#allocation6 + $0x14] sm:$0xf0]  ;;  %v6016_v19 = vld [vmem:[#allocation6 + $0x208] sm:$0xf] }
 0x3a0   : > { %4043 = vmatmul.bf16.gmra.mxu2 %v8118_v24  ;;  %v6467_v62 = vld [vmem:[#allocation6 + $0x214] sm:$0xf0] }
 0x3a1   : > { %v3752_v1 = vpop.f32.mrf.mxu0  ;;  %4210 = vmatpush.bf16.msrb.mxu2 %v6065_v36  ;;  %v6032_v36 = vld [vmem:[#allocation6 + $0x228] sm:$0xf] }
 0x3a2   : > { %v3753_v41 = vadd.f32 %v3752_v1, %v8190_v22  ;;  %v5905_v1 = vor.u32 %v6439_v20, %v5904_v60  ;;  %v6033_v45 = vor.u32 %v6471_v11, %v6032_v36 }
 0x3a3   : > { %v3801_v8 = vpop.f32.mrf.mxu1  ;;  %v3884_v49 = vpop.f32.mrf.mxu3  ;;  %4114 = vmatpush.bf16.msrb.mxu0 %v5777_v9 }
 0x3a4   : > { %v8268_v54 = vadd.f32 %v3884_v49, %v8230_v59  ;;  %v3848_v47 = vpop.f32.mrf.mxu2  ;;  %v3802_v24 = vadd.f32 %v3801_v8, %v3753_v41  ;;  %4163 = vmatpush.bf16.msrb.mxu1 %v5905_v1  ;;  %v5760_v59 = vld [vmem:[#allocation6 + $0x8] sm:$0xf]  ;;  %v6435_v41 = vld [vmem:[#allocation6 + $0x114] sm:$0xf0] }
 0x3a5   : > { %v8270_v16 = vadd.f32 %v3848_v47, %v3800_v0  ;;  %4211 = vmatpush.bf16.msrb.mxu2 %v6049_v42  ;;  %v5761_v49 = vor.u32 %v6403_v15, %v5760_v59  ;;  %v5889_v8 = vor.u32 %v6435_v41, %v5888_v17  ;;  %v6017_v42 = vor.u32 %v6467_v62, %v6016_v19  ;;  %v6176_v17 = vld [vmem:[#allocation6 + $0x348] sm:$0xf]  ;;  %v6507_v41 = vld [vmem:[#allocation6 + $0x354] sm:$0xf0] }
 0x3a7   : > { %4115 = vmatpush.bf16.msrb.mxu0 %v5761_v49 }
 0x3a8   : > { %4082 = vmatmul.bf16.gmra.mxu3 %v8166_v12  ;;  %4164 = vmatpush.bf16.msrb.mxu1 %v5889_v8  ;;  %v6177_v8 = vor.u32 %v6507_v41, %v6176_v17 }
 0x3a9   : > { %v3755_v0 = vpop.f32.mrf.mxu0  ;;  %4212 = vmatpush.bf16.msrb.mxu2 %v6033_v45 }
 0x3aa   : > { %v3756_v47 = vadd.f32 %v3755_v0, %v8190_v22  ;;  %4260 = vmatpush.bf16.msrb.mxu3 %v6177_v8 }
 0x3ab   : > { %v3804_v35 = vpop.f32.mrf.mxu1  ;;  %v3887_v34 = vpop.f32.mrf.mxu3 }
 0x3ac   : > { %v8275_v60 = vadd.f32 %v3887_v34, %v8238_v26  ;;  %v3850_v9 = vpop.f32.mrf.mxu2  ;;  %v3805_v20 = vadd.f32 %v3804_v35, %v3756_v47  ;;  %3950 = vmatmul.bf16.gmra.mxu0 %v8870_v61 }
 0x3ad   : > { %v8278_v1 = vadd.f32 %v3850_v9, %v3802_v24  ;;  %4213 = vmatpush.bf16.msrb.mxu2 %v6017_v42 }
 0x3ae   : > { %3999 = vmatmul.bf16.gmra.mxu1 %v8062_v2 }
 0x3b0   : > { %4048 = vmatmul.bf16.gmra.mxu2 %v8128_v5 }
 0x3b1   : > { %v3757_v59 = vpop.f32.mrf.mxu0 }
 0x3b2   : > { %v3758_v26 = vadd.f32 %v3757_v59, %v8190_v22 }
 0x3b3   : > { %v3806_v15 = vpop.f32.mrf.mxu1  ;;  %v3889_v49 = vpop.f32.mrf.mxu3 }
 0x3b4   : > { %v8284_v0 = vadd.f32 %v3889_v49, %v8246_v28  ;;  %v3853_v24 = vpop.f32.mrf.mxu2  ;;  %v3807_v36 = vadd.f32 %v3806_v15, %v3758_v26  ;;  %v6160_v15 = vld [vmem:[#allocation6 + $0x328] sm:$0xf]  ;;  %v6503_v49 = vld [vmem:[#allocation6 + $0x334] sm:$0xf0] }
 0x3b5   : > { %v3854_v11 = vadd.f32 %v3853_v24, %v3805_v20  ;;  %v6161_v41 = vor.u32 %v6503_v49, %v6160_v15  ;;  %v6499_v15 = vld [vmem:[#allocation6 + $0x314] sm:$0xf0] }
 0x3b7   : > { %4261 = vmatpush.bf16.msrb.mxu3 %v6161_v41 }
 0x3b8   : > { %4087 = vmatmul.bf16.gmra.mxu3 %v8174_v30 }
 0x3b9   : > { %v3760_v47 = vpop.f32.mrf.mxu0 }
 0x3ba   : > { %v3761_v35 = vadd.f32 %v3760_v47, %v8190_v22 }
 0x3bb   : > { %v3809_v34 = vpop.f32.mrf.mxu1  ;;  %v3892_v45 = vpop.f32.mrf.mxu3 }
 0x3bc   : > { %v8289_v9 = vadd.f32 %v3892_v45, %v8254_v52  ;;  %v3855_v19 = vpop.f32.mrf.mxu2  ;;  %v3810_v62 = vadd.f32 %v3809_v34, %v3761_v35  ;;  %3955 = vmatmul.bf16.gmra.mxu0 %v8871_v38 }
 0x3bd   : > { %v3856_v28 = vadd.f32 %v3855_v19, %v3807_v36  ;;  %v8301_v36 = vperm.slane %v8184_v13, 1 }
 0x3be   : > { %4004 = vmatmul.bf16.gmra.mxu1 %v8070_v23 }
 0x3c0   : > { %4053 = vmatmul.bf16.gmra.mxu2 %v8135_v33 }
 0x3c1   : > { %v3762_v20 = vpop.f32.mrf.mxu0 }
 0x3c2   : > { %v3763_v42 = vadd.f32 %v3762_v20, %v8190_v22 }
 0x3c3   : > { %v3811_v59 = vpop.f32.mrf.mxu1  ;;  %v3894_v26 = vpop.f32.mrf.mxu3 }
 0x3c4   : > { %v8296_v17 = vadd.f32 %v3894_v26, %v8262_v4  ;;  %v3858_v52 = vpop.f32.mrf.mxu2  ;;  %v3812_v24 = vadd.f32 %v3811_v59, %v3763_v42  ;;  %v6144_v26 = vld [vmem:[#allocation6 + $0x308] sm:$0xf] }
 0x3c5   : > { %v8298_v8 = vadd.f32 %v3858_v52, %v3810_v62  ;;  %v6145_v52 = vor.u32 %v6499_v15, %v6144_v26  ;;  %v6493_v26 = vld [vmem:[#allocation6 + $0x2ec] sm:$0xf]  ;;  %v6130_v15 = vld [vmem:[#allocation6 + $0x2f8] sm:$0xf0] }
 0x3c7   : > { %4262 = vmatpush.bf16.msrb.mxu3 %v6145_v52 }
 0x3c8   : > { %4092 = vmatmul.bf16.gmra.mxu3 %v8187_v48 }
 0x3c9   : > { %v3921_v47 = vpop.f32.mrf.mxu0 }
 0x3ca   : > { %v3922_v22 = vadd.f32 %v3921_v47, %v8301_v36 }
 0x3cb   : > { %v3970_v35 = vpop.f32.mrf.mxu1  ;;  %v3897_v34 = vpop.f32.mrf.mxu3 }
 0x3cc   : > { %v8306_v45 = vadd.f32 %v3897_v34, %v8270_v16  ;;  %v3860_v4 = vpop.f32.mrf.mxu2  ;;  %v3971_v19 = vadd.f32 %v3970_v35, %v3922_v22  ;;  %4116 = vmatmul.bf16.vlgmr.msrb.gmra.mxu0 %v7938_v46 }
 0x3cd   : > { %v8309_v62 = vadd.f32 %v3860_v4, %v3812_v24 }
 0x3ce   : > { %4165 = vmatmul.bf16.vlgmr.msrb.gmra.mxu1 %v8006_v56 }
 0x3d0   : > { %4214 = vmatmul.bf16.vlgmr.msrb.gmra.mxu2 %v8078_v39 }
 0x3d1   : > { %v3923_v13 = vpop.f32.mrf.mxu0 }
 0x3d2   : > { %v3924_v20 = vadd.f32 %v3923_v13, %v8301_v36 }
 0x3d3   : > { %v3972_v42 = vpop.f32.mrf.mxu1  ;;  %v3899_v59 = vpop.f32.mrf.mxu3 }
 0x3d4   : > { %v8315_v16 = vadd.f32 %v3899_v59, %v8278_v1  ;;  %v4019_v49 = vpop.f32.mrf.mxu2  ;;  %v3973_v41 = vadd.f32 %v3972_v42, %v3924_v20 }
 0x3d5   : > { %v8317_v47 = vadd.f32 %v4019_v49, %v3971_v19  ;;  %v6429_v49 = vld [vmem:[#allocation6 + $0xec] sm:$0xf] }
 0x3d8   : > { %4097 = vmatmul.bf16.gmra.mxu3 %v8200_v7  ;;  %v6002_v7 = vld [vmem:[#allocation6 + $0x1f8] sm:$0xf0] }
 0x3d9   : > { %v3926_v24 = vpop.f32.mrf.mxu0 }
 0x3da   : > { %v3927_v22 = vadd.f32 %v3926_v24, %v8301_v36  ;;  %v6133_v24 = vor.u32 %v6493_v26, %v6130_v15 }
 0x3db   : > { %v3975_v35 = vpop.f32.mrf.mxu1  ;;  %v3902_v34 = vpop.f32.mrf.mxu3 }
 0x3dc   : > { %v8321_v4 = vadd.f32 %v3902_v34, %v3854_v11  ;;  %v4021_v13 = vpop.f32.mrf.mxu2  ;;  %v3976_v39 = vadd.f32 %v3975_v35, %v3927_v22  ;;  %4121 = vmatmul.bf16.gmra.mxu0 %v7947_v3  ;;  %v5874_v22 = vld [vmem:[#allocation6 + $0xf8] sm:$0xf0]  ;;  %v6525_v35 = vld [vmem:[#allocation6 + $0x3ec] sm:$0xf]  ;;  %4402 = vmatpush.bf16.msra.mxu2 %v6133_v24 }
 0x3dd   : > { %v8324_v1 = vadd.f32 %v4021_v13, %v3973_v41  ;;  %v6258_v41 = vld [vmem:[#allocation6 + $0x3f8] sm:$0xf0]  ;;  %v6461_v3 = vld [vmem:[#allocation6 + $0x1ec] sm:$0xf] }
 0x3de   : > { %4170 = vmatmul.bf16.gmra.mxu1 %v8014_v55  ;;  %v5877_v55 = vor.u32 %v6429_v49, %v5874_v22  ;;  %v6114_v22 = vld [vmem:[#allocation6 + $0x2d8] sm:$0xf0] }
 0x3e0   : > { %4219 = vmatmul.bf16.gmra.mxu2 %v8086_v51  ;;  %v6261_v51 = vor.u32 %v6525_v35, %v6258_v41  ;;  %4304 = vmatpush.bf16.msra.mxu0 %v5877_v55  ;;  %v6425_v35 = vld [vmem:[#allocation6 + $0xcc] sm:$0xf] }
 0x3e1   : > { %v3928_v19 = vpop.f32.mrf.mxu0 }
 0x3e2   : > { %v3929_v20 = vadd.f32 %v3928_v19, %v8301_v36  ;;  %v6005_v19 = vor.u32 %v6461_v3, %v6002_v7  ;;  %4451 = vmatpush.bf16.msra.mxu3 %v6261_v51  ;;  %v4500_v3 = vsub.f32 0.0, %v8227_v57  ;;  %v6521_v57 = vld [vmem:[#allocation6 + $0x3cc] sm:$0xf] }
 0x3e3   : > { %v3977_v42 = vpop.f32.mrf.mxu1  ;;  %v3904_v59 = vpop.f32.mrf.mxu3 }
 0x3e4   : > { %v8329_v11 = vadd.f32 %v3904_v59, %v3856_v28  ;;  %v4024_v52 = vpop.f32.mrf.mxu2  ;;  %v3978_v34 = vadd.f32 %v3977_v42, %v3929_v20  ;;  %4353 = vmatpush.bf16.msra.mxu1 %v6005_v19  ;;  %v4564_v55 = vmul.f32 1.442695, %v4500_v3 }
 0x3e5   : > { %v8331_v13 = vadd.f32 %v4024_v52, %v3976_v39 }
 0x3e6   : > { %7104 = vpow2.f32 %v4564_v55 }
 0x3e8   : > { %4102 = vmatmul.bf16.gmra.mxu3 %v8212_v50 }
 0x3e9   : > { %v3931_v28 = vpop.f32.mrf.mxu0 }
 0x3ea   : > { %v3932_v59 = vadd.f32 %v3931_v28, %v8301_v36  ;;  %v5858_v28 = vld [vmem:[#allocation6 + $0xd8] sm:$0xf0] }
 0x3eb   : > { %v3980_v26 = vpop.f32.mrf.mxu1  ;;  %v3907_v15 = vpop.f32.mrf.mxu3 }
 0x3ec   : > { %v8336_v20 = vadd.f32 %v3907_v15, %v8298_v8  ;;  %v4026_v39 = vpop.f32.mrf.mxu2  ;;  %v3981_v42 = vadd.f32 %v3980_v26, %v3932_v59  ;;  %4126 = vmatmul.bf16.gmra.mxu0 %v7955_v18  ;;  %v6489_v8 = vld [vmem:[#allocation6 + $0x2cc] sm:$0xf]  ;;  %v6242_v59 = vld [vmem:[#allocation6 + $0x3d8] sm:$0xf0] }
 0x3ed   : > { %v8339_v49 = vadd.f32 %v4026_v39, %v3978_v34  ;;  %v6117_v19 = vor.u32 %v6489_v8, %v6114_v22  ;;  %v5861_v39 = vor.u32 %v6425_v35, %v5858_v28  ;;  %v6245_v3 = vor.u32 %v6521_v57, %v6242_v59 }
 0x3ee   : > { %4175 = vmatmul.bf16.gmra.mxu1 %v8022_v14 }
 0x3ef   : > { %4403 = vmatpush.bf16.msra.mxu2 %v6117_v19  ;;  %4305 = vmatpush.bf16.msra.mxu0 %v5861_v39 }
 0x3f0   : > { %4224 = vmatmul.bf16.gmra.mxu2 %v8094_v43  ;;  %v6457_v43 = vld [vmem:[#allocation6 + $0x1cc] sm:$0xf]  ;;  %4452 = vmatpush.bf16.msra.mxu3 %v6245_v3 }
 0x3f1   : > { %v3933_v51 = vpop.f32.mrf.mxu0  ;;  %v6485_v3 = vld [vmem:[#allocation6 + $0x2ac] sm:$0xf] }
 0x3f2   : > { %v3934_v7 = vadd.f32 %v3933_v51, %v8301_v36  ;;  %v5986_v51 = vld [vmem:[#allocation6 + $0x1d8] sm:$0xf0] }
 0x3f3   : > { %v3982_v52 = vpop.f32.mrf.mxu1  ;;  %v3909_v24 = vpop.f32.mrf.mxu3  ;;  %v5989_v14 = vor.u32 %v6457_v43, %v5986_v51  ;;  %v6098_v51 = vld [vmem:[#allocation6 + $0x2b8] sm:$0xf0] }
 0x3f4   : > { %v8346_v41 = vadd.f32 %v3909_v24, %v8309_v62  ;;  %v4029_v34 = vpop.f32.mrf.mxu2  ;;  %v3983_v26 = vadd.f32 %v3982_v52, %v3934_v7  ;;  %v4504_v24 = vsub.f32 0.0, %v8236_v44 }
 0x3f5   : > { %v8348_v15 = vadd.f32 %v4029_v34, %v3981_v42  ;;  %4354 = vmatpush.bf16.msra.mxu1 %v5989_v14  ;;  %v4508_v34 = vsub.f32 0.0, %v8243_v32  ;;  %v7105_v14 = vpop.eup %7104  ;;  %v6421_v32 = vld [vmem:[#allocation6 + $0xac] sm:$0xf] }
 0x3f6   : > { %v4572_v55 = vmul.f32 1.442695, %v4504_v24  ;;  %v4692_v28 = vadd.f32 1.0, %v7105_v14  ;;  %v5842_v24 = vld [vmem:[#allocation6 + $0xb8] sm:$0xf0] }
 0x3f7   : > { %v4580_v57 = vmul.f32 1.442695, %v4508_v34  ;;  %v5845_v34 = vor.u32 %v6421_v32, %v5842_v24 }
 0x3f8   : > { %4263 = vmatmul.bf16.vlgmr.msrb.gmra.mxu3 %v8142_v29 }
 0x3f9   : > { %v3936_v62 = vpop.f32.mrf.mxu0  ;;  %4306 = vmatpush.bf16.msra.mxu0 %v5845_v34 }
 0x3fa   : > { %v3937_v8 = vadd.f32 %v3936_v62, %v8301_v36 }
 0x3fb   : > { %v3985_v7 = vpop.f32.mrf.mxu1  ;;  %v4068_v42 = vpop.f32.mrf.mxu3 }
 0x3fc   : > { %v4069_v52 = vadd.f32 %v4068_v42, %v8317_v47  ;;  %v4031_v22 = vpop.f32.mrf.mxu2  ;;  %v3986_v35 = vadd.f32 %v3985_v7, %v3937_v8  ;;  %4131 = vmatmul.bf16.gmra.mxu0 %v7963_v31  ;;  %v6101_v7 = vor.u32 %v6485_v3, %v6098_v51  ;;  %v6517_v42 = vld [vmem:[#allocation6 + $0x3ac] sm:$0xf]  ;;  %v4820_v3 = vld [vmem:[%s8823_s7] sm:$0xf] }
 0x3fd   : > { %v8355_v43 = vadd.f32 %v4031_v22, %v3983_v26 }
 0x3fe   : > { %v4501_v19 = vsub.f32 0.0, %v4069_v52  ;;  %4180 = vmatmul.bf16.gmra.mxu1 %v8030_v25  ;;  %v6226_v52 = vld [vmem:[#allocation6 + $0x3b8] sm:$0xf0]  ;;  %4404 = vmatpush.bf16.msra.mxu2 %v6101_v7 }
 0x3ff   : > { %v6229_v14 = vor.u32 %v6517_v42, %v6226_v52  ;;  %v8377_v52 = vperm.slane %v4820_v3, 1 }
 0x400   : > { %v4566_v44 = vmul.f32 1.442695, %v4501_v19  ;;  %4229 = vmatmul.bf16.gmra.mxu2 %v8102_v53 }
 0x401   : > { %v3938_v47 = vpop.f32.mrf.mxu0  ;;  %4453 = vmatpush.bf16.msra.mxu3 %v6229_v14 }
 0x402   : > { %7106 = vpow2.f32 %v4566_v44  ;;  %v3939_v59 = vadd.f32 %v3938_v47, %v8301_v36  ;;  %v5970_v44 = vld [vmem:[#allocation6 + $0x1b8] sm:$0xf0] }
 0x403   : > { %7108 = vpow2.f32 %v4572_v55  ;;  %v3987_v39 = vpop.f32.mrf.mxu1  ;;  %v4070_v26 = vpop.f32.mrf.mxu3  ;;  %v6453_v55 = vld [vmem:[#allocation6 + $0x1ac] sm:$0xf] }
 0x404   : > { %v4071_v62 = vadd.f32 %v4070_v26, %v8324_v1  ;;  %v4034_v8 = vpop.f32.mrf.mxu2  ;;  %v3988_v22 = vadd.f32 %v3987_v39, %v3939_v59  ;;  %v5973_v53 = vor.u32 %v6453_v55, %v5970_v44  ;;  %7110 = vrcp.f32 %v4692_v28 }
 0x405   : > { %v8362_v19 = vadd.f32 %v4034_v8, %v3986_v35  ;;  %7112 = vpow2.f32 %v4580_v57  ;;  %v4512_v35 = vsub.f32 0.0, %v8252_v10  ;;  %v8374_v10 = vperm.slane %v4820_v3, 0 }
 0x406   : > { %v4505_v47 = vsub.f32 0.0, %v4071_v62  ;;  %4355 = vmatpush.bf16.msra.mxu1 %v5973_v53 }
 0x407   : > { %v4588_v7 = vmul.f32 1.442695, %v4512_v35 }
 0x408   : > { %v7107_v25 = vpop.eup %7106  ;;  %v4574_v1 = vmul.f32 1.442695, %v4505_v47  ;;  %4268 = vmatmul.bf16.gmra.mxu3 %v8150_v27 }
 0x409   : > { %v7109_v26 = vpop.eup %7108  ;;  %v4693_v59 = vadd.f32 1.0, %v7107_v25  ;;  %v3941_v39 = vpop.f32.mrf.mxu0 }
 0x40a   : > { %7114 = vpow2.f32 %v4574_v1  ;;  %v3942_v51 = vadd.f32 %v3941_v39, %v8301_v36  ;;  %v4696_v62 = vadd.f32 1.0, %v7109_v26  ;;  %v7111_v24 = vpop.eup %7110  ;;  %v4516_v1 = vsub.f32 0.0, %v8259_v37 }
 0x40b   : > { %7116 = vrcp.f32 %v4693_v59  ;;  %v3990_v32 = vpop.f32.mrf.mxu1  ;;  %v4073_v28 = vpop.f32.mrf.mxu3 }
 0x40c   : > { %v4074_v8 = vadd.f32 %v4073_v28, %v8331_v13  ;;  %v4036_v53 = vpop.f32.mrf.mxu2  ;;  %v3991_v57 = vadd.f32 %v3990_v32, %v3942_v51  ;;  %4136 = vmatmul.bf16.gmra.mxu0 %v8868_v6  ;;  %v7113_v34 = vpop.eup %7112  ;;  %7118 = vrcp.f32 %v4696_v62  ;;  %v6481_v51 = vld [vmem:[#allocation6 + $0x28c] sm:$0xf]  ;;  %v6082_v32 = vld [vmem:[#allocation6 + $0x298] sm:$0xf0] }
 0x40d   : > { %v8372_v25 = vadd.f32 %v4036_v53, %v3988_v22  ;;  %7120 = vpow2.f32 %v4588_v7  ;;  %v4830_v22 = vmul.f32 %v7111_v24, %v8374_v10  ;;  %v4700_v47 = vadd.f32 1.0, %v7113_v34  ;;  %v6417_v28 = vld [vmem:[#allocation6 + $0x8c] sm:$0xf]  ;;  %v5826_v7 = vld [vmem:[#allocation6 + $0x98] sm:$0xf0] }
 0x40e   : > { %v4509_v42 = vsub.f32 0.0, %v4074_v8  ;;  %4185 = vmatmul.bf16.gmra.mxu1 %v8038_v63  ;;  %v6085_v53 = vor.u32 %v6481_v51, %v6082_v32  ;;  %v6513_v24 = vld [vmem:[#allocation6 + $0x38c] sm:$0xf] }
 0x410   : > { %v7115_v14 = vpop.eup %7114  ;;  %v4582_v55 = vmul.f32 1.442695, %v4509_v42  ;;  %4234 = vmatmul.bf16.gmra.mxu2 %v8110_v58  ;;  %v6210_v42 = vld [vmem:[#allocation6 + $0x398] sm:$0xf0] }
 0x411   : > { %v7117_v13 = vpop.eup %7116  ;;  %v4697_v44 = vadd.f32 1.0, %v7115_v14  ;;  %v3943_v26 = vpop.f32.mrf.mxu0  ;;  %4405 = vmatpush.bf16.msra.mxu2 %v6085_v53  ;;  %v5810_v53 = vld [vmem:[#allocation6 + $0x78] sm:$0xf0] }
 0x412   : > { %7122 = vpow2.f32 %v4582_v55  ;;  %v4831_v35 = vmul.f32 %v7117_v13, %v8377_v52  ;;  %v3944_v59 = vadd.f32 %v3943_v26, %v8301_v36  ;;  %v5829_v55 = vor.u32 %v6417_v28, %v5826_v7  ;;  %v5954_v26 = vld [vmem:[#allocation6 + $0x198] sm:$0xf0]  ;;  %v7119_v58 = vpop.eup %7118 }
 0x413   : > { %7124 = vrcp.f32 %v4697_v44  ;;  %v3992_v39 = vpop.f32.mrf.mxu1  ;;  %v4075_v3 = vpop.f32.mrf.mxu3  ;;  %v6213_v13 = vor.u32 %v6513_v24, %v6210_v42  ;;  %v6449_v44 = vld [vmem:[#allocation6 + $0x18c] sm:$0xf] }
 0x414   : > { %v4076_v62 = vadd.f32 %v4075_v3, %v8339_v49  ;;  %v4039_v8 = vpop.f32.mrf.mxu2  ;;  %v8385_v37 = vadd.f32 %v4831_v35, %v4830_v22  ;;  %v3993_v34 = vadd.f32 %v3992_v39, %v3944_v59  ;;  %v5957_v6 = vor.u32 %v6449_v44, %v5954_v26  ;;  %v7121_v27 = vpop.eup %7120  ;;  %4307 = vmatpush.bf16.msra.mxu0 %v5829_v55  ;;  %v5938_v55 = vld [vmem:[#allocation6 + $0x178] sm:$0xf0]  ;;  %v8873_v44 = vld [vmem:[#allocation21_spill] sm:$0xff] }
 0x415   : > { %v8387_v14 = vadd.f32 %v4039_v8, %v3991_v57  ;;  %4454 = vmatpush.bf16.msra.mxu3 %v6213_v13  ;;  %v4596_v3 = vmul.f32 1.442695, %v4516_v1  ;;  %7126 = vrcp.f32 %v4700_v47  ;;  %v4520_v57 = vsub.f32 0.0, %v8268_v54  ;;  %v6413_v47 = vld [vmem:[#allocation6 + $0x6c] sm:$0xf] }
 0x416   : > { %v4513_v63 = vsub.f32 0.0, %v4076_v62  ;;  %4356 = vmatpush.bf16.msra.mxu1 %v5957_v6  ;;  %v4834_v39 = vmul.f32 %v7119_v58, %v8374_v10  ;;  %v4704_v28 = vadd.f32 1.0, %v7121_v27  ;;  %v6445_v54 = vld [vmem:[#allocation6 + $0x16c] sm:$0xf]  ;;  %v5813_v27 = vor.u32 %v6413_v47, %v5810_v53 }
 0x417   : > { %v4604_v24 = vmul.f32 1.442695, %v4520_v57  ;;  %v5941_v26 = vor.u32 %v6445_v54, %v5938_v55  ;;  %v5794_v57 = vld [vmem:[#allocation6 + $0x58] sm:$0xf0]  ;;  %v4524_v53 = vsub.f32 0.0, %v8275_v60 }
 0x418   : > { %v7123_v49 = vpop.eup %7122  ;;  %v4590_v51 = vmul.f32 1.442695, %v4513_v63  ;;  %4273 = vmatmul.bf16.gmra.mxu3 %v8158_v21  ;;  %4308 = vmatpush.bf16.msra.mxu0 %v5813_v27 }
 0x419   : > { %v7125_v22 = vpop.eup %7124  ;;  %v4701_v35 = vadd.f32 1.0, %v7123_v49  ;;  %v3946_v59 = vpop.f32.mrf.mxu0 }
 0x41a   : > { %7128 = vpow2.f32 %v4590_v51  ;;  %v4835_v32 = vmul.f32 %v7125_v22, %v8377_v52  ;;  %v3947_v62 = vadd.f32 %v3946_v59, %v8301_v36  ;;  %v8874_v51 = vld [vmem:[#allocation27_spill] sm:$0xff]  ;;  %4357 = vmatpush.bf16.msra.mxu1 %v5941_v26  ;;  %v6409_v22 = vld [vmem:[#allocation6 + $0x4c] sm:$0xf] }
 0x41b   : > { %7130 = vrcp.f32 %v4701_v35  ;;  %v3995_v1 = vpop.f32.mrf.mxu1  ;;  %v4078_v63 = vpop.f32.mrf.mxu3  ;;  %v5797_v59 = vor.u32 %v6409_v22, %v5794_v57  ;;  %v6194_v26 = vld [vmem:[#allocation6 + $0x378] sm:$0xf0]  ;;  %v6405_v57 = vld [vmem:[#allocation6 + $0x2c] sm:$0xf] }
 0x41c   : > { %7132 = vpow2.f32 %v4596_v3  ;;  %v4079_v6 = vadd.f32 %v4078_v63, %v8348_v15  ;;  %v4041_v8 = vpop.f32.mrf.mxu2  ;;  %v8395_v7 = vadd.f32 %v4835_v32, %v4834_v39  ;;  %v3996_v42 = vadd.f32 %v3995_v1, %v3947_v62  ;;  %4141 = vmatmul.bf16.gmra.mxu0 %v8869_v40  ;;  %v7127_v49 = vpop.eup %7126  ;;  %v6441_v39 = vld [vmem:[#allocation6 + $0x14c] sm:$0xf]  ;;  %v5922_v32 = vld [vmem:[#allocation6 + $0x158] sm:$0xf0] }
 0x41d   : > { %v8398_v58 = vadd.f32 %v4041_v8, %v3993_v34  ;;  %7134 = vrcp.f32 %v4704_v28  ;;  %v6477_v63 = vld [vmem:[#allocation6 + $0x26c] sm:$0xf]  ;;  %v5925_v8 = vor.u32 %v6441_v39, %v5922_v32  ;;  %v4838_v28 = vmul.f32 %v7127_v49, %v8374_v10  ;;  %4309 = vmatpush.bf16.msra.mxu0 %v5797_v59  ;;  %v5778_v49 = vld [vmem:[#allocation6 + $0x38] sm:$0xf0] }
 0x41e   : > { %v4517_v13 = vsub.f32 0.0, %v4079_v6  ;;  %4190 = vmatmul.bf16.gmra.mxu1 %v8873_v44  ;;  %7136 = vpow2.f32 %v4604_v24  ;;  %v6066_v6 = vld [vmem:[#allocation6 + $0x278] sm:$0xf0]  ;;  %v6437_v39 = vld [vmem:[#allocation6 + $0x12c] sm:$0xf] }
 0x41f   : > { %v6069_v55 = vor.u32 %v6477_v63, %v6066_v6  ;;  %4358 = vmatpush.bf16.msra.mxu1 %v5925_v8  ;;  %v5906_v63 = vld [vmem:[#allocation6 + $0x138] sm:$0xf0]  ;;  %v4612_v8 = vmul.f32 1.442695, %v4524_v53 }
 0x420   : > { %v7129_v15 = vpop.eup %7128  ;;  %v4598_v3 = vmul.f32 1.442695, %v4517_v13  ;;  %4239 = vmatmul.bf16.gmra.mxu2 %v8874_v51  ;;  %v6509_v13 = vld [vmem:[#allocation6 + $0x36c] sm:$0xf]  ;;  %v5909_v59 = vor.u32 %v6437_v39, %v5906_v63 }
 0x421   : > { %v7131_v35 = vpop.eup %7130  ;;  %v4705_v34 = vadd.f32 1.0, %v7129_v15  ;;  %v3948_v1 = vpop.f32.mrf.mxu0  ;;  %v6197_v22 = vor.u32 %v6509_v13, %v6194_v26  ;;  %4406 = vmatpush.bf16.msra.mxu2 %v6069_v55 }
 0x422   : > { %v7133_v62 = vpop.eup %7132  ;;  %7138 = vpow2.f32 %v4598_v3  ;;  %v4839_v47 = vmul.f32 %v7131_v35, %v8377_v52  ;;  %v3949_v54 = vadd.f32 %v3948_v1, %v8301_v36  ;;  %v5781_v1 = vor.u32 %v6405_v57, %v5778_v49  ;;  %v6469_v57 = vld [vmem:[#allocation6 + $0x22c] sm:$0xf]  ;;  %v6034_v49 = vld [vmem:[#allocation6 + $0x238] sm:$0xf0] }
 0x423   : > { %7140 = vrcp.f32 %v4705_v34  ;;  %v3997_v24 = vpop.f32.mrf.mxu1  ;;  %v4080_v27 = vpop.f32.mrf.mxu3  ;;  %v4708_v60 = vadd.f32 1.0, %v7133_v62  ;;  %4455 = vmatpush.bf16.msra.mxu3 %v6197_v22  ;;  %4359 = vmatpush.bf16.msra.mxu1 %v5909_v59  ;;  %v5762_v62 = vld [vmem:[#allocation6 + $0x18] sm:$0xf0] }
 0x424   : > { %v4081_v15 = vadd.f32 %v4080_v27, %v8355_v43  ;;  %v4044_v3 = vpop.f32.mrf.mxu2  ;;  %v8407_v35 = vadd.f32 %v4839_v47, %v4838_v28  ;;  %v3998_v34 = vadd.f32 %v3997_v24, %v3949_v54  ;;  %v7135_v6 = vpop.eup %7134  ;;  %v6473_v43 = vld [vmem:[#allocation6 + $0x24c] sm:$0xf]  ;;  %v6050_v27 = vld [vmem:[#allocation6 + $0x258] sm:$0xf0]  ;;  %4310 = vmatpush.bf16.msra.mxu0 %v5781_v1  ;;  %v4528_v54 = vsub.f32 0.0, %v8284_v0 }
 0x425   : > { %v8409_v32 = vadd.f32 %v4044_v3, %v3996_v42  ;;  %v7137_v13 = vpop.eup %7136  ;;  %v6053_v26 = vor.u32 %v6473_v43, %v6050_v27  ;;  %v6401_v42 = vld [vmem:[#allocation6 + $0xc] sm:$0xf]  ;;  %7142 = vrcp.f32 %v4708_v60  ;;  %v5890_v3 = vld [vmem:[#allocation6 + $0x118] sm:$0xf0]  ;;  %v6037_v0 = vor.u32 %v6469_v57, %v6034_v49 }
 0x426   : > { %v4521_v51 = vsub.f32 0.0, %v4081_v15  ;;  %v5765_v55 = vor.u32 %v6401_v42, %v5762_v62  ;;  %v6433_v15 = vld [vmem:[#allocation6 + $0x10c] sm:$0xf] }
 0x427   : > { %4407 = vmatpush.bf16.msra.mxu2 %v6053_v26  ;;  %v5893_v22 = vor.u32 %v6433_v15, %v5890_v3  ;;  %v4620_v26 = vmul.f32 1.442695, %v4528_v54  ;;  %v6465_v62 = vld [vmem:[#allocation6 + $0x20c] sm:$0xf] }
 0x428   : > { %v7139_v44 = vpop.eup %7138  ;;  %v4606_v28 = vmul.f32 1.442695, %v4521_v51  ;;  %4278 = vmatmul.bf16.gmra.mxu3 %v8166_v12  ;;  %v4842_v51 = vmul.f32 %v7135_v6, %v8374_v10  ;;  %4311 = vmatpush.bf16.msra.mxu0 %v5765_v55 }
 0x429   : > { %v7141_v47 = vpop.eup %7140  ;;  %v4709_v24 = vadd.f32 1.0, %v7139_v44  ;;  %v3951_v53 = vpop.f32.mrf.mxu0  ;;  %v4712_v44 = vadd.f32 1.0, %v7137_v13  ;;  %4360 = vmatpush.bf16.msra.mxu1 %v5893_v22 }
 0x42a   : > { %7144 = vpow2.f32 %v4606_v28  ;;  %v4843_v39 = vmul.f32 %v7141_v47, %v8377_v52  ;;  %v3952_v1 = vadd.f32 %v3951_v53, %v8301_v36  ;;  %v6018_v47 = vld [vmem:[#allocation6 + $0x218] sm:$0xf0] }
 0x42b   : > { %7146 = vrcp.f32 %v4709_v24  ;;  %v4000_v60 = vpop.f32.mrf.mxu1  ;;  %v4083_v63 = vpop.f32.mrf.mxu3  ;;  %4408 = vmatpush.bf16.msra.mxu2 %v6037_v0 }
 0x42c   : > { %7148 = vpow2.f32 %v4612_v8  ;;  %v4084_v59 = vadd.f32 %v4083_v63, %v8362_v19  ;;  %v4046_v43 = vpop.f32.mrf.mxu2  ;;  %v8417_v27 = vadd.f32 %v4843_v39, %v4842_v51  ;;  %v4001_v28 = vadd.f32 %v4000_v60, %v3952_v1  ;;  %4146 = vmatmul.bf16.gmra.mxu0 %v8870_v61  ;;  %v7143_v13 = vpop.eup %7142  ;;  %v6505_v51 = vld [vmem:[#allocation6 + $0x34c] sm:$0xf]  ;;  %v6178_v39 = vld [vmem:[#allocation6 + $0x358] sm:$0xf0] }
 0x42d   : > { %v8420_v6 = vadd.f32 %v4046_v43, %v3998_v34  ;;  %v6021_v8 = vor.u32 %v6465_v62, %v6018_v47  ;;  %7150 = vrcp.f32 %v4712_v44  ;;  %v4846_v3 = vmul.f32 %v7143_v13, %v8374_v10 }
 0x42e   : > { %v4525_v42 = vsub.f32 0.0, %v4084_v59  ;;  %4195 = vmatmul.bf16.gmra.mxu1 %v8062_v2  ;;  %7152 = vpow2.f32 %v4620_v26  ;;  %v4532_v1 = vsub.f32 0.0, %v8289_v9  ;;  %v6181_v0 = vor.u32 %v6505_v51, %v6178_v39 }
 0x42f   : > { %4409 = vmatpush.bf16.msra.mxu2 %v6021_v8 }
 0x430   : > { %v7145_v24 = vpop.eup %7144  ;;  %v4614_v19 = vmul.f32 1.442695, %v4525_v42  ;;  %4244 = vmatmul.bf16.gmra.mxu2 %v8128_v5  ;;  %4456 = vmatpush.bf16.msra.mxu3 %v6181_v0  ;;  %v4628_v8 = vmul.f32 1.442695, %v4532_v1 }
 0x431   : > { %v7147_v55 = vpop.eup %7146  ;;  %v4713_v54 = vadd.f32 1.0, %v7145_v24  ;;  %v3953_v34 = vpop.f32.mrf.mxu0 }
 0x432   : > { %v7149_v15 = vpop.eup %7148  ;;  %7154 = vpow2.f32 %v4614_v19  ;;  %v4847_v53 = vmul.f32 %v7147_v55, %v8377_v52  ;;  %v3954_v22 = vadd.f32 %v3953_v34, %v8301_v36 }
 0x433   : > { %7156 = vrcp.f32 %v4713_v54  ;;  %v4002_v57 = vpop.f32.mrf.mxu1  ;;  %v4085_v49 = vpop.f32.mrf.mxu3  ;;  %v4716_v59 = vadd.f32 1.0, %v7149_v15 }
 0x434   : > { %v4086_v60 = vadd.f32 %v4085_v49, %v8372_v25  ;;  %v4049_v63 = vpop.f32.mrf.mxu2  ;;  %v8429_v44 = vadd.f32 %v4847_v53, %v4846_v3  ;;  %v4003_v43 = vadd.f32 %v4002_v57, %v3954_v22  ;;  %v7151_v42 = vpop.eup %7150  ;;  %v4536_v25 = vsub.f32 0.0, %v8296_v17 }
 0x435   : > { %v8431_v26 = vadd.f32 %v4049_v63, %v4001_v28  ;;  %v7153_v47 = vpop.eup %7152  ;;  %7158 = vrcp.f32 %v4716_v59  ;;  %v4850_v54 = vmul.f32 %v7151_v42, %v8374_v10 }
 0x436   : > { %v4529_v62 = vsub.f32 0.0, %v4086_v60  ;;  %v4720_v53 = vadd.f32 1.0, %v7153_v47  ;;  %v4636_v17 = vmul.f32 1.442695, %v4536_v25  ;;  %v6162_v25 = vld [vmem:[#allocation6 + $0x338] sm:$0xf0] }
 0x438   : > { %v7155_v13 = vpop.eup %7154  ;;  %v4622_v24 = vmul.f32 1.442695, %v4529_v62  ;;  %4283 = vmatmul.bf16.gmra.mxu3 %v8174_v30 }
 0x439   : > { %v7157_v9 = vpop.eup %7156  ;;  %v4717_v19 = vadd.f32 1.0, %v7155_v13  ;;  %v3956_v55 = vpop.f32.mrf.mxu0 }
 0x43a   : > { %7160 = vpow2.f32 %v4622_v24  ;;  %v4851_v28 = vmul.f32 %v7157_v9, %v8377_v52  ;;  %v3957_v15 = vadd.f32 %v3956_v55, %v8301_v36  ;;  %v6501_v9 = vld [vmem:[#allocation6 + $0x32c] sm:$0xf] }
 0x43b   : > { %7162 = vrcp.f32 %v4717_v19  ;;  %v4005_v34 = vpop.f32.mrf.mxu1  ;;  %v4088_v3 = vpop.f32.mrf.mxu3  ;;  %v4540_v19 = vsub.f32 0.0, %v8306_v45 }
 0x43c   : > { %7164 = vpow2.f32 %v4628_v8  ;;  %v4089_v22 = vadd.f32 %v4088_v3, %v8387_v14  ;;  %v4051_v57 = vpop.f32.mrf.mxu2  ;;  %v8439_v49 = vadd.f32 %v4851_v28, %v4850_v54  ;;  %v4006_v51 = vadd.f32 %v4005_v34, %v3957_v15  ;;  %4151 = vmatmul.bf16.gmra.mxu0 %v8871_v38  ;;  %v7159_v60 = vpop.eup %7158 }
 0x43d   : > { %v8442_v39 = vadd.f32 %v4051_v57, %v4003_v43  ;;  %7166 = vrcp.f32 %v4720_v53  ;;  %v4854_v47 = vmul.f32 %v7159_v60, %v8374_v10  ;;  %v6165_v28 = vor.u32 %v6501_v9, %v6162_v25 }
 0x43e   : > { %v4533_v1 = vsub.f32 0.0, %v4089_v22  ;;  %4200 = vmatmul.bf16.gmra.mxu1 %v8070_v23  ;;  %7168 = vpow2.f32 %v4636_v17  ;;  %v8458_v17 = vld [vmem:[%s8822_s6] sm:$0xf] }
 0x43f   : > { %4457 = vmatpush.bf16.msra.mxu3 %v6165_v28  ;;  %v8461_v45 = vperm.slane %v8458_v17, 2 }
 0x440   : > { %v7161_v63 = vpop.eup %7160  ;;  %v4630_v0 = vmul.f32 1.442695, %v4533_v1  ;;  %4249 = vmatmul.bf16.gmra.mxu2 %v8135_v33  ;;  %v4644_v1 = vmul.f32 1.442695, %v4540_v19 }
 0x441   : > { %v7163_v59 = vpop.eup %7162  ;;  %v4721_v14 = vadd.f32 1.0, %v7161_v63  ;;  %v3958_v62 = vpop.f32.mrf.mxu0 }
 0x442   : > { %v7165_v42 = vpop.eup %7164  ;;  %7170 = vpow2.f32 %v4630_v0  ;;  %v4855_v43 = vmul.f32 %v7163_v59, %v8377_v52  ;;  %v3959_v13 = vadd.f32 %v3958_v62, %v8301_v36 }
 0x443   : > { %7172 = vrcp.f32 %v4721_v14  ;;  %v4007_v8 = vpop.f32.mrf.mxu1  ;;  %v4090_v24 = vpop.f32.mrf.mxu3  ;;  %v4724_v34 = vadd.f32 1.0, %v7165_v42 }
 0x444   : > { %v4091_v55 = vadd.f32 %v4090_v24, %v8398_v58  ;;  %v4054_v54 = vpop.f32.mrf.mxu2  ;;  %v8451_v15 = vadd.f32 %v4855_v43, %v4854_v47  ;;  %v4008_v3 = vadd.f32 %v4007_v8, %v3959_v13  ;;  %v7167_v22 = vpop.eup %7166 }
 0x445   : > { %v8453_v53 = vadd.f32 %v4054_v54, %v4006_v51  ;;  %v7169_v36 = vpop.eup %7168  ;;  %7174 = vrcp.f32 %v4724_v34  ;;  %v4544_v51 = vsub.f32 0.0, %v8315_v16  ;;  %v4858_v14 = vmul.f32 %v7167_v22, %v8374_v10  ;;  %v8875_v22 = vld [vmem:[#allocation22_spill] sm:$0xff] }
 0x446   : > { %v4537_v57 = vsub.f32 0.0, %v4091_v55  ;;  %v4728_v13 = vadd.f32 1.0, %v7169_v36 }
 0x447   : > { %v4652_v16 = vmul.f32 1.442695, %v4544_v51  ;;  %v6146_v51 = vld [vmem:[#allocation6 + $0x318] sm:$0xf0] }
 0x448   : > { %v7171_v58 = vpop.eup %7170  ;;  %v4638_v60 = vmul.f32 1.442695, %v4537_v57  ;;  %4288 = vmatmul.bf16.gmra.mxu3 %v8187_v48 }
 0x449   : > { %v7173_v63 = vpop.eup %7172  ;;  %v4725_v0 = vadd.f32 1.0, %v7171_v58  ;;  %v4117_v59 = vpop.f32.mrf.mxu0 }
 0x44a   : > { %7176 = vpow2.f32 %v4638_v60  ;;  %v4859_v42 = vmul.f32 %v7173_v63, %v8377_v52  ;;  %v4118_v62 = vadd.f32 %v4117_v59, %v8461_v45  ;;  %v6497_v63 = vld [vmem:[#allocation6 + $0x30c] sm:$0xf] }
 0x44b   : > { %7178 = vrcp.f32 %v4725_v0  ;;  %v4166_v47 = vpop.f32.mrf.mxu1  ;;  %v4093_v43 = vpop.f32.mrf.mxu3  ;;  %v4548_v0 = vsub.f32 0.0, %v8321_v4 }
 0x44c   : > { %7180 = vpow2.f32 %v4644_v1  ;;  %v4094_v8 = vadd.f32 %v4093_v43, %v8409_v32  ;;  %v4056_v24 = vpop.f32.mrf.mxu2  ;;  %v8469_v9 = vadd.f32 %v4859_v42, %v4858_v14  ;;  %v4167_v25 = vadd.f32 %v4166_v47, %v4118_v62  ;;  %4312 = vmatmul.bf16.vlgmr.msra.gmra.mxu0 %v7938_v46  ;;  %v7175_v54 = vpop.eup %7174 }
 0x44d   : > { %v8472_v19 = vadd.f32 %v4056_v24, %v4008_v3  ;;  %7182 = vrcp.f32 %v4728_v13  ;;  %v4862_v1 = vmul.f32 %v7175_v54, %v8374_v10  ;;  %v6149_v42 = vor.u32 %v6497_v63, %v6146_v51  ;;  %v8877_v51 = vld [vmem:[#allocation12_spill] sm:$0xff] }
 0x44e   : > { %v4541_v55 = vsub.f32 0.0, %v4094_v8  ;;  %4361 = vmatmul.bf16.vlgmr.msra.gmra.mxu1 %v8006_v56  ;;  %7184 = vpow2.f32 %v4652_v16  ;;  %v4660_v54 = vmul.f32 1.442695, %v4548_v0 }
 0x44f   : > { %4458 = vmatpush.bf16.msra.mxu3 %v6149_v42 }
 0x450   : > { %v7177_v28 = vpop.eup %7176  ;;  %v4646_v34 = vmul.f32 1.442695, %v4541_v55  ;;  %4410 = vmatmul.bf16.vlgmr.msra.gmra.mxu2 %v8875_v22 }
 0x451   : > { %v7179_v57 = vpop.eup %7178  ;;  %v4729_v32 = vadd.f32 1.0, %v7177_v28  ;;  %v4119_v58 = vpop.f32.mrf.mxu0 }
 0x452   : > { %v7181_v36 = vpop.eup %7180  ;;  %7186 = vpow2.f32 %v4646_v34  ;;  %v4863_v46 = vmul.f32 %v7179_v57, %v8377_v52  ;;  %v4120_v3 = vadd.f32 %v4119_v58, %v8461_v45  ;;  %v8876_v34 = vld [vmem:[#allocation14_spill] sm:$0xff] }
 0x453   : > { %7188 = vrcp.f32 %v4729_v32  ;;  %v4168_v56 = vpop.f32.mrf.mxu1  ;;  %v4095_v60 = vpop.f32.mrf.mxu3  ;;  %v4732_v47 = vadd.f32 1.0, %v7181_v36 }
 0x454   : > { %v4096_v59 = vadd.f32 %v4095_v60, %v8420_v6  ;;  %v4215_v14 = vpop.f32.mrf.mxu2  ;;  %v8481_v62 = vadd.f32 %v4863_v46, %v4862_v1  ;;  %v4169_v43 = vadd.f32 %v4168_v56, %v4120_v3  ;;  %v7183_v8 = vpop.eup %7182  ;;  %v4552_v1 = vsub.f32 0.0, %v8329_v11 }
 0x455   : > { %v8483_v13 = vadd.f32 %v4215_v14, %v4167_v25  ;;  %v7185_v16 = vpop.eup %7184  ;;  %7190 = vrcp.f32 %v4732_v47  ;;  %v4866_v57 = vmul.f32 %v7183_v8, %v8374_v10  ;;  %v8878_v14 = vld [vmem:[#allocation17_spill] sm:$0xff] }
 0x456   : > { %v4545_v24 = vsub.f32 0.0, %v4096_v59  ;;  %v4736_v60 = vadd.f32 1.0, %v7185_v16  ;;  %v4668_v8 = vmul.f32 1.442695, %v4552_v1 }
 0x458   : > { %v7187_v55 = vpop.eup %7186  ;;  %v4654_v28 = vmul.f32 1.442695, %v4545_v24  ;;  %4293 = vmatmul.bf16.gmra.mxu3 %v8876_v34 }
 0x459   : > { %v7189_v4 = vpop.eup %7188  ;;  %v4733_v6 = vadd.f32 1.0, %v7187_v55  ;;  %v4122_v22 = vpop.f32.mrf.mxu0  ;;  %v8879_v55 = vld [vmem:[#allocation23_spill] sm:$0xff] }
 0x45a   : > { %7192 = vpow2.f32 %v4654_v28  ;;  %v4867_v32 = vmul.f32 %v7189_v4, %v8377_v52  ;;  %v4123_v25 = vadd.f32 %v4122_v22, %v8461_v45 }
 0x45b   : > { %7194 = vrcp.f32 %v4733_v6  ;;  %v4171_v36 = vpop.f32.mrf.mxu1  ;;  %v4098_v58 = vpop.f32.mrf.mxu3 }
 0x45c   : > { %7196 = vpow2.f32 %v4660_v54  ;;  %v4099_v46 = vadd.f32 %v4098_v58, %v8431_v26  ;;  %v4217_v3 = vpop.f32.mrf.mxu2  ;;  %v8491_v56 = vadd.f32 %v4867_v32, %v4866_v57  ;;  %v4172_v63 = vadd.f32 %v4171_v36, %v4123_v25  ;;  %4317 = vmatmul.bf16.gmra.mxu0 %v8877_v51  ;;  %v7191_v42 = vpop.eup %7190 }
 0x45d   : > { %v8494_v0 = vadd.f32 %v4217_v3, %v4169_v43  ;;  %7198 = vrcp.f32 %v4736_v60  ;;  %v4870_v28 = vmul.f32 %v7191_v42, %v8374_v10  ;;  %v4556_v57 = vsub.f32 0.0, %v8336_v20 }
 0x45e   : > { %v4549_v59 = vsub.f32 0.0, %v4099_v46  ;;  %4366 = vmatmul.bf16.gmra.mxu1 %v8878_v14 }
 0x460   : > { %v7193_v47 = vpop.eup %7192  ;;  %v4662_v24 = vmul.f32 1.442695, %v4549_v59  ;;  %4415 = vmatmul.bf16.gmra.mxu2 %v8879_v55  ;;  %v4676_v59 = vmul.f32 1.442695, %v4556_v57  ;;  %v8880_v57 = vld [vmem:[#allocation18_spill] sm:$0xff] }
 0x461   : > { %v7195_v11 = vpop.eup %7194  ;;  %v4737_v26 = vadd.f32 1.0, %v7193_v47  ;;  %v4124_v16 = vpop.f32.mrf.mxu0 }
 0x462   : > { %v7197_v54 = vpop.eup %7196  ;;  %7200 = vpow2.f32 %v4662_v24  ;;  %v4871_v43 = vmul.f32 %v7195_v11, %v8377_v52  ;;  %v4125_v4 = vadd.f32 %v4124_v16, %v8461_v45 }
 0x463   : > { %7202 = vrcp.f32 %v4737_v26  ;;  %v4173_v6 = vpop.f32.mrf.mxu1  ;;  %v4100_v22 = vpop.f32.mrf.mxu3  ;;  %v4740_v58 = vadd.f32 1.0, %v7197_v54  ;;  %v4560_v26 = vsub.f32 0.0, %v8346_v41 }
 0x464   : > { %7204 = vpow2.f32 %v4668_v8  ;;  %v4101_v32 = vadd.f32 %v4100_v22, %v8442_v39  ;;  %v4220_v25 = vpop.f32.mrf.mxu2  ;;  %v8503_v36 = vadd.f32 %v4871_v43, %v4870_v28  ;;  %v4174_v1 = vadd.f32 %v4173_v6, %v4125_v4  ;;  %v7199_v60 = vpop.eup %7198 }
 0x465   : > { %v8505_v46 = vadd.f32 %v4220_v25, %v4172_v63  ;;  %7206 = vrcp.f32 %v4740_v58  ;;  %v4874_v8 = vmul.f32 %v7199_v60, %v8374_v10  ;;  %v4684_v58 = vmul.f32 1.442695, %v4560_v26  ;;  %v8881_v60 = vld [vmem:[#allocation24_spill] sm:$0xff] }
 0x466   : > { %v4553_v3 = vsub.f32 0.0, %v4101_v32 }
 0x468   : > { %v7201_v51 = vpop.eup %7200  ;;  %v4670_v14 = vmul.f32 1.442695, %v4553_v3  ;;  %4298 = vmatmul.bf16.gmra.mxu3 %v8212_v50 }
 0x469   : > { %v7203_v42 = vpop.eup %7202  ;;  %v4741_v47 = vadd.f32 1.0, %v7201_v51  ;;  %v4127_v39 = vpop.f32.mrf.mxu0 }
 0x46a   : > { %v7205_v20 = vpop.eup %7204  ;;  %7208 = vpow2.f32 %v4670_v14  ;;  %v4875_v24 = vmul.f32 %v7203_v42, %v8377_v52  ;;  %v4128_v63 = vadd.f32 %v4127_v39, %v8461_v45 }
 0x46b   : > { %7210 = vrcp.f32 %v4741_v47  ;;  %v4176_v55 = vpop.f32.mrf.mxu1  ;;  %v4103_v11 = vpop.f32.mrf.mxu3  ;;  %v4744_v43 = vadd.f32 1.0, %v7205_v20 }
 0x46c   : > { %7212 = vpow2.f32 %v4676_v59  ;;  %v4104_v54 = vadd.f32 %v4103_v11, %v8453_v53  ;;  %v4222_v16 = vpop.f32.mrf.mxu2  ;;  %v8513_v28 = vadd.f32 %v4875_v24, %v4874_v8  ;;  %v4177_v4 = vadd.f32 %v4176_v55, %v4128_v63  ;;  %4322 = vmatmul.bf16.gmra.mxu0 %v7955_v18  ;;  %v7207_v32 = vpop.eup %7206 }
 0x46d   : > { %v8516_v6 = vadd.f32 %v4222_v16, %v4174_v1  ;;  %7214 = vrcp.f32 %v4744_v43  ;;  %v4878_v14 = vmul.f32 %v7207_v32, %v8374_v10 }
 0x46e   : > { %v4557_v22 = vsub.f32 0.0, %v4104_v54  ;;  %4371 = vmatmul.bf16.gmra.mxu1 %v8880_v57 }
 0x470   : > { %v7209_v25 = vpop.eup %7208  ;;  %v4678_v3 = vmul.f32 1.442695, %v4557_v22  ;;  %4420 = vmatmul.bf16.gmra.mxu2 %v8881_v60 }
 0x471   : > { %v7211_v41 = vpop.eup %7210  ;;  %v4745_v53 = vadd.f32 1.0, %v7209_v25  ;;  %v4129_v59 = vpop.f32.mrf.mxu0 }
 0x472   : > { %v7213_v51 = vpop.eup %7212  ;;  %7216 = vpow2.f32 %v4678_v3  ;;  %v4879_v18 = vmul.f32 %v7211_v41, %v8377_v52  ;;  %v4130_v1 = vadd.f32 %v4129_v59, %v8461_v45 }
 0x473   : > { %7218 = vrcp.f32 %v4745_v53  ;;  %v4178_v42 = vpop.f32.mrf.mxu1  ;;  %v4105_v47 = vpop.f32.mrf.mxu3  ;;  %v4748_v24 = vadd.f32 1.0, %v7213_v51 }
 0x474   : > { %7220 = vpow2.f32 %v4684_v58  ;;  %v4106_v20 = vadd.f32 %v4105_v47, %v8472_v19  ;;  %v4225_v39 = vpop.f32.mrf.mxu2  ;;  %v8524_v8 = vadd.f32 %v4879_v18, %v4878_v14  ;;  %v4179_v63 = vadd.f32 %v4178_v42, %v4130_v1  ;;  %v7215_v26 = vpop.eup %7214  ;;  %v8882_v18 = vld [vmem:[#allocation19_spill] sm:$0xff] }
 0x475   : > { %v8526_v55 = vadd.f32 %v4225_v39, %v4177_v4  ;;  %7222 = vrcp.f32 %v4748_v24  ;;  %v4882_v19 = vmul.f32 %v7215_v26, %v8374_v10 }
 0x476   : > { %v4561_v11 = vsub.f32 0.0, %v4106_v20  ;;  %v8883_v20 = vld [vmem:[#allocation25_spill] sm:$0xff] }
 0x478   : > { %v7217_v54 = vpop.eup %7216  ;;  %v4686_v16 = vmul.f32 1.442695, %v4561_v11  ;;  %4459 = vmatmul.bf16.vlgmr.msra.gmra.mxu3 %v8142_v29 }
 0x479   : > { %v7219_v43 = vpop.eup %7218  ;;  %v4749_v22 = vadd.f32 1.0, %v7217_v54  ;;  %v4132_v32 = vpop.f32.mrf.mxu0 }
 0x47a   : > { %v7221_v57 = vpop.eup %7220  ;;  %7224 = vpow2.f32 %v4686_v16  ;;  %v4883_v25 = vmul.f32 %v7219_v43, %v8377_v52  ;;  %v4133_v4 = vadd.f32 %v4132_v32, %v8461_v45 }
 0x47b   : > { %7226 = vrcp.f32 %v4749_v22  ;;  %v4181_v58 = vpop.f32.mrf.mxu1  ;;  %v4264_v3 = vpop.f32.mrf.mxu3  ;;  %v4752_v29 = vadd.f32 1.0, %v7221_v57 }
 0x47c   : > { %v4265_v60 = vadd.f32 %v4264_v3, %v8483_v13  ;;  %v4227_v41 = vpop.f32.mrf.mxu2  ;;  %v8533_v53 = vadd.f32 %v4883_v25, %v4882_v19  ;;  %v4182_v51 = vadd.f32 %v4181_v58, %v4133_v4  ;;  %4327 = vmatmul.bf16.gmra.mxu0 %v7963_v31  ;;  %v7223_v1 = vpop.eup %7222  ;;  %v8884_v3 = vld [vmem:[#allocation28_spill] sm:$0xff] }
 0x47d   : > { %v8536_v59 = vadd.f32 %v4227_v41, %v4179_v63  ;;  %7228 = vrcp.f32 %v4752_v29  ;;  %v4886_v11 = vmul.f32 %v7223_v1, %v8374_v10 }
 0x47e   : > { %v4502_v14 = vsub.f32 0.0, %v4265_v60  ;;  %4376 = vmatmul.bf16.gmra.mxu1 %v8882_v18 }
 0x480   : > { %v7225_v42 = vpop.eup %7224  ;;  %v4568_v47 = vmul.f32 1.442695, %v4502_v14  ;;  %4425 = vmatmul.bf16.gmra.mxu2 %v8883_v20 }
 0x481   : > { %v7227_v39 = vpop.eup %7226  ;;  %v4753_v13 = vadd.f32 1.0, %v7225_v42  ;;  %v4134_v24 = vpop.f32.mrf.mxu0 }
 0x482   : > { %7230 = vpow2.f32 %v4568_v47  ;;  %v4887_v26 = vmul.f32 %v7227_v39, %v8377_v52  ;;  %v4135_v31 = vadd.f32 %v4134_v24, %v8461_v45 }
 0x483   : > { %7232 = vrcp.f32 %v4753_v13  ;;  %v4183_v63 = vpop.f32.mrf.mxu1  ;;  %v4266_v54 = vpop.f32.mrf.mxu3  ;;  %v8885_v13 = vld [vmem:[#allocation13_spill] sm:$0xff] }
 0x484   : > { %v4267_v16 = vadd.f32 %v4266_v54, %v8494_v0  ;;  %v4230_v43 = vpop.f32.mrf.mxu2  ;;  %v8544_v22 = vadd.f32 %v4887_v26, %v4886_v11  ;;  %v4184_v57 = vadd.f32 %v4183_v63, %v4135_v31  ;;  %v7229_v25 = vpop.eup %7228  ;;  %v8886_v26 = vld [vmem:[#allocation20_spill] sm:$0xff]  ;;  %v8887_v63 = vld [vmem:[#allocation26_spill] sm:$0xff] }
 0x485   : > { %v8546_v32 = vadd.f32 %v4230_v43, %v4182_v51  ;;  %v4890_v14 = vmul.f32 %v7229_v25, %v8374_v10  ;;  %v8562_v10 = vld [vmem:[%s8823_s7] sm:$0xf] }
 0x486   : > { %v4506_v19 = vsub.f32 0.0, %v4267_v16 }
 0x488   : > { %v7231_v4 = vpop.eup %7230  ;;  %v4576_v58 = vmul.f32 1.442695, %v4506_v19  ;;  %4464 = vmatmul.bf16.gmra.mxu3 %v8884_v3 }
 0x489   : > { %v7233_v60 = vpop.eup %7232  ;;  %v4694_v41 = vadd.f32 1.0, %v7231_v4  ;;  %v4137_v29 = vpop.f32.mrf.mxu0 }
 0x48a   : > { %7234 = vpow2.f32 %v4576_v58  ;;  %v4891_v0 = vmul.f32 %v7233_v60, %v8377_v52  ;;  %v4138_v18 = vadd.f32 %v4137_v29, %v8461_v45  ;;  %v8565_v52 = vperm.slane %v8562_v10, 2 }
 0x48b   : > { %7236 = vrcp.f32 %v4694_v41  ;;  %v4186_v1 = vpop.f32.mrf.mxu1  ;;  %v4269_v51 = vpop.f32.mrf.mxu3 }
 0x48c   : > { %v4270_v42 = vadd.f32 %v4269_v51, %v8505_v46  ;;  %v4232_v47 = vpop.f32.mrf.mxu2  ;;  %v8553_v20 = vadd.f32 %v4891_v0, %v4890_v14  ;;  %v4187_v39 = vadd.f32 %v4186_v1, %v4138_v18  ;;  %4332 = vmatmul.bf16.gmra.mxu0 %v8885_v13 }
 0x48d   : > { %v8556_v24 = vadd.f32 %v4232_v47, %v4184_v57 }
 0x48e   : > { %v4510_v11 = vsub.f32 0.0, %v4270_v42  ;;  %4381 = vmatmul.bf16.gmra.mxu1 %v8886_v26 }
 0x490   : > { %v7235_v46 = vpop.eup %7234  ;;  %v4584_v31 = vmul.f32 1.442695, %v4510_v11  ;;  %4430 = vmatmul.bf16.gmra.mxu2 %v8887_v63  ;;  %v8888_v63 = vld [vmem:[#allocation21_spill] sm:$0xff] }
 0x491   : > { %v7237_v54 = vpop.eup %7236  ;;  %v4698_v16 = vadd.f32 1.0, %v7235_v46  ;;  %v4139_v43 = vpop.f32.mrf.mxu0 }
 0x492   : > { %7238 = vpow2.f32 %v4584_v31  ;;  %v4832_v57 = vmul.f32 %v7237_v54, %v8565_v52  ;;  %v4140_v19 = vadd.f32 %v4139_v43, %v8461_v45  ;;  %v8889_v43 = vld [vmem:[#allocation27_spill] sm:$0xff] }
 0x493   : > { %7240 = vrcp.f32 %v4698_v16  ;;  %v4188_v25 = vpop.f32.mrf.mxu1  ;;  %v4271_v4 = vpop.f32.mrf.mxu3 }
 0x494   : > { %v4272_v58 = vadd.f32 %v4271_v4, %v8516_v6  ;;  %v4235_v3 = vpop.f32.mrf.mxu2  ;;  %v8572_v60 = vadd.f32 %v8385_v37, %v4832_v57  ;;  %v4189_v41 = vadd.f32 %v4188_v25, %v4140_v19 }
 0x495   : > { %v8574_v29 = vadd.f32 %v4235_v3, %v4187_v39 }
 0x496   : > { %v4514_v14 = vsub.f32 0.0, %v4272_v58 }
 0x498   : > { %v7239_v0 = vpop.eup %7238  ;;  %v4592_v18 = vmul.f32 1.442695, %v4514_v14  ;;  %4469 = vmatmul.bf16.gmra.mxu3 %v8158_v21 }
 0x499   : > { %v7241_v1 = vpop.eup %7240  ;;  %v4702_v51 = vadd.f32 1.0, %v7239_v0  ;;  %v4142_v42 = vpop.f32.mrf.mxu0 }
 0x49a   : > { %7242 = vpow2.f32 %v4592_v18  ;;  %v4836_v47 = vmul.f32 %v7241_v1, %v8565_v52  ;;  %v4143_v6 = vadd.f32 %v4142_v42, %v8461_v45 }
 0x49b   : > { %7244 = vrcp.f32 %v4702_v51  ;;  %v4191_v13 = vpop.f32.mrf.mxu1  ;;  %v4274_v37 = vpop.f32.mrf.mxu3 }
 0x49c   : > { %v4275_v11 = vadd.f32 %v4274_v37, %v8526_v55  ;;  %v4237_v39 = vpop.f32.mrf.mxu2  ;;  %v8581_v26 = vadd.f32 %v8395_v7, %v4836_v47  ;;  %v4192_v46 = vadd.f32 %v4191_v13, %v4143_v6  ;;  %4337 = vmatmul.bf16.gmra.mxu0 %v8869_v40 }
 0x49d   : > { %v8584_v21 = vadd.f32 %v4237_v39, %v4189_v41 }
 0x49e   : > { %v4518_v31 = vsub.f32 0.0, %v4275_v11  ;;  %4386 = vmatmul.bf16.gmra.mxu1 %v8888_v63 }
 0x4a0   : > { %v7243_v54 = vpop.eup %7242  ;;  %v4600_v16 = vmul.f32 1.442695, %v4518_v31  ;;  %4435 = vmatmul.bf16.gmra.mxu2 %v8889_v43 }
 0x4a1   : > { %v7245_v57 = vpop.eup %7244  ;;  %v4706_v19 = vadd.f32 1.0, %v7243_v54  ;;  %v4144_v55 = vpop.f32.mrf.mxu0 }
 0x4a2   : > { %7246 = vpow2.f32 %v4600_v16  ;;  %v4840_v25 = vmul.f32 %v7245_v57, %v8565_v52  ;;  %v4145_v7 = vadd.f32 %v4144_v55, %v8461_v45 }
 0x4a3   : > { %7248 = vrcp.f32 %v4706_v19  ;;  %v4193_v4 = vpop.f32.mrf.mxu1  ;;  %v4276_v40 = vpop.f32.mrf.mxu3 }
 0x4a4   : > { %v4277_v58 = vadd.f32 %v4276_v40, %v8536_v59  ;;  %v4240_v3 = vpop.f32.mrf.mxu2  ;;  %v8592_v41 = vadd.f32 %v8407_v35, %v4840_v25  ;;  %v4194_v14 = vadd.f32 %v4193_v4, %v4145_v7 }
 0x4a5   : > { %v8594_v0 = vadd.f32 %v4240_v3, %v4192_v46 }
 0x4a6   : > { %v4522_v18 = vsub.f32 0.0, %v4277_v58 }
 0x4a8   : > { %v7247_v1 = vpop.eup %7246  ;;  %v4608_v51 = vmul.f32 1.442695, %v4522_v18  ;;  %4474 = vmatmul.bf16.gmra.mxu3 %v8166_v12 }
 0x4a9   : > { %v7249_v42 = vpop.eup %7248  ;;  %v4710_v47 = vadd.f32 1.0, %v7247_v1  ;;  %v4147_v6 = vpop.f32.mrf.mxu0 }
 0x4aa   : > { %7250 = vpow2.f32 %v4608_v51  ;;  %v4844_v13 = vmul.f32 %v7249_v42, %v8565_v52  ;;  %v4148_v59 = vadd.f32 %v4147_v6, %v8461_v45 }
 0x4ab   : > { %7252 = vrcp.f32 %v4710_v47  ;;  %v4196_v37 = vpop.f32.mrf.mxu1  ;;  %v4279_v35 = vpop.f32.mrf.mxu3 }
 0x4ac   : > { %v4280_v11 = vadd.f32 %v4279_v35, %v8546_v32  ;;  %v4242_v39 = vpop.f32.mrf.mxu2  ;;  %v8601_v46 = vadd.f32 %v8417_v27, %v4844_v13  ;;  %v4197_v31 = vadd.f32 %v4196_v37, %v4148_v59  ;;  %4342 = vmatmul.bf16.gmra.mxu0 %v8870_v61 }
 0x4ad   : > { %v8604_v12 = vadd.f32 %v4242_v39, %v4194_v14 }
 0x4ae   : > { %v4526_v63 = vsub.f32 0.0, %v4280_v11  ;;  %4391 = vmatmul.bf16.gmra.mxu1 %v8062_v2 }
 0x4b0   : > { %v7251_v54 = vpop.eup %7250  ;;  %v4616_v16 = vmul.f32 1.442695, %v4526_v63  ;;  %4440 = vmatmul.bf16.gmra.mxu2 %v8128_v5 }
 0x4b1   : > { %v7253_v43 = vpop.eup %7252  ;;  %v4714_v57 = vadd.f32 1.0, %v7251_v54  ;;  %v4149_v32 = vpop.f32.mrf.mxu0 }
 0x4b2   : > { %7254 = vpow2.f32 %v4616_v16  ;;  %v4848_v19 = vmul.f32 %v7253_v43, %v8565_v52  ;;  %v4150_v27 = vadd.f32 %v4149_v32, %v8461_v45 }
 0x4b3   : > { %7256 = vrcp.f32 %v4714_v57  ;;  %v4198_v55 = vpop.f32.mrf.mxu1  ;;  %v4281_v61 = vpop.f32.mrf.mxu3 }
 0x4b4   : > { %v4282_v25 = vadd.f32 %v4281_v61, %v8556_v24  ;;  %v4245_v7 = vpop.f32.mrf.mxu2  ;;  %v8612_v2 = vadd.f32 %v8429_v44, %v4848_v19  ;;  %v4199_v4 = vadd.f32 %v4198_v55, %v4150_v27 }
 0x4b5   : > { %v8614_v40 = vadd.f32 %v4245_v7, %v4197_v31 }
 0x4b6   : > { %v4530_v5 = vsub.f32 0.0, %v4282_v25 }
 0x4b8   : > { %v7255_v58 = vpop.eup %7254  ;;  %v4624_v3 = vmul.f32 1.442695, %v4530_v5  ;;  %4479 = vmatmul.bf16.gmra.mxu3 %v8174_v30 }
 0x4b9   : > { %v7257_v14 = vpop.eup %7256  ;;  %v4718_v18 = vadd.f32 1.0, %v7255_v58  ;;  %v4152_v1 = vpop.f32.mrf.mxu0 }
 0x4ba   : > { %7258 = vpow2.f32 %v4624_v3  ;;  %v4852_v51 = vmul.f32 %v7257_v14, %v8565_v52  ;;  %v4153_v24 = vadd.f32 %v4152_v1, %v8461_v45 }
 0x4bb   : > { %7260 = vrcp.f32 %v4718_v18  ;;  %v4201_v42 = vpop.f32.mrf.mxu1  ;;  %v4284_v44 = vpop.f32.mrf.mxu3 }
 0x4bc   : > { %v4285_v47 = vadd.f32 %v4284_v44, %v8574_v29  ;;  %v4247_v6 = vpop.f32.mrf.mxu2  ;;  %v8621_v13 = vadd.f32 %v8439_v49, %v4852_v51  ;;  %v4202_v59 = vadd.f32 %v4201_v42, %v4153_v24  ;;  %4347 = vmatmul.bf16.gmra.mxu0 %v8871_v38 }
 0x4bd   : > { %v8624_v30 = vadd.f32 %v4247_v6, %v4199_v4 }
 0x4be   : > { %v4534_v37 = vsub.f32 0.0, %v4285_v47  ;;  %4396 = vmatmul.bf16.gmra.mxu1 %v8070_v23 }
 0x4c0   : > { %v7259_v35 = vpop.eup %7258  ;;  %v4632_v11 = vmul.f32 1.442695, %v4534_v37  ;;  %4445 = vmatmul.bf16.gmra.mxu2 %v8135_v33 }
 0x4c1   : > { %v7261_v39 = vpop.eup %7260  ;;  %v4722_v31 = vadd.f32 1.0, %v7259_v35  ;;  %v4154_v29 = vpop.f32.mrf.mxu0 }
 0x4c2   : > { %7262 = vpow2.f32 %v4632_v11  ;;  %v4856_v63 = vmul.f32 %v7261_v39, %v8565_v52  ;;  %v4155_v49 = vadd.f32 %v4154_v29, %v8461_v45 }
 0x4c3   : > { %7264 = vrcp.f32 %v4722_v31  ;;  %v4286_v54 = vpop.f32.mrf.mxu3  ;;  %v4203_v38 = vpop.f32.mrf.mxu1 }
 0x4c4   : > { %v4287_v16 = vadd.f32 %v4286_v54, %v8584_v21  ;;  %v4250_v43 = vpop.f32.mrf.mxu2  ;;  %v8632_v23 = vadd.f32 %v8451_v15, %v4856_v63  ;;  %v4204_v57 = vadd.f32 %v4203_v38, %v4155_v49 }
 0x4c5   : > { %v8634_v32 = vadd.f32 %v4250_v43, %v4202_v59 }
 0x4c6   : > { %v4538_v33 = vsub.f32 0.0, %v4287_v16 }
 0x4c8   : > { %v7263_v19 = vpop.eup %7262  ;;  %v4640_v27 = vmul.f32 1.442695, %v4538_v33  ;;  %4484 = vmatmul.bf16.gmra.mxu3 %v8187_v48 }
 0x4c9   : > { %v7265_v55 = vpop.eup %7264  ;;  %v4726_v61 = vadd.f32 1.0, %v7263_v19  ;;  %v4313_v1 = vpop.f32.mrf.mxu0 }
 0x4ca   : > { %7266 = vpow2.f32 %v4640_v27  ;;  %v4860_v45 = vmul.f32 %v7265_v55, %v8565_v52 }
 0x4cb   : > { %7268 = vrcp.f32 %v4726_v61  ;;  %v4289_v25 = vpop.f32.mrf.mxu3  ;;  %v4362_v44 = vpop.f32.mrf.mxu1 }
 0x4cc   : > { %v4290_v21 = vadd.f32 %v4289_v25, %v8594_v0  ;;  %v4252_v7 = vpop.f32.mrf.mxu2  ;;  %v8640_v15 = vadd.f32 %v8469_v9, %v4860_v45 }
 0x4cd   : > { %v8642_v4 = vadd.f32 %v4252_v7, %v4204_v57 }
 0x4ce   : > { %v4542_v5 = vsub.f32 0.0, %v4290_v21 }
 0x4d0   : > { %v7267_v58 = vpop.eup %7266  ;;  %v4648_v3 = vmul.f32 1.442695, %v4542_v5 }
 0x4d1   : > { %v7269_v14 = vpop.eup %7268  ;;  %v4730_v48 = vadd.f32 1.0, %v7267_v58 }
 0x4d2   : > { %7270 = vpow2.f32 %v4648_v3  ;;  %v4864_v18 = vmul.f32 %v7269_v14, %v8565_v52  ;;  %v8667_v3 = vperm.slane %v8458_v17, 3 }
 0x4d3   : > { %7272 = vrcp.f32 %v4730_v48  ;;  %v4291_v51 = vpop.f32.mrf.mxu3 }
 0x4d4   : > { %v4292_v24 = vadd.f32 %v4291_v51, %v8604_v12  ;;  %v8647_v0 = vadd.f32 %v8481_v62, %v4864_v18  ;;  %v4411_v37 = vpop.f32.mrf.mxu2  ;;  %v4315_v62 = vpop.f32.mrf.mxu0 }
 0x4d6   : > { %v4546_v9 = vsub.f32 0.0, %v4292_v24 }
 0x4d8   : > { %v7271_v42 = vpop.eup %7270  ;;  %v4656_v47 = vmul.f32 1.442695, %v4546_v9  ;;  %4489 = vmatmul.bf16.gmra.mxu3 %v8876_v34  ;;  %v4364_v34 = vpop.f32.mrf.mxu1 }
 0x4d9   : > { %v7273_v6 = vpop.eup %7272  ;;  %v4734_v59 = vadd.f32 1.0, %v7271_v42 }
 0x4da   : > { %7274 = vpow2.f32 %v4656_v47  ;;  %v4868_v35 = vmul.f32 %v7273_v6, %v8565_v52 }
 0x4db   : > { %7276 = vrcp.f32 %v4734_v59  ;;  %v4294_v11 = vpop.f32.mrf.mxu3 }
 0x4dc   : > { %v4295_v39 = vadd.f32 %v4294_v11, %v8614_v40  ;;  %v8653_v12 = vadd.f32 %v8491_v56, %v4868_v35  ;;  %v4413_v16 = vpop.f32.mrf.mxu2  ;;  %v4318_v33 = vpop.f32.mrf.mxu0 }
 0x4de   : > { %v4550_v31 = vsub.f32 0.0, %v4295_v39 }
 0x4e0   : > { %v7275_v29 = vpop.eup %7274  ;;  %v4664_v63 = vmul.f32 1.442695, %v4550_v31  ;;  %v4367_v21 = vpop.f32.mrf.mxu1 }
 0x4e1   : > { %v7277_v49 = vpop.eup %7276  ;;  %v4738_v54 = vadd.f32 1.0, %v7275_v29 }
 0x4e2   : > { %7278 = vpow2.f32 %v4664_v63  ;;  %v4872_v38 = vmul.f32 %v7277_v49, %v8565_v52 }
 0x4e3   : > { %7280 = vrcp.f32 %v4738_v54  ;;  %v4296_v43 = vpop.f32.mrf.mxu3 }
 0x4e4   : > { %v4297_v57 = vadd.f32 %v4296_v43, %v8624_v30  ;;  %v8658_v40 = vadd.f32 %v8503_v36, %v4872_v38  ;;  %v4416_v36 = vpop.f32.mrf.mxu2  ;;  %v4320_v48 = vpop.f32.mrf.mxu0 }
 0x4e6   : > { %v4554_v56 = vsub.f32 0.0, %v4297_v57 }
 0x4e8   : > { %v7279_v19 = vpop.eup %7278  ;;  %v4672_v27 = vmul.f32 1.442695, %v4554_v56  ;;  %4494 = vmatmul.bf16.gmra.mxu3 %v8212_v50  ;;  %v4369_v42 = vpop.f32.mrf.mxu1 }
 0x4e9   : > { %v7281_v55 = vpop.eup %7280  ;;  %v4742_v61 = vadd.f32 1.0, %v7279_v19 }
 0x4ea   : > { %7282 = vpow2.f32 %v4672_v27  ;;  %v4876_v45 = vmul.f32 %v7281_v55, %v8565_v52 }
 0x4eb   : > { %7284 = vrcp.f32 %v4742_v61  ;;  %v4299_v25 = vpop.f32.mrf.mxu3 }
 0x4ec   : > { %v4300_v7 = vadd.f32 %v4299_v25, %v8634_v32  ;;  %v8664_v30 = vadd.f32 %v8513_v28, %v4876_v45  ;;  %v4314_v32 = vadd.f32 %v4313_v1, %v8667_v3  ;;  %v4418_v17 = vpop.f32.mrf.mxu2  ;;  %v4323_v63 = vpop.f32.mrf.mxu0 }
 0x4ee   : > { %v4558_v5 = vsub.f32 0.0, %v4300_v7  ;;  %v4363_v59 = vadd.f32 %v4362_v44, %v4314_v32 }
 0x4f0   : > { %v7283_v58 = vpop.eup %7282  ;;  %v4680_v50 = vmul.f32 1.442695, %v4558_v5  ;;  %v4412_v31 = vadd.f32 %v4411_v37, %v4363_v59  ;;  %v4372_v44 = vpop.f32.mrf.mxu1 }
 0x4f1   : > { %v7285_v14 = vpop.eup %7284  ;;  %v4746_v18 = vadd.f32 1.0, %v7283_v58 }
 0x4f2   : > { %7286 = vpow2.f32 %v4680_v50  ;;  %v4880_v51 = vmul.f32 %v7285_v14, %v8565_v52 }
 0x4f3   : > { %7288 = vrcp.f32 %v4746_v18  ;;  %v4301_v24 = vpop.f32.mrf.mxu3 }
 0x4f4   : > { %v4302_v28 = vadd.f32 %v4301_v24, %v8642_v4  ;;  %v8673_v9 = vadd.f32 %v8524_v8, %v4880_v51  ;;  %v4316_v4 = vadd.f32 %v4315_v62, %v8667_v3  ;;  %v4421_v37 = vpop.f32.mrf.mxu2  ;;  %v4319_v62 = vadd.f32 %v4318_v33, %v8667_v3  ;;  %v4325_v25 = vpop.f32.mrf.mxu0 }
 0x4f5   : > { %v4321_v33 = vadd.f32 %v4320_v48, %v8667_v3 }
 0x4f6   : > { %v4562_v47 = vsub.f32 0.0, %v4302_v28  ;;  %v4365_v43 = vadd.f32 %v4364_v34, %v4316_v4  ;;  %v4368_v5 = vadd.f32 %v4367_v21, %v4319_v62  ;;  %v8691_v21 = vperm.slane %v8562_v10, 3 }
 0x4f8   : > { %v7287_v6 = vpop.eup %7286  ;;  %v4688_v35 = vmul.f32 1.442695, %v4562_v47  ;;  %v4414_v27 = vadd.f32 %v4413_v16, %v4365_v43  ;;  %v4417_v18 = vadd.f32 %v4416_v36, %v4368_v5  ;;  %v4374_v16 = vpop.f32.mrf.mxu1  ;;  %v4370_v36 = vadd.f32 %v4369_v42, %v4321_v33 }
 0x4f9   : > { %v7289_v11 = vpop.eup %7288  ;;  %v4750_v39 = vadd.f32 1.0, %v7287_v6 }
 0x4fa   : > { %7290 = vpow2.f32 %v4688_v35  ;;  %v4884_v29 = vmul.f32 %v7289_v11, %v8565_v52 }
 0x4fb   : > { %7292 = vrcp.f32 %v4750_v39  ;;  %v4460_v1 = vpop.f32.mrf.mxu3 }
 0x4fc   : > { %v4461_v49 = vadd.f32 %v4460_v1, %v4412_v31  ;;  %v8678_v8 = vadd.f32 %v8533_v53, %v4884_v29  ;;  %v4423_v24 = vpop.f32.mrf.mxu2  ;;  %v4328_v6 = vpop.f32.mrf.mxu0  ;;  %v4324_v29 = vadd.f32 %v4323_v63, %v8667_v3  ;;  %v4326_v63 = vadd.f32 %v4325_v25, %v8667_v3 }
 0x4fd   : > { %v4329_v25 = vadd.f32 %v4328_v6, %v8667_v3 }
 0x4fe   : > { %v4503_v54 = vsub.f32 0.0, %v4461_v49  ;;  %v4373_v42 = vadd.f32 %v4372_v44, %v4324_v29 }
 0x500   : > { %v7291_v38 = vpop.eup %7290  ;;  %v4570_v57 = vmul.f32 1.442695, %v4503_v54 }
 0x501   : > { %v7293_v56 = vpop.eup %7292  ;;  %v4754_v19 = vadd.f32 1.0, %v7291_v38 }
 0x502   : > { %7294 = vpow2.f32 %v4570_v57  ;;  %v4888_v55 = vmul.f32 %v7293_v56, %v8565_v52  ;;  %v4422_v56 = vadd.f32 %v4421_v37, %v4373_v42 }
 0x503   : > { %7296 = vrcp.f32 %v4754_v19  ;;  %v4462_v61 = vpop.f32.mrf.mxu3 }
 0x504   : > { %v4463_v45 = vadd.f32 %v4462_v61, %v4414_v27  ;;  %v8683_v53 = vadd.f32 %v8544_v22, %v4888_v55  ;;  %v4426_v10 = vpop.f32.mrf.mxu2  ;;  %v4330_v57 = vpop.f32.mrf.mxu0 }
 0x505   : > { %v4331_v6 = vadd.f32 %v4330_v57, %v8667_v3 }
 0x506   : > { %v4507_v7 = vsub.f32 0.0, %v4463_v45 }
 0x508   : > { %v7295_v34 = vpop.eup %7294  ;;  %v4578_v58 = vmul.f32 1.442695, %v4507_v7  ;;  %v4375_v7 = vadd.f32 %v4374_v16, %v4326_v63 }
 0x509   : > { %v7297_v50 = vpop.eup %7296  ;;  %v4695_v14 = vadd.f32 1.0, %v7295_v34 }
 0x50a   : > { %7298 = vpow2.f32 %v4578_v58  ;;  %v4892_v51 = vmul.f32 %v7297_v50, %v8565_v52  ;;  %v4419_v52 = vadd.f32 %v4418_v17, %v4370_v36  ;;  %v4424_v37 = vadd.f32 %v4423_v24, %v4375_v7 }
 0x50b   : > { %7300 = vrcp.f32 %v4695_v14  ;;  %v4465_v32 = vpop.f32.mrf.mxu3 }
 0x50c   : > { %v4466_v28 = vadd.f32 %v4465_v32, %v4417_v18  ;;  %v8688_v22 = vadd.f32 %v8553_v20, %v4892_v51  ;;  %v4377_v20 = vpop.f32.mrf.mxu1  ;;  %v4428_v45 = vpop.f32.mrf.mxu2 }
 0x50d   : > { %v4333_v14 = vpop.f32.mrf.mxu0 }
 0x50e   : > { %v4511_v47 = vsub.f32 0.0, %v4466_v28  ;;  %v4378_v28 = vadd.f32 %v4377_v20, %v4329_v25  ;;  %v4334_v57 = vadd.f32 %v4333_v14, %v8667_v3 }
 0x510   : > { %v7299_v59 = vpop.eup %7298  ;;  %v4586_v35 = vmul.f32 1.442695, %v4511_v47 }
 0x511   : > { %v7301_v11 = vpop.eup %7300  ;;  %v4699_v39 = vadd.f32 1.0, %v7299_v59 }
 0x512   : > { %7302 = vpow2.f32 %v4586_v35  ;;  %v4833_v31 = vmul.f32 %v7301_v11, %v8691_v21  ;;  %v4427_v35 = vadd.f32 %v4426_v10, %v4378_v28 }
 0x513   : > { %7304 = vrcp.f32 %v4699_v39  ;;  %v4467_v48 = vpop.f32.mrf.mxu3 }
 0x514   : > { %v4468_v1 = vadd.f32 %v4467_v48, %v4419_v52  ;;  %v4896_v4 = vadd.f32 %v8572_v60, %v4833_v31  ;;  %v4379_v61 = vpop.f32.mrf.mxu1  ;;  %v4431_v36 = vpop.f32.mrf.mxu2 }
 0x515   : > { %v4335_v31 = vpop.f32.mrf.mxu0  ;;  %v4380_v20 = vadd.f32 %v4379_v61, %v4331_v6 }
 0x516   : > { %v4515_v49 = vsub.f32 0.0, %v4468_v1  ;;  %4897 = vadd.xlane.f32.xlu0 %v4896_v4 }
 0x518   : > { %v7303_v54 = vpop.eup %7302  ;;  %v4594_v38 = vmul.f32 1.442695, %v4515_v49 }
 0x519   : > { %v7305_v43 = vpop.eup %7304  ;;  %v4703_v17 = vadd.f32 1.0, %v7303_v54  ;;  %v4429_v54 = vadd.f32 %v4428_v45, %v4380_v20 }
 0x51a   : > { %7306 = vpow2.f32 %v4594_v38  ;;  %v4837_v19 = vmul.f32 %v7305_v43, %v8691_v21 }
 0x51b   : > { %7308 = vrcp.f32 %v4703_v17  ;;  %v4470_v27 = vpop.f32.mrf.mxu3 }
 0x51c   : > { %v4471_v55 = vadd.f32 %v4470_v27, %v4422_v56  ;;  %v4901_v60 = vadd.f32 %v8581_v26, %v4837_v19  ;;  %v4382_v16 = vpop.f32.mrf.mxu1  ;;  %v4433_v38 = vpop.f32.mrf.mxu2 }
 0x51d   : > { %v4338_v19 = vpop.f32.mrf.mxu0  ;;  %v4383_v63 = vadd.f32 %v4382_v16, %v4334_v57 }
 0x51e   : > { %v4519_v62 = vsub.f32 0.0, %v4471_v55  ;;  %4902 = vadd.xlane.f32.xlu0 %v4901_v60  ;;  %v4974_v60 = vld [vmem:[#allocation2] sm:$0x1] }
 0x51f   : > { %6528 = vpush %v4974_v60  ;;  %v4432_v45 = vadd.f32 %v4431_v36, %v4383_v63 }
 0x520   : > { %v7307_v44 = vpop.eup %7306  ;;  %v4602_v34 = vmul.f32 1.442695, %v4519_v62 }
 0x521   : > { %v7309_v5 = vpop.eup %7308  ;;  %v4707_v58 = vadd.f32 1.0, %v7307_v44 }
 0x522   : > { %7310 = vpow2.f32 %v4602_v34  ;;  %v4841_v50 = vmul.f32 %v7309_v5, %v8691_v21  ;;  %v4336_v34 = vadd.f32 %v4335_v31, %v8667_v3 }
 0x523   : > { %7312 = vrcp.f32 %v4707_v58  ;;  %v4472_v18 = vpop.f32.mrf.mxu3 }
 0x524   : > { %v4473_v51 = vadd.f32 %v4472_v18, %v4424_v37  ;;  %v4906_v26 = vadd.f32 %v8592_v41, %v4841_v50  ;;  %v4384_v10 = vpop.f32.mrf.mxu1  ;;  %v4436_v37 = vpop.f32.mrf.mxu2 }
 0x525   : > { %v4385_v18 = vadd.f32 %v4384_v10, %v4336_v34 }
 0x526   : > { %v4523_v32 = vsub.f32 0.0, %v4473_v51  ;;  %4907 = vadd.xlane.f32.xlu1 %v4906_v26  ;;  %v4340_v26 = vpop.f32.mrf.mxu0 }
 0x528   : > { %v7311_v33 = vpop.eup %7310  ;;  %v4610_v47 = vmul.f32 1.442695, %v4523_v32 }
 0x529   : > { %v7313_v59 = vpop.eup %7312  ;;  %v4711_v24 = vadd.f32 1.0, %v7311_v33  ;;  %v4434_v33 = vadd.f32 %v4433_v38, %v4385_v18 }
 0x52a   : > { %7314 = vpow2.f32 %v4610_v47  ;;  %v4845_v11 = vmul.f32 %v7313_v59, %v8691_v21  ;;  %v4339_v47 = vadd.f32 %v4338_v19, %v8667_v3 }
 0x52b   : > { %7316 = vrcp.f32 %v4711_v24  ;;  %v4475_v39 = vpop.f32.mrf.mxu3 }
 0x52c   : > { %v4476_v52 = vadd.f32 %v4475_v39, %v4427_v35  ;;  %v4911_v41 = vadd.f32 %v8601_v46, %v4845_v11  ;;  %v4387_v5 = vpop.f32.mrf.mxu1  ;;  %v4438_v35 = vpop.f32.mrf.mxu2 }
 0x52d   : > { %v4388_v39 = vadd.f32 %v4387_v5, %v4339_v47 }
 0x52e   : > { %v4527_v48 = vsub.f32 0.0, %v4476_v52  ;;  %4912 = vadd.xlane.f32.xlu1 %v4911_v41 }
 0x52f   : > { %v4437_v31 = vadd.f32 %v4436_v37, %v4388_v39 }
 0x530   : > { %v7315_v29 = vpop.eup %7314  ;;  %v4618_v1 = vmul.f32 1.442695, %v4527_v48 }
 0x531   : > { %v7317_v4 = vpop.eup %7316  ;;  %v4715_v49 = vadd.f32 1.0, %v7315_v29  ;;  %v4343_v29 = vpop.f32.mrf.mxu0 }
 0x532   : > { %7318 = vpow2.f32 %v4618_v1  ;;  %v4849_v42 = vmul.f32 %v7317_v4, %v8691_v21  ;;  %v4341_v1 = vadd.f32 %v4340_v26, %v8667_v3 }
 0x533   : > { %7320 = vrcp.f32 %v4715_v49  ;;  %v4477_v43 = vpop.f32.mrf.mxu3 }
 0x534   : > { %v4478_v17 = vadd.f32 %v4477_v43, %v4429_v54  ;;  %v4916_v46 = vadd.f32 %v8612_v2, %v4849_v42  ;;  %v4389_v36 = vpop.f32.mrf.mxu1  ;;  %v4441_v57 = vpop.f32.mrf.mxu2 }
 0x535   : > { %v4390_v10 = vadd.f32 %v4389_v36, %v4341_v1 }
 0x536   : > { %v4531_v56 = vsub.f32 0.0, %v4478_v17  ;;  %4917 = vadd.xlane.f32.xlu2 %v4916_v46 }
 0x537   : > { %v4439_v46 = vadd.f32 %v4438_v35, %v4390_v10 }
 0x538   : > { %v7319_v27 = vpop.eup %7318  ;;  %v4626_v55 = vmul.f32 1.442695, %v4531_v56 }
 0x539   : > { %v7321_v61 = vpop.eup %7320  ;;  %v4719_v62 = vadd.f32 1.0, %v7319_v27  ;;  %v4344_v27 = vadd.f32 %v4343_v29, %v8667_v3 }
 0x53a   : > { %7322 = vpow2.f32 %v4626_v55  ;;  %v4853_v44 = vmul.f32 %v7321_v61, %v8691_v21  ;;  %v4345_v55 = vpop.f32.mrf.mxu0 }
 0x53b   : > { %7324 = vrcp.f32 %v4719_v62  ;;  %v4480_v7 = vpop.f32.mrf.mxu3 }
 0x53c   : > { %v4481_v2 = vadd.f32 %v4480_v7, %v4432_v45  ;;  %v4921_v58 = vadd.f32 %v8621_v13, %v4853_v44  ;;  %v4392_v42 = vpop.f32.mrf.mxu1 }
 0x53d   : > { %v4393_v62 = vadd.f32 %v4392_v42, %v4344_v27 }
 0x53e   : > { %v4535_v50 = vsub.f32 0.0, %v4481_v2  ;;  %4922 = vadd.xlane.f32.xlu2 %v4921_v58  ;;  %v4443_v58 = vpop.f32.mrf.mxu2 }
 0x53f   : > { %v4442_v5 = vadd.f32 %v4441_v57, %v4393_v62 }
 0x540   : > { %v7323_v14 = vpop.eup %7322  ;;  %v4634_v25 = vmul.f32 1.442695, %v4535_v50  ;;  %v4346_v50 = vadd.f32 %v4345_v55, %v8667_v3 }
 0x541   : > { %v7325_v51 = vpop.eup %7324  ;;  %v4723_v32 = vadd.f32 1.0, %v7323_v14 }
 0x542   : > { %7326 = vpow2.f32 %v4634_v25  ;;  %v4857_v28 = vmul.f32 %v7325_v51, %v8691_v21  ;;  %v4348_v25 = vpop.f32.mrf.mxu0 }
 0x543   : > { %7328 = vrcp.f32 %v4723_v32  ;;  %v4482_v16 = vpop.f32.mrf.mxu3 }
 0x544   : > { %v4483_v59 = vadd.f32 %v4482_v16, %v4434_v33  ;;  %v4926_v13 = vadd.f32 %v8632_v23, %v4857_v28  ;;  %v4394_v34 = vpop.f32.mrf.mxu1 }
 0x545   : > { %v4395_v26 = vadd.f32 %v4394_v34, %v4346_v50 }
 0x546   : > { %v4539_v24 = vsub.f32 0.0, %v4483_v59  ;;  %4927 = vadd.xlane.f32.xlu0 %v4926_v13  ;;  %v4349_v13 = vadd.f32 %v4348_v25, %v8667_v3  ;;  %v4446_v35 = vpop.f32.mrf.mxu2  ;;  %v5009_v25 = vlaneseq }
 0x547   : > { %v4444_v16 = vadd.f32 %v4443_v58, %v4395_v26 }
 0x548   : > { %v7327_v11 = vpop.eup %7326  ;;  %v4642_v6 = vmul.f32 1.442695, %v4539_v24 }
 0x549   : > { %v7329_v52 = vpop.eup %7328  ;;  %v4727_v41 = vadd.f32 1.0, %v7327_v11 }
 0x54a   : > { %7330 = vpow2.f32 %v4642_v6  ;;  %v4861_v48 = vmul.f32 %v7329_v52, %v8691_v21 }
 0x54b   : > { %7332 = vrcp.f32 %v4727_v41  ;;  %v4485_v20 = vpop.f32.mrf.mxu3 }
 0x54c   : > { %v4486_v4 = vadd.f32 %v4485_v20, %v4437_v31  ;;  %v4931_v23 = vadd.f32 %v8640_v15, %v4861_v48  ;;  %v4350_v31 = vpop.f32.mrf.mxu0 }
 0x54e   : > { %v4543_v49 = vsub.f32 0.0, %v4486_v4  ;;  %4932 = vadd.xlane.f32.xlu1 %v4931_v23  ;;  %v4351_v4 = vadd.f32 %v4350_v31, %v8667_v3  ;;  %v4448_v10 = vpop.f32.mrf.mxu2 }
 0x550   : > { %v7331_v54 = vpop.eup %7330  ;;  %v4650_v38 = vmul.f32 1.442695, %v4543_v49  ;;  %s6529_s25 = spop %6528 }
 0x551   : > { %v7333_v43 = vpop.eup %7332  ;;  %v4731_v17 = vadd.f32 1.0, %v7331_v54 }
 0x552   : > { %7334 = vpow2.f32 %v4650_v38  ;;  %v4865_v56 = vmul.f32 %v7333_v43, %v8691_v21 }
 0x553   : > { %7336 = vrcp.f32 %v4731_v17  ;;  %v4487_v19 = vpop.f32.mrf.mxu3 }
 0x554   : > { %v4488_v63 = vadd.f32 %v4487_v19, %v4439_v46  ;;  %v4936_v15 = vadd.f32 %v8647_v0, %v4865_v56 }
 0x556   : > { %v4547_v60 = vsub.f32 0.0, %v4488_v63  ;;  %4937 = vadd.xlane.f32.xlu2 %v4936_v15 }
 0x558   : > { %v7335_v61 = vpop.eup %7334  ;;  %v4658_v45 = vmul.f32 1.442695, %v4547_v60 }
 0x559   : > { %v7337_v44 = vpop.eup %7336  ;;  %v4735_v7 = vadd.f32 1.0, %v7335_v61 }
 0x55a   : > { %7338 = vpow2.f32 %v4658_v45  ;;  %v4869_v2 = vmul.f32 %v7337_v44, %v8691_v21 }
 0x55b   : > { %7340 = vrcp.f32 %v4735_v7  ;;  %v4490_v37 = vpop.f32.mrf.mxu3 }
 0x55c   : > { %v4491_v14 = vadd.f32 %v4490_v37, %v4442_v5  ;;  %v4941_v0 = vadd.f32 %v8653_v12, %v4869_v2  ;;  %v4397_v12 = vpop.f32.mrf.mxu1 }
 0x55d   : > { %v4398_v6 = vadd.f32 %v4397_v12, %v4349_v13 }
 0x55e   : > { %v4551_v18 = vsub.f32 0.0, %v4491_v14  ;;  %4942 = vadd.xlane.f32.xlu0 %v4941_v0 }
 0x55f   : > { %v4447_v29 = vadd.f32 %v4446_v35, %v4398_v6 }
 0x560   : > { %v7339_v51 = vpop.eup %7338  ;;  %v4666_v32 = vmul.f32 1.442695, %v4551_v18 }
 0x561   : > { %v7341_v33 = vpop.eup %7340  ;;  %v4739_v28 = vadd.f32 1.0, %v7339_v51 }
 0x562   : > { %7342 = vpow2.f32 %v4666_v32  ;;  %v4873_v47 = vmul.f32 %v7341_v33, %v8691_v21  ;;  %v8737_v33 = vand.u32 127, %v5009_v25 }
 0x563   : > { %7344 = vrcp.f32 %v4739_v28  ;;  %v4492_v59 = vpop.f32.mrf.mxu3 }
 0x564   : > { %v4493_v36 = vadd.f32 %v4492_v59, %v4444_v16  ;;  %v4946_v24 = vadd.f32 %v8658_v40, %v4873_v47  ;;  %v4399_v54 = vpop.f32.mrf.mxu1  ;;  %v5016_v16 = vadd.s32 4294967280, %v8737_v33  ;;  %v5020_v59 = vadd.s32 4294967272, %v8737_v33 }
 0x565   : > { %v4400_v38 = vadd.f32 %v4399_v54, %v4351_v4  ;;  %v5024_v35 = vadd.s32 4294967264, %v8737_v33  ;;  %v5028_v31 = vadd.s32 4294967256, %v8737_v33  ;;  %v5040_v54 = vadd.s32 4294967232, %v8737_v33 }
 0x566   : > { %v4555_v11 = vsub.f32 0.0, %v4493_v36  ;;  %4947 = vadd.xlane.f32.xlu1 %v4946_v24  ;;  %v5068_v25 = vadd.s32 4294967176, %v8737_v33 }
 0x567   : > { %v4449_v46 = vadd.f32 %v4448_v10, %v4400_v38 }
 0x568   : > { %v7343_v39 = vpop.eup %7342  ;;  %v4674_v52 = vmul.f32 1.442695, %v4555_v11 }
 0x569   : > { %v7345_v41 = vpop.eup %7344  ;;  %v4743_v48 = vadd.f32 1.0, %v7343_v39 }
 0x56a   : > { %7346 = vpow2.f32 %v4674_v52  ;;  %v4877_v20 = vmul.f32 %v7345_v41, %v8691_v21 }
 0x56b   : > { %7348 = vrcp.f32 %v4743_v48  ;;  %v4495_v1 = vpop.f32.mrf.mxu3 }
 0x56c   : > { %v4496_v23 = vadd.f32 %v4495_v1, %v4447_v29  ;;  %v4951_v40 = vadd.f32 %v8664_v30, %v4877_v20  ;;  %v5032_v20 = vadd.s32 4294967248, %v8737_v33 }
 0x56e   : > { %v4559_v49 = vsub.f32 0.0, %v4496_v23  ;;  %4952 = vadd.xlane.f32.xlu2 %v4951_v40  ;;  %v5036_v23 = vadd.s32 4294967240, %v8737_v33 }
 0x570   : > { %v7347_v42 = vpop.eup %7346  ;;  %v4682_v43 = vmul.f32 1.442695, %v4559_v49 }
 0x571   : > { %v7349_v57 = vpop.eup %7348  ;;  %v4747_v17 = vadd.f32 1.0, %v7347_v42 }
 0x572   : > { %7350 = vpow2.f32 %v4682_v43  ;;  %v4881_v56 = vmul.f32 %v7349_v57, %v8691_v21  ;;  %v5044_v43 = vadd.s32 4294967224, %v8737_v33 }
 0x573   : > { %7352 = vrcp.f32 %v4747_v17  ;;  %v4497_v19 = vpop.f32.mrf.mxu3 }
 0x574   : > { %v4498_v27 = vadd.f32 %v4497_v19, %v4449_v46  ;;  %v4956_v3 = vadd.f32 %v8673_v9, %v4881_v56  ;;  %v5048_v56 = vadd.s32 4294967216, %v8737_v33 }
 0x576   : > { %v4563_v63 = vsub.f32 0.0, %v4498_v27  ;;  %4957 = vadd.xlane.f32.xlu0 %v4956_v3 }
 0x578   : > { %v7351_v30 = vpop.eup %7350  ;;  %v4690_v15 = vmul.f32 1.442695, %v4563_v63 }
 0x579   : > { %v7353_v55 = vpop.eup %7352  ;;  %v4751_v60 = vadd.f32 1.0, %v7351_v30  ;;  %v5052_v30 = vadd.s32 4294967208, %v8737_v33 }
 0x57a   : > { %7354 = vpow2.f32 %v4690_v15  ;;  %v4885_v61 = vmul.f32 %v7353_v55, %v8691_v21 }
 0x57b   : > { %7356 = vrcp.f32 %v4751_v60 }
 0x57c   : > { %v4961_v62 = vadd.f32 %v8678_v8, %v4885_v61  ;;  %v5056_v61 = vadd.s32 4294967200, %v8737_v33 }
 0x57e   : > { %4962 = vadd.xlane.f32.xlu1 %v4961_v62 }
 0x580   : > { %v7355_v45 = vpop.eup %7354 }
 0x581   : > { %v7357_v44 = vpop.eup %7356  ;;  %v4755_v7 = vadd.f32 1.0, %v7355_v45 }
 0x582   : > { %v4889_v34 = vmul.f32 %v7357_v44, %v8691_v21 }
 0x583   : > { %7358 = vrcp.f32 %v4755_v7  ;;  %v5060_v7 = vadd.s32 4294967192, %v8737_v33 }
 0x584   : > { %v4966_v9 = vadd.f32 %v8683_v53, %v4889_v34  ;;  %v8739_v53 = vstv %s6529_s25 }
 0x586   : > { %4967 = vadd.xlane.f32.xlu2 %v4966_v9 }
 0x589   : > { %v7359_v5 = vpop.eup %7358  ;;  %v4898_v37 = vpop.xlane.xlu0 %4897 }
 0x58a   : > { %v4893_v2 = vmul.f32 %v7359_v5, %v8691_v21  ;;  %v5012_v21 = vadd.s32 4294967288, %v8737_v33  ;;  %v4977_v28 = vadd.f32 %v8739_v53, %v4898_v37 }
 0x58c   : > { %v4971_v58 = vadd.f32 %v8688_v22, %v4893_v2  ;;  %v5011_v6 = vperm.slane %v4977_v28, %v8737_v33  ;;  %v5064_v2 = vadd.s32 4294967184, %v8737_v33 }
 0x58e   : > { %4972 = vadd.xlane.f32.xlu0 %v4971_v58 }
 0x591   : > { %v4903_v8 = vpop.xlane.xlu0 %4902 }
 0x592   : > { %v4978_v22 = vadd.f32 %v8739_v53, %v4903_v8 }
 0x594   : > { %v5013_v24 = vperm.slane %v4978_v22, %v5012_v21 }
 0x596   : > { %v5015_v29 = vsel %vm5014_vm1, %v5013_v24, %v5011_v6 }
 0x599   : > { %v4908_v50 = vpop.xlane.xlu1 %4907 }
 0x59a   : > { %v4979_v47 = vadd.f32 %v8739_v53, %v4908_v50 }
 0x59c   : > { %v5017_v52 = vperm.slane %v4979_v47, %v5016_v16 }
 0x59e   : > { %v5019_v49 = vsel %vm5018_vm2, %v5017_v52, %v5015_v29 }
 0x5a1   : > { %v4913_v0 = vpop.xlane.xlu1 %4912 }
 0x5a2   : > { %v4980_v13 = vadd.f32 %v8739_v53, %v4913_v0 }
 0x5a4   : > { %v5021_v41 = vperm.slane %v4980_v13, %v5020_v59 }
 0x5a6   : > { %v5023_v42 = vsel %vm5022_vm3, %v5021_v41, %v5019_v49 }
 0x5a9   : > { %v4918_v14 = vpop.xlane.xlu2 %4917 }
 0x5aa   : > { %v4981_v11 = vadd.f32 %v8739_v53, %v4918_v14 }
 0x5ac   : > { %v5025_v4 = vperm.slane %v4981_v11, %v5024_v35 }
 0x5ae   : > { %v5027_v3 = vsel %vm5026_vm4, %v5025_v4, %v5023_v42 }
 0x5b1   : > { %v4923_v18 = vpop.xlane.xlu2 %4922 }
 0x5b2   : > { %v4982_v48 = vadd.f32 %v8739_v53, %v4923_v18 }
 0x5b4   : > { %v5029_v38 = vperm.slane %v4982_v48, %v5028_v31 }
 0x5b6   : > { %v5031_v45 = vsel %vm5030_vm5, %v5029_v38, %v5027_v3 }
 0x5b9   : > { %v4928_v51 = vpop.xlane.xlu0 %4927 }
 0x5ba   : > { %v4983_v1 = vadd.f32 %v8739_v53, %v4928_v51 }
 0x5bc   : > { %v5033_v46 = vperm.slane %v4983_v1, %v5032_v20 }
 0x5be   : > { %v5035_v9 = vsel %vm5034_vm6, %v5033_v46, %v5031_v45 }
 0x5c1   : > { %v4933_v26 = vpop.xlane.xlu1 %4932 }
 0x5c2   : > { %v4984_v40 = vadd.f32 %v8739_v53, %v4933_v26 }
 0x5c4   : > { %v5037_v63 = vperm.slane %v4984_v40, %v5036_v23 }
 0x5c6   : > { %v5039_v37 = vsel %vm5038_vm7, %v5037_v63, %v5035_v9 }
 0x5c9   : > { %v4938_v32 = vpop.xlane.xlu2 %4937 }
 0x5ca   : > { %v4985_v10 = vadd.f32 %v8739_v53, %v4938_v32 }
 0x5cc   : > { %v5041_v60 = vperm.slane %v4985_v10, %v5040_v54 }
 0x5ce   : > { %v5043_v14 = vsel %vm5042_vm8, %v5041_v60, %v5039_v37 }
 0x5d1   : > { %v4943_v36 = vpop.xlane.xlu0 %4942 }
 0x5d2   : > { %v4986_v57 = vadd.f32 %v8739_v53, %v4943_v36 }
 0x5d4   : > { %v5045_v44 = vperm.slane %v4986_v57, %v5044_v43 }
 0x5d6   : > { %v5047_v0 = vsel %vm5046_vm9, %v5045_v44, %v5043_v14 }
 0x5d9   : > { %v4948_v12 = vpop.xlane.xlu1 %4947 }
 0x5da   : > { %v4987_v19 = vadd.f32 %v8739_v53, %v4948_v12 }
 0x5dc   : > { %v5049_v5 = vperm.slane %v4987_v19, %v5048_v56 }
 0x5de   : > { %v5051_v51 = vsel %vm5050_vm10, %v5049_v5, %v5047_v0 }
 0x5e1   : > { %v4953_v39 = vpop.xlane.xlu2 %4952 }
 0x5e2   : > { %v4988_v15 = vadd.f32 %v8739_v53, %v4953_v39 }
 0x5e4   : > { %v5053_v50 = vperm.slane %v4988_v15, %v5052_v30 }
 0x5e6   : > { %v5055_v21 = vsel %vm5054_vm11, %v5053_v50, %v5051_v51 }
 0x5e9   : > { %v4958_v17 = vpop.xlane.xlu0 %4957 }
 0x5ea   : > { %v4989_v62 = vadd.f32 %v8739_v53, %v4958_v17 }
 0x5ec   : > { %v5057_v8 = vperm.slane %v4989_v62, %v5056_v61 }
 0x5ee   : > { %v5059_v28 = vsel %vm5058_vm12, %v5057_v8, %v5055_v21 }
 0x5f1   : > { %v4963_v27 = vpop.xlane.xlu1 %4962 }
 0x5f2   : > { %v4990_v34 = vadd.f32 %v8739_v53, %v4963_v27 }
 0x5f4   : > { %v5061_v18 = vperm.slane %v4990_v34, %v5060_v7 }
 0x5f6   : > { %v5063_v16 = vsel %vm5062_vm13, %v5061_v18, %v5059_v28 }
 0x5f9   : > { %v4968_v55 = vpop.xlane.xlu2 %4967 }
 0x5fa   : > { %v4991_v58 = vadd.f32 %v8739_v53, %v4968_v55 }
 0x5fc   : > { %v5065_v26 = vperm.slane %v4991_v58, %v5064_v2 }
 0x5fe   : > { %v5067_v59 = vsel %vm5066_vm14, %v5065_v26, %v5063_v16 }
 0x601   : > { %v4973_v32 = vpop.xlane.xlu0 %4972 }
 0x602   : > { %v4992_v22 = vadd.f32 %v8739_v53, %v4973_v32 }
 0x604   : > { %v5069_v47 = vperm.slane %v4992_v22, %v5068_v25 }
 0x606   : > { %v5071_v33 = vsel %vm5070_vm15, %v5069_v47, %v5067_v59 }
 0x607   : > { %5073 = vst [vmem:[%s361_s27] sm:$0x1] %v5071_v33 }
 0x608   : > { %7450 = shalt.err (!%p7447_p8)
}
 0x609   : > { %6538 = dma.vmem_to_hbm [thread:$0]  (%p7590_p5), %s5086_s28, 16, %s5088_s8, %s5075_s29  }
 0x60a PF: > { %p6555_p9 = scmp.ge.s32.totalorder %s7493_s14, 2  ;;  %s5099_s15 = sand.u32 1, %s7481_s11  }
 0x60b   : > { %s5100_s26 = scalar_lea.sflag [#allocation5], %s5099_s15 }
 0x60c   : > { %p6548_p10 = pnand %p6555_p9, %p7594_p6 }
 0x60e   : > { %p6549_p11 = pneg %p6548_p10 }
 0x610   : > { %7476 = dma.done.wait (%p6549_p11), %s5100_s26, 16  }
 0x611   : > { %7478 = vsyncadd (%p6549_p11), %s5100_s26, 4294967280  ;;  %p23_p12 = scmp.ge.s32.totalorder %s7577_s16, 4   ;;  %s8890_s11 = smov %s7485_s12 }
 0x612   : > { %s8891_s12 = smov %s7489_s13  ;;  %s8892_s13 = smov %s7588_s19 }
 0x613   : > { %s8893_s14 = smov %s7577_s16  ;;  %25 = sbr.rel (!%p23_p12) target bundleno = 8 (0x8), region = 100 }
 0x618   :  { %5105 = vsyncpa [#allocation4], 1 }
 0x619   :  { %5107 = vsyncpa [#allocation4 + $0x1], 1 }
 0x61a   :  { %5108 = vsyncpa [#allocation7], 1 }
 0x61b   :  { %5109 = vsyncpa [#allocation5], 1 }
 0x61c   :  { %5111 = vsyncpa [#allocation5 + $0x1], 1 }

</bundles_post_ra>
